<compile_context>
chip_gen: v7x
topology: tpu7x:2x2x1
jax: 0.10.0
libtpu: 0.0.40
codegen_flags: <defaults>
</compile_context>

<pallas_src>
import functools

import jax
import jax.numpy as jnp
from jax.experimental import pallas as pl
from jax.experimental.pallas import tpu as pltpu

_VMEM_LIMIT = 48 * 1024 * 1024   # fits v7x's 64 MiB physical VMEM, above v5e/v6e scoped defaults


# ----------------------------------------------------------------------------
# in-kernel helpers
# ----------------------------------------------------------------------------
def _layernorm(x, g, b, eps=1e-5):
    mu = jnp.mean(x, axis=-1, keepdims=True)
    var = jnp.mean((x - mu) ** 2, axis=-1, keepdims=True)
    return (x - mu) * jax.lax.rsqrt(var + eps) * g + b


def _gelu(y):
    # TODO(synk): PyTorch F.gelu is the exact erf GELU; tanh approximation used here.
    c = 0.7978845608028654
    return 0.5 * y * (1.0 + jnp.tanh(c * (y + 0.044715 * y * y * y)))


def _self_attention(xln, wqkv_ref, bqkv_ref, wo_ref, bo_ref, *, num_head, d_model):
    """Fused-head MHA on an (L, d) tile.

    QKV computed with ONE (L,d)x(d,3d) bf16 matmul; per-head softmax on static lane slices;
    heads concatenated into (L, d) before a single (L,d)x(d,d) bf16 output projection.
    The 1/sqrt(hd) scale is folded into wq/bq at weight-prep time.
    """
    hd = d_model // num_head
    qkv = jnp.dot(xln.astype(jnp.bfloat16), wqkv_ref[...],
                  preferred_element_type=jnp.float32) + bqkv_ref[...]      # (L, 3d) f32
    heads = []
    for h in range(num_head):                                              # small nh -> unrolled
        q = qkv[:, h * hd:(h + 1) * hd]
        k = qkv[:, d_model + h * hd:d_model + (h + 1) * hd]
        v = qkv[:, 2 * d_model + h * hd:2 * d_model + (h + 1) * hd]
        s = jax.lax.dot_general(q.astype(jnp.bfloat16), k.astype(jnp.bfloat16),
                                (((1,), (1,)), ((), ())),
                                preferred_element_type=jnp.float32)        # (L, L)
        m = jnp.max(s, axis=-1, keepdims=True)
        e = jnp.exp(s - m)
        p = e * pl.reciprocal(jnp.sum(e, axis=-1, keepdims=True), approx=True)
        heads.append(jnp.dot(p.astype(jnp.bfloat16), v.astype(jnp.bfloat16),
                             preferred_element_type=jnp.float32))          # (L, hd)
    ctx = jnp.concatenate(heads, axis=-1)                                  # (L, d)
    return jnp.dot(ctx.astype(jnp.bfloat16), wo_ref[...],
                   preferred_element_type=jnp.float32) + bo_ref[...]


# ----------------------------------------------------------------------------
# kernel 1: reference path  (grid over the nk reference frames)
# ----------------------------------------------------------------------------
def _ref_path_kernel(x_ref, gt_ref, ln1g_ref, ln1b_ref, wqkv_ref, bqkv_ref, wo_ref, bo_ref,
                     ln2g_ref, ln2b_ref, lqw_ref, lqb_ref, lvw_ref, lvb_ref,
                     kv_out_ref, *, num_head, d_model, bs, HW):
    # TODO(synk): at production Lr = bs*HW (4-8k), tile this flash-style over query blocks with
    # an online softmax instead of materialising the full (Lr, Lr) score matrix.
    x = x_ref[0].astype(jnp.float32)                        # (Lr, d)
    xln1 = _layernorm(x, ln1g_ref[...], ln1b_ref[...])
    attn = _self_attention(xln1, wqkv_ref, bqkv_ref, wo_ref, bo_ref,
                           num_head=num_head, d_model=d_model)
    xp = x + attn                                           # DropPath == identity (eval)
    xln2 = _layernorm(xp, ln2g_ref[...], ln2b_ref[...])
    k_sup = jnp.dot(xln2.astype(jnp.bfloat16), lqw_ref[...],
                    preferred_element_type=jnp.float32) + lqb_ref[...]
    v_sup = jnp.dot((k_sup + gt_ref[0].astype(jnp.float32)).astype(jnp.bfloat16),
                    lvw_ref[...], preferred_element_type=jnp.float32) + lvb_ref[...]
    kv = jnp.concatenate([k_sup, v_sup], axis=-1)           # (Lr, 2d): packed K/V, lane-denser
    kv_out_ref[...] = kv.astype(kv_out_ref.dtype).reshape(bs, 1, HW, 2 * d_model)


# ----------------------------------------------------------------------------
# kernel 2: target path + FFN, fused  (grid over batch)
# ----------------------------------------------------------------------------
def _tgt_ffn_kernel(x_ref, kv_ref, ln1g_ref, ln1b_ref, wqkv_ref, bqkv_ref, wo_ref, bo_ref,
                    ln2g_ref, ln2b_ref, lqw_ref, lqb_ref, pool_ref, exp_ref,
                    ln3g_ref, ln3b_ref, l1w_ref, l1b_ref, gdn_ref, gup_ref,
                    gng_ref, gnb_ref, cw_ref, l2w_ref, l2b_ref,
                    o_ref, pad_ref, *, num_head, nk, d_model, H, W, ksize):
    HW = H * W
    pd = ksize // 2
    x = x_ref[0].astype(jnp.float32)                        # (HW, d)
    xln1 = _layernorm(x, ln1g_ref[...], ln1b_ref[...])
    attn = _self_attention(xln1, wqkv_ref, bqkv_ref, wo_ref, bo_ref,
                           num_head=num_head, d_model=d_model)
    xp = x + attn                                           # tgt after self-attn residual
    xln2 = _layernorm(xp, ln2g_ref[...], ln2b_ref[...])
    # pattern-aware Q; the 1/sqrt(d) scale is folded into lqw_ref / lqb_ref in the wrapper.
    q = jnp.dot(xln2.astype(jnp.bfloat16), lqw_ref[...],
                preferred_element_type=jnp.float32) + lqb_ref[...]         # (HW, d)

    def k_of(n):
        return kv_ref[0, n].astype(jnp.float32)[:, :d_model]

    def v_of(n):
        return kv_ref[0, n].astype(jnp.float32)[:, d_model:]

    # ---- global pattern-aware: per-pixel, per-channel softmax over the nk frames,
    #      two-pass (recompute) formulation -> no nk-long lists of live (HW, d) tensors. ----
    # TODO(synk): for large nk, stream frames via an inner "arbitrary" grid axis.
    gm = q * k_of(0)
    for n in range(1, nk):
        gm = jnp.maximum(gm, q * k_of(n))
    gden = jnp.zeros_like(q)
    gacc = jnp.zeros_like(q)
    for n in range(nk):
        e = jnp.exp(q * k_of(n) - gm)
        gden = gden + e
        gacc = gacc + e * v_of(n)
    out_g = gacc * pl.reciprocal(gden, approx=True)

    # ---- local pattern-aware: matmul-pool Q/K to patch resolution, softmax per patch,
    #      ONE batched expansion matmul (HW,P)x(P, nk*d) back to pixels, weight full-res V. ----
    pool = pool_ref[...]                                    # (P, HW) bf16 averaging matrix
    qp = jnp.dot(pool, q.astype(jnp.bfloat16), preferred_element_type=jnp.float32)   # (P, d)
    kps = [jnp.dot(pool, kv_ref[0, n], preferred_element_type=jnp.float32)[:, :d_model]
           for n in range(nk)]                              # tiny (P, d) tensors
    lm = qp * kps[0]
    for n in range(1, nk):
        lm = jnp.maximum(lm, qp * kps[n])
    lden = jnp.zeros_like(qp)
    les = []
    for n in range(nk):
        e = jnp.exp(qp * kps[n] - lm)
        lden = lden + e
        les.append(e)                                       # (P, d), negligible VMEM
    linv = pl.reciprocal(lden, approx=True)
    wcat = jnp.concatenate([(e * linv).astype(jnp.bfloat16) for e in les], axis=-1)   # (P, nk*d)
    expf = jnp.dot(exp_ref[...], wcat, preferred_element_type=jnp.float32)            # (HW, nk*d)
    out_l = expf[:, 0:d_model] * v_of(0)
    for n in range(1, nk):
        out_l = out_l + expf[:, n * d_model:(n + 1) * d_model] * v_of(n)

    t = xp + out_g + out_l                                  # droppath_lst=False default

    # ---- FFN: LN3 + linear1 + GroupNorm + GELU + depthwise ksize x ksize conv + linear2 ----
    xln3 = _layernorm(t, ln3g_ref[...], ln3b_ref[...])
    h1 = jnp.dot(xln3.astype(jnp.bfloat16), l1w_ref[...],
                 preferred_element_type=jnp.float32) + l1b_ref[...]        # (HW, dff)
    dff = h1.shape[-1]

    # GroupNorm group statistics via small (dff,G) / (G,dff) projections (no dff^2 matrix);
    # 1/(Cg*H*W) is folded into gdn_ref.
    csum = jnp.sum(h1, axis=0, keepdims=True)               # (1, dff)
    cssq = jnp.sum(h1 * h1, axis=0, keepdims=True)          # (1, dff)
    mu = jnp.dot(jnp.dot(csum, gdn_ref[...], preferred_element_type=jnp.float32),
                 gup_ref[...], preferred_element_type=jnp.float32)         # (1, dff)
    ex2 = jnp.dot(jnp.dot(cssq, gdn_ref[...], preferred_element_type=jnp.float32),
                  gup_ref[...], preferred_element_type=jnp.float32)
    var = ex2 - mu * mu
    y = (h1 - mu) * jax.lax.rsqrt(var + 1e-5) * gng_ref[...] + gnb_ref[...]
    y = _gelu(y)

    # Depthwise conv, channels-last (H, W, C). Only the halo strips of the padded scratch are
    # zeroed each step (interior is fully overwritten) -- no full (H+4,W+4,dff) memset, and it
    # stays correct if the batch grid is split across cores.
    # TODO(synk): pltpu.roll for the W shifts and row-blocked conv+linear2 for production H,W,dff.
    pad_ref[0:pd, :, :] = jnp.zeros((pd, W + 2 * pd, dff), jnp.float32)
    pad_ref[pd + H:2 * pd + H, :, :] = jnp.zeros((pd, W + 2 * pd, dff), jnp.float32)
    pad_ref[pd:pd + H, 0:pd, :] = jnp.zeros((H, pd, dff), jnp.float32)
    pad_ref[pd:pd + H, pd + W:2 * pd + W, :] = jnp.zeros((H, pd, dff), jnp.float32)
    pad_ref[pd:pd + H, pd:pd + W, :] = y.reshape(H, W, dff)

    acc = jnp.zeros((H, W, dff), jnp.float32)
    for i in range(ksize):
        for j in range(ksize):
            tap = cw_ref[i * ksize + j:i * ksize + j + 1, :].reshape(1, 1, dff)
            acc = acc + pad_ref[i:i + H, j:j + W, :] * tap
    conv = acc.reshape(HW, dff)

    out2 = jnp.dot(conv.astype(jnp.bfloat16), l2w_ref[...],
                   preferred_element_type=jnp.float32) + l2b_ref[...]
    o_ref[0] = (t + out2).astype(o_ref.dtype)               # DropPath == identity (eval)


# ----------------------------------------------------------------------------
# module forward (wrapper): parameter re-layout + the two pallas_calls
# ----------------------------------------------------------------------------
def _wspec(shape):
    nd = len(shape)
    return pl.BlockSpec(shape, lambda *_: (0,) * nd)


def global_local_patrans_block(p, tgt, ref_embs, ref_gt, *, size_2d, num_head,
                               patch_num, gn_groups=32):
    HW, bs, d = tgt.shape
    H, Wsp = size_2d
    Lr, nk, _ = ref_embs.shape
    assert HW == H * Wsp and Lr == bs * HW
    dff = p['l1_w'].shape[1]
    nh = num_head
    hd = d // nh
    dt = tgt.dtype
    f32, bf16 = jnp.float32, jnp.bfloat16

    # ---- batch-leading layouts (tiny one-time transposes; heavy math is fused below) ----
    tgt_b = jnp.transpose(tgt, (1, 0, 2))                   # (bs, HW, d)
    ref_b = jnp.transpose(ref_embs, (1, 0, 2))              # (nk, Lr, d)
    gt_b = jnp.transpose(ref_gt, (1, 0, 2))                 # (nk, Lr, d)

    # ---- fused QKV weights (bf16), 1/sqrt(hd) folded into the Q slice ----
    a = p['attn']
    s_attn = 1.0 / float(hd) ** 0.5
    wqkv = jnp.concatenate([a['wq'] * s_attn, a['wk'], a['wv']], axis=1).astype(bf16)  # (d, 3d)
    bqkv = jnp.concatenate([a['bq'] * s_attn, a['bk'], a['bv']]).reshape(1, 3 * d).astype(f32)
    wo = a['wo'].astype(bf16)
    bo = a['bo'].reshape(1, d).astype(f32)

    r1 = lambda v: v.reshape(1, -1).astype(f32)
    ln1g, ln1b = r1(p['norm1_g']), r1(p['norm1_b'])
    ln2g, ln2b = r1(p['norm2_g']), r1(p['norm2_b'])
    ln3g, ln3b = r1(p['norm3_g']), r1(p['norm3_b'])
    lqb, lvb = r1(p['lq_b']), r1(p['lv_b'])
    l1b, l2b = r1(p['l1_b']), r1(p['l2_b'])
    gng, gnb = r1(p['gn_g']), r1(p['gn_b'])

    lqw = p['lq_w'].astype(bf16)                            # kernel 1: unscaled linear_Q
    lvw = p['lv_w'].astype(bf16)
    l1w = p['l1_w'].astype(bf16)
    l2w = p['l2_w'].astype(bf16)

    # pattern-aware scale 1/sqrt(d) folded into the target-path linear_Q weights only
    s_pa = 1.0 / float(d) ** 0.5
    lqw_pa = (p['lq_w'] * s_pa).astype(bf16)
    lqb_pa = (p['lq_b'] * s_pa).reshape(1, d).astype(f32)

    # ---- patch pooling / expansion matrices for the local pattern-aware attention ----
    vn = patch_num
    ph, pw = H // vn, Wsp // vn
    npatch = vn * vn
    pid = (jnp.arange(H)[:, None] // ph * vn + jnp.arange(Wsp)[None, :] // pw).reshape(HW)
    memb_pix = (pid[:, None] == jnp.arange(npatch)[None, :]).astype(f32)   # (HW, P) 0/1
    expand = memb_pix.astype(bf16)                                         # (HW, P)
    pool = (memb_pix.T / float(ph * pw)).astype(bf16)                      # (P, HW)

    # ---- GroupNorm down/up projections (replaces the dff x dff membership matrix) ----
    G = gn_groups
    Cg = dff // G
    gid = jnp.arange(dff) // Cg
    memb_ch = (gid[:, None] == jnp.arange(G)[None, :]).astype(f32)         # (dff, G) 0/1
    gdown = memb_ch / float(Cg * HW)                                       # stats + 1/cnt
    gup = jnp.transpose(memb_ch)                                           # (G, dff)

    convw = p['conv_w'].reshape(dff, 25).T.astype(f32)                     # (25, dff)

    # ===================== kernel 1: reference path =====================
    k1 = functools.partial(_ref_path_kernel, num_head=nh, d_model=d, bs=bs, HW=HW)
    kv = pl.pallas_call(
        k1,
        out_shape=jax.ShapeDtypeStruct((bs, nk, HW, 2 * d), bf16),
        grid=(nk,),
        in_specs=[
            pl.BlockSpec((1, Lr, d), lambda n: (n, 0, 0)),      # ref_embs
            pl.BlockSpec((1, Lr, d), lambda n: (n, 0, 0)),      # ref_gt
            _wspec((1, d)), _wspec((1, d)),                     # norm1
            _wspec((d, 3 * d)), _wspec((1, 3 * d)),             # fused QKV
            _wspec((d, d)), _wspec((1, d)),                     # out-proj
            _wspec((1, d)), _wspec((1, d)),                     # norm2
            _wspec((d, d)), _wspec((1, d)),                     # linear_Q
            _wspec((d, d)), _wspec((1, d)),                     # linear_V
        ],
        out_specs=pl.BlockSpec((bs, 1, HW, 2 * d), lambda n: (0, n, 0, 0)),
        compiler_params=pltpu.CompilerParams(
            dimension_semantics=("parallel",),
            vmem_limit_bytes=_VMEM_LIMIT),
    )(ref_b, gt_b, ln1g, ln1b, wqkv, bqkv, wo, bo, ln2g, ln2b, lqw, lqb, lvw, lvb)

    # ===================== kernel 2: target path + FFN (fused) =====================
    k2 = functools.partial(_tgt_ffn_kernel, num_head=nh, nk=nk, d_model=d,
                           H=H, W=Wsp, ksize=5)
    out_b = pl.pallas_call(
        k2,
        out_shape=jax.ShapeDtypeStruct((bs, HW, d), dt),
        grid=(bs,),
        in_specs=[
            pl.BlockSpec((1, HW, d), lambda b: (b, 0, 0)),          # tgt
            pl.BlockSpec((1, nk, HW, 2 * d), lambda b: (b, 0, 0, 0)),  # packed K/V (contiguous)
            _wspec((1, d)), _wspec((1, d)),                         # norm1
            _wspec((d, 3 * d)), _wspec((1, 3 * d)),                 # fused QKV
            _wspec((d, d)), _wspec((1, d)),                         # out-proj
            _wspec((1, d)), _wspec((1, d)),                         # norm2
            _wspec((d, d)), _wspec((1, d)),                         # linear_Q (PA-scaled)
            _wspec((npatch, HW)), _wspec((HW, npatch)),             # pool / expand matrices
            _wspec((1, d)), _wspec((1, d)),                         # norm3
            _wspec((d, dff)), _wspec((1, dff)),                     # linear1
            _wspec((dff, G)), _wspec((G, dff)),                     # GroupNorm down / up
            _wspec((1, dff)), _wspec((1, dff)),                     # GroupNorm gamma/beta
            _wspec((25, dff)),                                      # depthwise conv taps
            _wspec((dff, d)), _wspec((1, d)),                       # linear2
        ],
        out_specs=pl.BlockSpec((1, HW, d), lambda b: (b, 0, 0)),
        scratch_shapes=[pltpu.VMEM((H + 4, Wsp + 4, dff), jnp.float32)],
        compiler_params=pltpu.CompilerParams(
            dimension_semantics=("parallel",),
            vmem_limit_bytes=_VMEM_LIMIT),
    )(tgt_b, kv, ln1g, ln1b, wqkv, bqkv, wo, bo, ln2g, ln2b, lqw_pa, lqb_pa,
      pool, expand, ln3g, ln3b, l1w, l1b, gdown, gup, gng, gnb, convw, l2w, l2b)

    return jnp.transpose(out_b, (1, 0, 2))                  # back to (HW, bs, d)


# ----------------------------------------------------------------------------
# Deterministic synthetic parameters (xavier-uniform for dim>1, like _init_weight)
# ----------------------------------------------------------------------------
def init_params(key, d, dff):
    keys = jax.random.split(key, 9)

    def xavier(k, shape, fan_in, fan_out):
        lim = float((6.0 / (fan_in + fan_out)) ** 0.5)
        return jax.random.uniform(k, shape, jnp.float32, -lim, lim)

    return {
        'norm1_g': jnp.ones((d,), jnp.float32), 'norm1_b': jnp.zeros((d,), jnp.float32),
        'norm2_g': jnp.ones((d,), jnp.float32), 'norm2_b': jnp.zeros((d,), jnp.float32),
        'norm3_g': jnp.ones((d,), jnp.float32), 'norm3_b': jnp.zeros((d,), jnp.float32),
        'attn': {
            'wq': xavier(keys[0], (d, d), d, d), 'bq': jnp.zeros((d,), jnp.float32),
            'wk': xavier(keys[1], (d, d), d, d), 'bk': jnp.zeros((d,), jnp.float32),
            'wv': xavier(keys[2], (d, d), d, d), 'bv': jnp.zeros((d,), jnp.float32),
            'wo': xavier(keys[3], (d, d), d, d), 'bo': jnp.zeros((d,), jnp.float32),
        },
        'lq_w': xavier(keys[4], (d, d), d, d), 'lq_b': jnp.zeros((d,), jnp.float32),
        'lv_w': xavier(keys[5], (d, d), d, d), 'lv_b': jnp.zeros((d,), jnp.float32),
        'l1_w': xavier(keys[6], (d, dff), d, dff), 'l1_b': jnp.zeros((dff,), jnp.float32),
        'l2_w': xavier(keys[7], (dff, d), dff, d), 'l2_b': jnp.zeros((d,), jnp.float32),
        'gn_g': jnp.ones((dff,), jnp.float32), 'gn_b': jnp.zeros((dff,), jnp.float32),
        'conv_w': xavier(keys[8], (dff, 5, 5), 25, dff * 25),
    }


if __name__ == "__main__":
    d_model, num_head, dim_feedforward = 32, 4, 64
    H, W_sp = 8, 8
    bs, nk = 2, 2
    patch_num = 4
    HW = H * W_sp

    key = jax.random.PRNGKey(0)
    kp, k1, k2, k3 = jax.random.split(key, 4)
    params = init_params(kp, d_model, dim_feedforward)

    tgt = jax.random.normal(k1, (HW, bs, d_model), jnp.float32)
    ref_embs = jax.random.normal(k2, (bs * HW, nk, d_model), jnp.float32)
    ref_gt = jax.random.normal(k3, (bs * HW, nk, d_model), jnp.float32)

    out = global_local_patrans_block(params, tgt, ref_embs, ref_gt,
                                     size_2d=(H, W_sp), num_head=num_head,
                                     patch_num=patch_num, gn_groups=32)
    out = jax.block_until_ready(out)
    assert out.shape == (HW, bs, d_model) and jnp.all(jnp.isfinite(out))
    print("KERNEL_OK")
</pallas_src>

<mosaic_0001>
module attributes {stable_mosaic.version = 11 : i64} {
  func.func @_ref_path_kernel(%arg0: i32, %arg1: memref<1x128x32xf32, #tpu.memory_space<vmem>>, %arg2: memref<1x128x32xf32, #tpu.memory_space<vmem>>, %arg3: memref<1x32xf32, #tpu.memory_space<vmem>>, %arg4: memref<1x32xf32, #tpu.memory_space<vmem>>, %arg5: memref<32x96xbf16, #tpu.memory_space<vmem>>, %arg6: memref<1x96xf32, #tpu.memory_space<vmem>>, %arg7: memref<32x32xbf16, #tpu.memory_space<vmem>>, %arg8: memref<1x32xf32, #tpu.memory_space<vmem>>, %arg9: memref<1x32xf32, #tpu.memory_space<vmem>>, %arg10: memref<1x32xf32, #tpu.memory_space<vmem>>, %arg11: memref<32x32xbf16, #tpu.memory_space<vmem>>, %arg12: memref<1x32xf32, #tpu.memory_space<vmem>>, %arg13: memref<32x32xbf16, #tpu.memory_space<vmem>>, %arg14: memref<1x32xf32, #tpu.memory_space<vmem>>, %arg15: memref<2x1x64x64xbf16, #tpu.memory_space<vmem>>) attributes {dimension_semantics = [#tpu.dimension_semantics<parallel>], iteration_bounds = array<i64: 2>, scalar_prefetch = 0 : i64, scratch_operands = 0 : i64, tpu.core_type = #tpu.core_type<tc>, window_params = [{transform_indices = @transform_0, window_bounds = array<i64: 1, 128, 32>}, {transform_indices = @transform_1, window_bounds = array<i64: 1, 128, 32>}, {pipeline_mode = #tpu.pipeline_mode<synchronous>, transform_indices = @transform_2, window_bounds = array<i64: 1, 32>}, {pipeline_mode = #tpu.pipeline_mode<synchronous>, transform_indices = @transform_3, window_bounds = array<i64: 1, 32>}, {pipeline_mode = #tpu.pipeline_mode<synchronous>, transform_indices = @transform_4, window_bounds = array<i64: 32, 96>}, {pipeline_mode = #tpu.pipeline_mode<synchronous>, transform_indices = @transform_5, window_bounds = array<i64: 1, 96>}, {pipeline_mode = #tpu.pipeline_mode<synchronous>, transform_indices = @transform_6, window_bounds = array<i64: 32, 32>}, {pipeline_mode = #tpu.pipeline_mode<synchronous>, transform_indices = @transform_7, window_bounds = array<i64: 1, 32>}, {pipeline_mode = #tpu.pipeline_mode<synchronous>, transform_indices = @transform_8, window_bounds = array<i64: 1, 32>}, {pipeline_mode = #tpu.pipeline_mode<synchronous>, transform_indices = @transform_9, window_bounds = array<i64: 1, 32>}, {pipeline_mode = #tpu.pipeline_mode<synchronous>, transform_indices = @transform_10, window_bounds = array<i64: 32, 32>}, {pipeline_mode = #tpu.pipeline_mode<synchronous>, transform_indices = @transform_11, window_bounds = array<i64: 1, 32>}, {pipeline_mode = #tpu.pipeline_mode<synchronous>, transform_indices = @transform_12, window_bounds = array<i64: 32, 32>}, {pipeline_mode = #tpu.pipeline_mode<synchronous>, transform_indices = @transform_13, window_bounds = array<i64: 1, 32>}, {transform_indices = @transform_14, window_bounds = array<i64: 2, 1, 64, 64>}]} {
    %c0 = arith.constant 0 : index
    %c0_0 = arith.constant 0 : index
    %c0_1 = arith.constant 0 : index
    %0 = vector.load %arg1[%c0, %c0_0, %c0_1] : memref<1x128x32xf32, #tpu.memory_space<vmem>>, vector<1x128x32xf32>
    %1 = vector.shape_cast %0 : vector<1x128x32xf32> to vector<128x32xf32>
    %c0_2 = arith.constant 0 : index
    %c0_3 = arith.constant 0 : index
    %2 = vector.load %arg3[%c0_2, %c0_3] : memref<1x32xf32, #tpu.memory_space<vmem>>, vector<1x32xf32>
    %c0_4 = arith.constant 0 : index
    %c0_5 = arith.constant 0 : index
    %3 = vector.load %arg4[%c0_4, %c0_5] : memref<1x32xf32, #tpu.memory_space<vmem>>, vector<1x32xf32>
    %cst = arith.constant dense<0.000000e+00> : vector<128xf32>
    %4 = vector.multi_reduction <add>, %1, %cst [1] : vector<128x32xf32> to vector<128xf32>
    %5 = vector.shape_cast %4 : vector<128xf32> to vector<128x1xf32>
    %cst_6 = arith.constant 3.200000e+01 : f32
    %6 = vector.broadcast %cst_6 : f32 to vector<128x1xf32>
    %7 = arith.divf %5, %6 : vector<128x1xf32>
    %8 = vector.broadcast %7 : vector<128x1xf32> to vector<128x32xf32>
    %9 = arith.subf %1, %8 : vector<128x32xf32>
    %10 = arith.mulf %9, %9 : vector<128x32xf32>
    %cst_7 = arith.constant dense<0.000000e+00> : vector<128xf32>
    %11 = vector.multi_reduction <add>, %10, %cst_7 [1] : vector<128x32xf32> to vector<128xf32>
    %12 = vector.shape_cast %11 : vector<128xf32> to vector<128x1xf32>
    %cst_8 = arith.constant 3.200000e+01 : f32
    %13 = vector.broadcast %cst_8 : f32 to vector<128x1xf32>
    %14 = arith.divf %12, %13 : vector<128x1xf32>
    %15 = vector.broadcast %7 : vector<128x1xf32> to vector<128x32xf32>
    %16 = arith.subf %1, %15 : vector<128x32xf32>
    %cst_9 = arith.constant 9.99999974E-6 : f32
    %17 = vector.broadcast %cst_9 : f32 to vector<128x1xf32>
    %18 = arith.addf %14, %17 : vector<128x1xf32>
    %19 = math.rsqrt %18 : vector<128x1xf32>
    %20 = vector.broadcast %19 : vector<128x1xf32> to vector<128x32xf32>
    %21 = arith.mulf %16, %20 : vector<128x32xf32>
    %22 = vector.broadcast %2 : vector<1x32xf32> to vector<128x32xf32>
    %23 = arith.mulf %21, %22 : vector<128x32xf32>
    %24 = vector.broadcast %3 : vector<1x32xf32> to vector<128x32xf32>
    %25 = arith.addf %23, %24 : vector<128x32xf32>
    %26 = arith.truncf %25 : vector<128x32xf32> to vector<128x32xbf16>
    %c0_10 = arith.constant 0 : index
    %c0_11 = arith.constant 0 : index
    %27 = vector.load %arg5[%c0_10, %c0_11] : memref<32x96xbf16, #tpu.memory_space<vmem>>, vector<32x96xbf16>
    %cst_12 = arith.constant dense<0.000000e+00> : vector<128x96xf32>
    %28 = tpu.matmul %26, %27, %cst_12 {dimension_numbers = #tpu.dot_dimension_numbers<[1], [0], [0], [1], [0, 0, 1, 1], [], []>} : vector<128x32xbf16>, vector<32x96xbf16>, vector<128x96xf32> -> vector<128x96xf32>
    %c0_13 = arith.constant 0 : index
    %c0_14 = arith.constant 0 : index
    %29 = vector.load %arg6[%c0_13, %c0_14] : memref<1x96xf32, #tpu.memory_space<vmem>>, vector<1x96xf32>
    %30 = vector.broadcast %29 : vector<1x96xf32> to vector<128x96xf32>
    %31 = arith.addf %28, %30 : vector<128x96xf32>
    %32 = vector.extract_strided_slice %31 {offsets = [0, 0], sizes = [128, 8], strides = [1, 1]} : vector<128x96xf32> to vector<128x8xf32>
    %33 = vector.extract_strided_slice %31 {offsets = [0, 32], sizes = [128, 8], strides = [1, 1]} : vector<128x96xf32> to vector<128x8xf32>
    %34 = vector.extract_strided_slice %31 {offsets = [0, 64], sizes = [128, 8], strides = [1, 1]} : vector<128x96xf32> to vector<128x8xf32>
    %35 = arith.truncf %32 : vector<128x8xf32> to vector<128x8xbf16>
    %36 = arith.truncf %33 : vector<128x8xf32> to vector<128x8xbf16>
    %cst_15 = arith.constant dense<0.000000e+00> : vector<128x128xf32>
    %37 = tpu.matmul %35, %36, %cst_15 {dimension_numbers = #tpu.dot_dimension_numbers<[1], [1], [0], [0], [0, 0, 1, 0], [], []>} : vector<128x8xbf16>, vector<128x8xbf16>, vector<128x128xf32> -> vector<128x128xf32>
    %cst_16 = arith.constant dense<0xFF800000> : vector<128xf32>
    %38 = vector.multi_reduction <maximumf>, %37, %cst_16 [1] : vector<128x128xf32> to vector<128xf32>
    %39 = vector.shape_cast %38 : vector<128xf32> to vector<128x1xf32>
    %40 = vector.broadcast %39 : vector<128x1xf32> to vector<128x128xf32>
    %41 = arith.subf %37, %40 : vector<128x128xf32>
    %42 = math.exp %41 : vector<128x128xf32>
    %cst_17 = arith.constant dense<0.000000e+00> : vector<128xf32>
    %43 = vector.multi_reduction <add>, %42, %cst_17 [1] : vector<128x128xf32> to vector<128xf32>
    %44 = vector.shape_cast %43 : vector<128xf32> to vector<128x1xf32>
    %45 = tpu.reciprocal %44 {approx = true} : vector<128x1xf32> -> vector<128x1xf32>
    %46 = vector.broadcast %45 : vector<128x1xf32> to vector<128x128xf32>
    %47 = arith.mulf %42, %46 : vector<128x128xf32>
    %48 = arith.truncf %47 : vector<128x128xf32> to vector<128x128xbf16>
    %49 = arith.truncf %34 : vector<128x8xf32> to vector<128x8xbf16>
    %cst_18 = arith.constant dense<0.000000e+00> : vector<128x8xf32>
    %50 = tpu.matmul %48, %49, %cst_18 {dimension_numbers = #tpu.dot_dimension_numbers<[1], [0], [0], [1], [0, 0, 1, 1], [], []>} : vector<128x128xbf16>, vector<128x8xbf16>, vector<128x8xf32> -> vector<128x8xf32>
    %51 = vector.extract_strided_slice %31 {offsets = [0, 8], sizes = [128, 8], strides = [1, 1]} : vector<128x96xf32> to vector<128x8xf32>
    %52 = vector.extract_strided_slice %31 {offsets = [0, 40], sizes = [128, 8], strides = [1, 1]} : vector<128x96xf32> to vector<128x8xf32>
    %53 = vector.extract_strided_slice %31 {offsets = [0, 72], sizes = [128, 8], strides = [1, 1]} : vector<128x96xf32> to vector<128x8xf32>
    %54 = arith.truncf %51 : vector<128x8xf32> to vector<128x8xbf16>
    %55 = arith.truncf %52 : vector<128x8xf32> to vector<128x8xbf16>
    %cst_19 = arith.constant dense<0.000000e+00> : vector<128x128xf32>
    %56 = tpu.matmul %54, %55, %cst_19 {dimension_numbers = #tpu.dot_dimension_numbers<[1], [1], [0], [0], [0, 0, 1, 0], [], []>} : vector<128x8xbf16>, vector<128x8xbf16>, vector<128x128xf32> -> vector<128x128xf32>
    %cst_20 = arith.constant dense<0xFF800000> : vector<128xf32>
    %57 = vector.multi_reduction <maximumf>, %56, %cst_20 [1] : vector<128x128xf32> to vector<128xf32>
    %58 = vector.shape_cast %57 : vector<128xf32> to vector<128x1xf32>
    %59 = vector.broadcast %58 : vector<128x1xf32> to vector<128x128xf32>
    %60 = arith.subf %56, %59 : vector<128x128xf32>
    %61 = math.exp %60 : vector<128x128xf32>
    %cst_21 = arith.constant dense<0.000000e+00> : vector<128xf32>
    %62 = vector.multi_reduction <add>, %61, %cst_21 [1] : vector<128x128xf32> to vector<128xf32>
    %63 = vector.shape_cast %62 : vector<128xf32> to vector<128x1xf32>
    %64 = tpu.reciprocal %63 {approx = true} : vector<128x1xf32> -> vector<128x1xf32>
    %65 = vector.broadcast %64 : vector<128x1xf32> to vector<128x128xf32>
    %66 = arith.mulf %61, %65 : vector<128x128xf32>
    %67 = arith.truncf %66 : vector<128x128xf32> to vector<128x128xbf16>
    %68 = arith.truncf %53 : vector<128x8xf32> to vector<128x8xbf16>
    %cst_22 = arith.constant dense<0.000000e+00> : vector<128x8xf32>
    %69 = tpu.matmul %67, %68, %cst_22 {dimension_numbers = #tpu.dot_dimension_numbers<[1], [0], [0], [1], [0, 0, 1, 1], [], []>} : vector<128x128xbf16>, vector<128x8xbf16>, vector<128x8xf32> -> vector<128x8xf32>
    %70 = vector.extract_strided_slice %31 {offsets = [0, 16], sizes = [128, 8], strides = [1, 1]} : vector<128x96xf32> to vector<128x8xf32>
    %71 = vector.extract_strided_slice %31 {offsets = [0, 48], sizes = [128, 8], strides = [1, 1]} : vector<128x96xf32> to vector<128x8xf32>
    %72 = vector.extract_strided_slice %31 {offsets = [0, 80], sizes = [128, 8], strides = [1, 1]} : vector<128x96xf32> to vector<128x8xf32>
    %73 = arith.truncf %70 : vector<128x8xf32> to vector<128x8xbf16>
    %74 = arith.truncf %71 : vector<128x8xf32> to vector<128x8xbf16>
    %cst_23 = arith.constant dense<0.000000e+00> : vector<128x128xf32>
    %75 = tpu.matmul %73, %74, %cst_23 {dimension_numbers = #tpu.dot_dimension_numbers<[1], [1], [0], [0], [0, 0, 1, 0], [], []>} : vector<128x8xbf16>, vector<128x8xbf16>, vector<128x128xf32> -> vector<128x128xf32>
    %cst_24 = arith.constant dense<0xFF800000> : vector<128xf32>
    %76 = vector.multi_reduction <maximumf>, %75, %cst_24 [1] : vector<128x128xf32> to vector<128xf32>
    %77 = vector.shape_cast %76 : vector<128xf32> to vector<128x1xf32>
    %78 = vector.broadcast %77 : vector<128x1xf32> to vector<128x128xf32>
    %79 = arith.subf %75, %78 : vector<128x128xf32>
    %80 = math.exp %79 : vector<128x128xf32>
    %cst_25 = arith.constant dense<0.000000e+00> : vector<128xf32>
    %81 = vector.multi_reduction <add>, %80, %cst_25 [1] : vector<128x128xf32> to vector<128xf32>
    %82 = vector.shape_cast %81 : vector<128xf32> to vector<128x1xf32>
    %83 = tpu.reciprocal %82 {approx = true} : vector<128x1xf32> -> vector<128x1xf32>
    %84 = vector.broadcast %83 : vector<128x1xf32> to vector<128x128xf32>
    %85 = arith.mulf %80, %84 : vector<128x128xf32>
    %86 = arith.truncf %85 : vector<128x128xf32> to vector<128x128xbf16>
    %87 = arith.truncf %72 : vector<128x8xf32> to vector<128x8xbf16>
    %cst_26 = arith.constant dense<0.000000e+00> : vector<128x8xf32>
    %88 = tpu.matmul %86, %87, %cst_26 {dimension_numbers = #tpu.dot_dimension_numbers<[1], [0], [0], [1], [0, 0, 1, 1], [], []>} : vector<128x128xbf16>, vector<128x8xbf16>, vector<128x8xf32> -> vector<128x8xf32>
    %89 = vector.extract_strided_slice %31 {offsets = [0, 24], sizes = [128, 8], strides = [1, 1]} : vector<128x96xf32> to vector<128x8xf32>
    %90 = vector.extract_strided_slice %31 {offsets = [0, 56], sizes = [128, 8], strides = [1, 1]} : vector<128x96xf32> to vector<128x8xf32>
    %91 = vector.extract_strided_slice %31 {offsets = [0, 88], sizes = [128, 8], strides = [1, 1]} : vector<128x96xf32> to vector<128x8xf32>
    %92 = arith.truncf %89 : vector<128x8xf32> to vector<128x8xbf16>
    %93 = arith.truncf %90 : vector<128x8xf32> to vector<128x8xbf16>
    %cst_27 = arith.constant dense<0.000000e+00> : vector<128x128xf32>
    %94 = tpu.matmul %92, %93, %cst_27 {dimension_numbers = #tpu.dot_dimension_numbers<[1], [1], [0], [0], [0, 0, 1, 0], [], []>} : vector<128x8xbf16>, vector<128x8xbf16>, vector<128x128xf32> -> vector<128x128xf32>
    %cst_28 = arith.constant dense<0xFF800000> : vector<128xf32>
    %95 = vector.multi_reduction <maximumf>, %94, %cst_28 [1] : vector<128x128xf32> to vector<128xf32>
    %96 = vector.shape_cast %95 : vector<128xf32> to vector<128x1xf32>
    %97 = vector.broadcast %96 : vector<128x1xf32> to vector<128x128xf32>
    %98 = arith.subf %94, %97 : vector<128x128xf32>
    %99 = math.exp %98 : vector<128x128xf32>
    %cst_29 = arith.constant dense<0.000000e+00> : vector<128xf32>
    %100 = vector.multi_reduction <add>, %99, %cst_29 [1] : vector<128x128xf32> to vector<128xf32>
    %101 = vector.shape_cast %100 : vector<128xf32> to vector<128x1xf32>
    %102 = tpu.reciprocal %101 {approx = true} : vector<128x1xf32> -> vector<128x1xf32>
    %103 = vector.broadcast %102 : vector<128x1xf32> to vector<128x128xf32>
    %104 = arith.mulf %99, %103 : vector<128x128xf32>
    %105 = arith.truncf %104 : vector<128x128xf32> to vector<128x128xbf16>
    %106 = arith.truncf %91 : vector<128x8xf32> to vector<128x8xbf16>
    %cst_30 = arith.constant dense<0.000000e+00> : vector<128x8xf32>
    %107 = tpu.matmul %105, %106, %cst_30 {dimension_numbers = #tpu.dot_dimension_numbers<[1], [0], [0], [1], [0, 0, 1, 1], [], []>} : vector<128x128xbf16>, vector<128x8xbf16>, vector<128x8xf32> -> vector<128x8xf32>
    %108 = tpu.concatenate %50, %69, %88, %107 in 1 : vector<128x8xf32>, vector<128x8xf32>, vector<128x8xf32>, vector<128x8xf32> -> vector<128x32xf32>
    %109 = arith.truncf %108 : vector<128x32xf32> to vector<128x32xbf16>
    %c0_31 = arith.constant 0 : index
    %c0_32 = arith.constant 0 : index
    %110 = vector.load %arg7[%c0_31, %c0_32] : memref<32x32xbf16, #tpu.memory_space<vmem>>, vector<32x32xbf16>
    %cst_33 = arith.constant dense<0.000000e+00> : vector<128x32xf32>
    %111 = tpu.matmul %109, %110, %cst_33 {dimension_numbers = #tpu.dot_dimension_numbers<[1], [0], [0], [1], [0, 0, 1, 1], [], []>} : vector<128x32xbf16>, vector<32x32xbf16>, vector<128x32xf32> -> vector<128x32xf32>
    %c0_34 = arith.constant 0 : index
    %c0_35 = arith.constant 0 : index
    %112 = vector.load %arg8[%c0_34, %c0_35] : memref<1x32xf32, #tpu.memory_space<vmem>>, vector<1x32xf32>
    %113 = vector.broadcast %112 : vector<1x32xf32> to vector<128x32xf32>
    %114 = arith.addf %111, %113 : vector<128x32xf32>
    %115 = arith.addf %1, %114 : vector<128x32xf32>
    %c0_36 = arith.constant 0 : index
    %c0_37 = arith.constant 0 : index
    %116 = vector.load %arg9[%c0_36, %c0_37] : memref<1x32xf32, #tpu.memory_space<vmem>>, vector<1x32xf32>
    %c0_38 = arith.constant 0 : index
    %c0_39 = arith.constant 0 : index
    %117 = vector.load %arg10[%c0_38, %c0_39] : memref<1x32xf32, #tpu.memory_space<vmem>>, vector<1x32xf32>
    %cst_40 = arith.constant dense<0.000000e+00> : vector<128xf32>
    %118 = vector.multi_reduction <add>, %115, %cst_40 [1] : vector<128x32xf32> to vector<128xf32>
    %119 = vector.shape_cast %118 : vector<128xf32> to vector<128x1xf32>
    %cst_41 = arith.constant 3.200000e+01 : f32
    %120 = vector.broadcast %cst_41 : f32 to vector<128x1xf32>
    %121 = arith.divf %119, %120 : vector<128x1xf32>
    %122 = vector.broadcast %121 : vector<128x1xf32> to vector<128x32xf32>
    %123 = arith.subf %115, %122 : vector<128x32xf32>
    %124 = arith.mulf %123, %123 : vector<128x32xf32>
    %cst_42 = arith.constant dense<0.000000e+00> : vector<128xf32>
    %125 = vector.multi_reduction <add>, %124, %cst_42 [1] : vector<128x32xf32> to vector<128xf32>
    %126 = vector.shape_cast %125 : vector<128xf32> to vector<128x1xf32>
    %cst_43 = arith.constant 3.200000e+01 : f32
    %127 = vector.broadcast %cst_43 : f32 to vector<128x1xf32>
    %128 = arith.divf %126, %127 : vector<128x1xf32>
    %129 = vector.broadcast %121 : vector<128x1xf32> to vector<128x32xf32>
    %130 = arith.subf %115, %129 : vector<128x32xf32>
    %cst_44 = arith.constant 9.99999974E-6 : f32
    %131 = vector.broadcast %cst_44 : f32 to vector<128x1xf32>
    %132 = arith.addf %128, %131 : vector<128x1xf32>
    %133 = math.rsqrt %132 : vector<128x1xf32>
    %134 = vector.broadcast %133 : vector<128x1xf32> to vector<128x32xf32>
    %135 = arith.mulf %130, %134 : vector<128x32xf32>
    %136 = vector.broadcast %116 : vector<1x32xf32> to vector<128x32xf32>
    %137 = arith.mulf %135, %136 : vector<128x32xf32>
    %138 = vector.broadcast %117 : vector<1x32xf32> to vector<128x32xf32>
    %139 = arith.addf %137, %138 : vector<128x32xf32>
    %140 = arith.truncf %139 : vector<128x32xf32> to vector<128x32xbf16>
    %c0_45 = arith.constant 0 : index
    %c0_46 = arith.constant 0 : index
    %141 = vector.load %arg11[%c0_45, %c0_46] : memref<32x32xbf16, #tpu.memory_space<vmem>>, vector<32x32xbf16>
    %cst_47 = arith.constant dense<0.000000e+00> : vector<128x32xf32>
    %142 = tpu.matmul %140, %141, %cst_47 {dimension_numbers = #tpu.dot_dimension_numbers<[1], [0], [0], [1], [0, 0, 1, 1], [], []>} : vector<128x32xbf16>, vector<32x32xbf16>, vector<128x32xf32> -> vector<128x32xf32>
    %c0_48 = arith.constant 0 : index
    %c0_49 = arith.constant 0 : index
    %143 = vector.load %arg12[%c0_48, %c0_49] : memref<1x32xf32, #tpu.memory_space<vmem>>, vector<1x32xf32>
    %144 = vector.broadcast %143 : vector<1x32xf32> to vector<128x32xf32>
    %145 = arith.addf %142, %144 : vector<128x32xf32>
    %c0_50 = arith.constant 0 : index
    %c0_51 = arith.constant 0 : index
    %c0_52 = arith.constant 0 : index
    %146 = vector.load %arg2[%c0_50, %c0_51, %c0_52] : memref<1x128x32xf32, #tpu.memory_space<vmem>>, vector<1x128x32xf32>
    %147 = vector.shape_cast %146 : vector<1x128x32xf32> to vector<128x32xf32>
    %148 = arith.addf %145, %147 : vector<128x32xf32>
    %149 = arith.truncf %148 : vector<128x32xf32> to vector<128x32xbf16>
    %c0_53 = arith.constant 0 : index
    %c0_54 = arith.constant 0 : index
    %150 = vector.load %arg13[%c0_53, %c0_54] : memref<32x32xbf16, #tpu.memory_space<vmem>>, vector<32x32xbf16>
    %cst_55 = arith.constant dense<0.000000e+00> : vector<128x32xf32>
    %151 = tpu.matmul %149, %150, %cst_55 {dimension_numbers = #tpu.dot_dimension_numbers<[1], [0], [0], [1], [0, 0, 1, 1], [], []>} : vector<128x32xbf16>, vector<32x32xbf16>, vector<128x32xf32> -> vector<128x32xf32>
    %c0_56 = arith.constant 0 : index
    %c0_57 = arith.constant 0 : index
    %152 = vector.load %arg14[%c0_56, %c0_57] : memref<1x32xf32, #tpu.memory_space<vmem>>, vector<1x32xf32>
    %153 = vector.broadcast %152 : vector<1x32xf32> to vector<128x32xf32>
    %154 = arith.addf %151, %153 : vector<128x32xf32>
    %155 = tpu.concatenate %145, %154 in 1 : vector<128x32xf32>, vector<128x32xf32> -> vector<128x64xf32>
    %156 = arith.truncf %155 : vector<128x64xf32> to vector<128x64xbf16>
    %157 = vector.shape_cast %156 : vector<128x64xbf16> to vector<2x1x64x64xbf16>
    %c0_58 = arith.constant 0 : index
    %c0_59 = arith.constant 0 : index
    %c0_60 = arith.constant 0 : index
    %c0_61 = arith.constant 0 : index
    %158 = vector.load %arg15[%c0_58, %c0_59, %c0_60, %c0_61] : memref<2x1x64x64xbf16, #tpu.memory_space<vmem>>, vector<2x1x64x64xbf16>
    tpu.vector_store %arg15[%c0_58, %c0_59, %c0_60, %c0_61], %157 {strides = array<i32>} : memref<2x1x64x64xbf16, #tpu.memory_space<vmem>>, vector<2x1x64x64xbf16>,
    return
  }
  func.func @transform_0(%arg0: i32) -> (i32, i32, i32) {
    %c0_i32 = arith.constant 0 : i32
    %c0_i32_0 = arith.constant 0 : i32
    %c0_i32_1 = arith.constant 0 : i32
    return %arg0, %c0_i32, %c0_i32_0 : i32, i32, i32
  }
  func.func @transform_1(%arg0: i32) -> (i32, i32, i32) {
    %c0_i32 = arith.constant 0 : i32
    %c0_i32_0 = arith.constant 0 : i32
    %c0_i32_1 = arith.constant 0 : i32
    return %arg0, %c0_i32, %c0_i32_0 : i32, i32, i32
  }
  func.func @transform_2(%arg0: i32) -> (i32, i32) {
    %c0_i32 = arith.constant 0 : i32
    %c0_i32_0 = arith.constant 0 : i32
    %c0_i32_1 = arith.constant 0 : i32
    return %c0_i32, %c0_i32_0 : i32, i32
  }
  func.func @transform_3(%arg0: i32) -> (i32, i32) {
    %c0_i32 = arith.constant 0 : i32
    %c0_i32_0 = arith.constant 0 : i32
    %c0_i32_1 = arith.constant 0 : i32
    return %c0_i32, %c0_i32_0 : i32, i32
  }
  func.func @transform_4(%arg0: i32) -> (i32, i32) {
    %c0_i32 = arith.constant 0 : i32
    %c0_i32_0 = arith.constant 0 : i32
    %c0_i32_1 = arith.constant 0 : i32
    return %c0_i32, %c0_i32_0 : i32, i32
  }
  func.func @transform_5(%arg0: i32) -> (i32, i32) {
    %c0_i32 = arith.constant 0 : i32
    %c0_i32_0 = arith.constant 0 : i32
    %c0_i32_1 = arith.constant 0 : i32
    return %c0_i32, %c0_i32_0 : i32, i32
  }
  func.func @transform_6(%arg0: i32) -> (i32, i32) {
    %c0_i32 = arith.constant 0 : i32
    %c0_i32_0 = arith.constant 0 : i32
    %c0_i32_1 = arith.constant 0 : i32
    return %c0_i32, %c0_i32_0 : i32, i32
  }
  func.func @transform_7(%arg0: i32) -> (i32, i32) {
    %c0_i32 = arith.constant 0 : i32
    %c0_i32_0 = arith.constant 0 : i32
    %c0_i32_1 = arith.constant 0 : i32
    return %c0_i32, %c0_i32_0 : i32, i32
  }
  func.func @transform_8(%arg0: i32) -> (i32, i32) {
    %c0_i32 = arith.constant 0 : i32
    %c0_i32_0 = arith.constant 0 : i32
    %c0_i32_1 = arith.constant 0 : i32
    return %c0_i32, %c0_i32_0 : i32, i32
  }
  func.func @transform_9(%arg0: i32) -> (i32, i32) {
    %c0_i32 = arith.constant 0 : i32
    %c0_i32_0 = arith.constant 0 : i32
    %c0_i32_1 = arith.constant 0 : i32
    return %c0_i32, %c0_i32_0 : i32, i32
  }
  func.func @transform_10(%arg0: i32) -> (i32, i32) {
    %c0_i32 = arith.constant 0 : i32
    %c0_i32_0 = arith.constant 0 : i32
    %c0_i32_1 = arith.constant 0 : i32
    return %c0_i32, %c0_i32_0 : i32, i32
  }
  func.func @transform_11(%arg0: i32) -> (i32, i32) {
    %c0_i32 = arith.constant 0 : i32
    %c0_i32_0 = arith.constant 0 : i32
    %c0_i32_1 = arith.constant 0 : i32
    return %c0_i32, %c0_i32_0 : i32, i32
  }
  func.func @transform_12(%arg0: i32) -> (i32, i32) {
    %c0_i32 = arith.constant 0 : i32
    %c0_i32_0 = arith.constant 0 : i32
    %c0_i32_1 = arith.constant 0 : i32
    return %c0_i32, %c0_i32_0 : i32, i32
  }
  func.func @transform_13(%arg0: i32) -> (i32, i32) {
    %c0_i32 = arith.constant 0 : i32
    %c0_i32_0 = arith.constant 0 : i32
    %c0_i32_1 = arith.constant 0 : i32
    return %c0_i32, %c0_i32_0 : i32, i32
  }
  func.func @transform_14(%arg0: i32) -> (i32, i32, i32, i32) {
    %c0_i32 = arith.constant 0 : i32
    %c0_i32_0 = arith.constant 0 : i32
    %c0_i32_1 = arith.constant 0 : i32
    %c0_i32_2 = arith.constant 0 : i32
    return %c0_i32, %arg0, %c0_i32_0, %c0_i32_1 : i32, i32, i32, i32
  }
}

</mosaic_0001>

<bundles_post_ra>
// kernel: tpu_custom_call.1
= control target key start
LH: loop header
LB: loop body
LE: loop exit
PB: predicated region body
PF: predicated region fallthrough
CT: control target
= control target key end

     0   :  { %s7133_s0 = inlined_call_operand.vmem [shape: f32[2,128,32], index: 0, kind: input, shape index: {}]   ;;  %s7134_s1 = inlined_call_operand.vmem [shape: f32[2,128,32], index: 1, kind: input, shape index: {}]   ;;  %s7135_s2 = inlined_call_operand.vmem [shape: f32[1,32], index: 2, kind: input, shape index: {}]   ;;  %s7136_s3 = inlined_call_operand.vmem [shape: f32[1,32], index: 3, kind: input, shape index: {}]   ;;  %s7137_s4 = inlined_call_operand.vmem [shape: bf16[32,96], index: 4, kind: input, shape index: {}]   ;;  %s7138_s5 = inlined_call_operand.vmem [shape: f32[1,96], index: 5, kind: input, shape index: {}]   ;;  %s7139_s6 = inlined_call_operand.vmem [shape: bf16[32,32], index: 6, kind: input, shape index: {}]   ;;  %s7140_s7 = inlined_call_operand.vmem [shape: f32[1,32], index: 7, kind: input, shape index: {}]   ;;  %s7141_s8 = inlined_call_operand.vmem [shape: f32[1,32], index: 8, kind: input, shape index: {}]   ;;  %s7142_s9 = inlined_call_operand.vmem [shape: f32[1,32], index: 9, kind: input, shape index: {}]   ;;  %s7143_s10 = inlined_call_operand.vmem [shape: bf16[32,32], index: 10, kind: input, shape index: {}]   ;;  %s7144_s11 = inlined_call_operand.vmem [shape: f32[1,32], index: 11, kind: input, shape index: {}]   ;;  %s7145_s12 = inlined_call_operand.vmem [shape: bf16[32,32], index: 12, kind: input, shape index: {}]   ;;  %s7146_s13 = inlined_call_operand.vmem [shape: f32[1,32], index: 13, kind: input, shape index: {}]   ;;  %s7147_s14 = inlined_call_operand.hbm [shape: bf16[2,2,64,64], index: 14, kind: output, shape index: {}]  }
   0x1   :  { %7154 = sst [smem:[#allocation26_spill]] %s7133_s0 }
   0x2   :  { %7155 = sst [smem:[#allocation27_spill]] %s7135_s2 }
   0x3   :  { %7156 = sst [smem:[#allocation28_spill]] %s7136_s3 }
   0x4   :  { %7157 = sst [smem:[#allocation29_spill]] %s7137_s4 }
   0x5   :  { %19 = vsyncpa [#allocation3], 0 }
   0x6   :  { %21 = vsyncpa [#allocation3 + $0x1], 0  ;;  %s5375_s29 = smov 0   ;;  %s5377_s30 = smov 0  }
   0x7   :  { %s5379_s15 = smov 0   ;;  %s5381_s16 = smov 0  }
   0x8 LB: > { %s5396_s17 = sadd.s32 4294967295, %s5276_s16   ;;  %s3990_s18 = sadd.s32 4294967294, %s5276_s16   ;;  %s5276_s16 = sphi %s5381_s16, %s7223_s16   ;;  %s5272_s15 = sphi %s5379_s15, %s7222_s15   ;;  %s5268_s30 = sphi %s5377_s30, %s7221_s30   ;;  %s5264_s29 = sphi %s5375_s29, %s7220_s29  }
   0x9   : > { %s5400_s19 = sadd.s32 1, %s5276_s16   ;;  %s338_s20 = sadd.s32 1, %s5272_s15 }
   0xa   : > { %s335_s21 = ssub.s32 %s5276_s16, %s5400_s19  ;;  %p348_p0 = scmp.ne.s32.totalorder %s5272_s15, %s5268_s30 }
   0xb   : > { %p336_p1 = scmp.eq.s32.totalorder %s335_s21, 0  ;;  %p349_p2 = scmp.eq.s32.totalorder %s5396_s17, 1 }
   0xc   : > { %p354_p3 = scmp.ne.s32.totalorder %s5268_s30, %s5264_s29  ;;  %p355_p4 = scmp.eq.s32.totalorder %s3990_s18, 1 }
   0xd   : > { %s5411_s22 = scalar_select %p336_p1, %s5272_s15, %s338_s20  }
   0xe   : > { %p5413_p5 = por %p349_p2, %p348_p0  ;;  %p5417_p6 = por %p355_p4, %p354_p3 }
   0xf   : > { %p3993_p7 = scmp.ge.s32.totalorder %s5276_s16, 1  ;;  %p425_p8 = scmp.lt.s32.totalorder %s5276_s16, 3 }
  0x11   : > { %p426_p9 = pnand %p3993_p7, %p425_p8 }
  0x13   : > { %429 = sbr.rel (%p426_p9) target bundleno = 4677 (0x1245), region = 76 }
  0x1a   : > { %p476_p10 = scmp.lt.s32.totalorder %s5396_s17, 1  ;;  %vm505_vm0 = vcmask 261120   ;;  %s7160_s0 = sld [smem:[#allocation26_spill]]  ;;  %vm943_vm1 = vcmask 64512   ;;  %vm2920_vm2 = vcmask 130048   ;;  %vm2937_vm3 = vcmask 195584  }
  0x1b   : > { %s7161_s4 = sld [smem:[#allocation29_spill]]  ;;  %s7162_s2 = sld [smem:[#allocation27_spill]]  ;;  %vm3856_vm4 = vcmask 519168  }
  0x1c   : > { %s5425_s25 = scalar_select %p476_p10, %s5396_s17, 1 }
  0x1d   : > { %s7163_s3 = sld [smem:[#allocation28_spill]]  ;;  %s5278_s27 = smov 96  }
  0x1e   : > { %s7151_s26 = sshll.u32 %s5425_s25, 7  ;;  %s5279_s28 = smov 64  }
  0x1f   : > { %s5280_s20 = smov 88   ;;  %s5281_s21 = smov 120  }
  0x20   : > { %s5433_s18 = scalar_lea.vmem %s7160_s0, %s7151_s26  ;;  %s7195_s26 = smov 8  }
  0x21   : > { %v487_v0 = vld [vmem:[%s5433_s18] sm:$0xff]  ;;  %v489_v1 = vld [vmem:[%s5433_s18 + $0x10] sm:$0xff]  ;;  %v488_v2 = vld [vmem:[%s5433_s18 + $0x8] sm:$0xff]  ;;  %s7219_s0 = sshll.u32 %s5425_s25, 7 }
  0x22   : > { %v506_v3 = vsel %vm505_vm0, %v487_v0, 0.0  ;;  %v512_v4 = vsel %vm505_vm0, %v489_v1, 0.0  ;;  %v490_v5 = vld [vmem:[%s5433_s18 + $0x18] sm:$0xff]  ;;  %v509_v6 = vsel %vm505_vm0, %v488_v2, 0.0  ;;  %v491_v8 = vld [vmem:[%s5433_s18 + $0x20] sm:$0xff]  ;;  %v492_v9 = vld [vmem:[%s5433_s18 + $0x28] sm:$0xff] }
  0x23   : > { %507 = vadd.xlane.f32.xlu0 %v506_v3  ;;  %513 = vadd.xlane.f32.xlu1 %v512_v4  ;;  %v515_v7 = vsel %vm505_vm0, %v490_v5, 0.0  ;;  %v518_v10 = vsel %vm505_vm0, %v491_v8, 0.0  ;;  %v521_v11 = vsel %vm505_vm0, %v492_v9, 0.0  ;;  %v5448_v12 = vld [vmem:[%s5433_s18 + $0x30] sm:$0xff]  ;;  %v5451_v13 = vld [vmem:[%s5433_s18 + $0x38] sm:$0xff]  ;;  %v5458_v16 = vld [vmem:[%s5433_s18 + $0x40] sm:$0xff] }
  0x24   : > { %v524_v14 = vsel %vm505_vm0, %v5448_v12, 0.0  ;;  %v527_v15 = vsel %vm505_vm0, %v5451_v13, 0.0  ;;  %v5461_v17 = vld [vmem:[%s5433_s18 + $0x48] sm:$0xff]  ;;  %v530_v18 = vsel %vm505_vm0, %v5458_v16, 0.0  ;;  %v5468_v20 = vld [vmem:[%s5433_s18 + $0x50] sm:$0xff]  ;;  %v5471_v21 = vld [vmem:[%s5433_s18 + $0x58] sm:$0xff] }
  0x25   : > { %v533_v19 = vsel %vm505_vm0, %v5461_v17, 0.0  ;;  %v536_v22 = vsel %vm505_vm0, %v5468_v20, 0.0  ;;  %v539_v23 = vsel %vm505_vm0, %v5471_v21, 0.0  ;;  %v5478_v24 = vld [vmem:[%s5433_s18 + $0x60] sm:$0xff]  ;;  %v5481_v25 = vld [vmem:[%s5433_s18 + $0x68] sm:$0xff]  ;;  %v5488_v28 = vld [vmem:[%s5433_s18 + $0x70] sm:$0xff] }
  0x26   : > { %v542_v26 = vsel %vm505_vm0, %v5478_v24, 0.0  ;;  %v545_v27 = vsel %vm505_vm0, %v5481_v25, 0.0  ;;  %v5491_v29 = vld [vmem:[%s5433_s18 + $0x78] sm:$0xff]  ;;  %v548_v30 = vsel %vm505_vm0, %v5488_v28, 0.0 }
  0x27   : > { %510 = vadd.xlane.f32.xlu0 %v509_v6  ;;  %516 = vadd.xlane.f32.xlu1 %v515_v7  ;;  %v551_v31 = vsel %vm505_vm0, %v5491_v29, 0.0 }
  0x2b   : > { %519 = vadd.xlane.f32.xlu0 %v518_v10  ;;  %522 = vadd.xlane.f32.xlu1 %v521_v11 }
  0x2f   : > { %525 = vadd.xlane.f32.xlu0 %v524_v14  ;;  %528 = vadd.xlane.f32.xlu1 %v527_v15 }
  0x33   : > { %531 = vadd.xlane.f32.xlu0 %v530_v18  ;;  %534 = vadd.xlane.f32.xlu1 %v533_v19 }
  0x37   : > { %537 = vadd.xlane.f32.xlu0 %v536_v22  ;;  %540 = vadd.xlane.f32.xlu1 %v539_v23 }
  0x3b   : > { %543 = vadd.xlane.f32.xlu0 %v542_v26  ;;  %546 = vadd.xlane.f32.xlu1 %v545_v27 }
  0x3f   : > { %549 = vadd.xlane.f32.xlu0 %v548_v30  ;;  %552 = vadd.xlane.f32.xlu1 %v551_v31 }
  0xb0   : > { %v508_v32 = vpop.xlane.xlu0 %507  ;;  %v514_v33 = vpop.xlane.xlu1 %513 }
  0xb1   : > { %v555_v34 = vmul.f32 0.03125, %v508_v32  ;;  %v557_v35 = vmul.f32 0.03125, %v514_v33 }
  0xb3   : > { %v5497_v36 = vsub.f32 %v487_v0, %v555_v34  ;;  %v5499_v37 = vsub.f32 %v489_v1, %v557_v35 }
  0xb4   : > { %v511_v38 = vpop.xlane.xlu0 %510  ;;  %v517_v39 = vpop.xlane.xlu1 %516 }
  0xb5   : > { %v556_v40 = vmul.f32 0.03125, %v511_v38  ;;  %v558_v41 = vmul.f32 0.03125, %v517_v39  ;;  %v587_v42 = vmul.f32 %v5497_v36, %v5497_v36  ;;  %v589_v43 = vmul.f32 %v5499_v37, %v5499_v37 }
  0xb7   : > { %v5505_v44 = vsub.f32 %v488_v2, %v556_v40  ;;  %v5507_v45 = vsub.f32 %v490_v5, %v558_v41  ;;  %v603_v46 = vsel %vm505_vm0, %v587_v42, 0.0  ;;  %v609_v49 = vsel %vm505_vm0, %v589_v43, 0.0 }
  0xb8   : > { %604 = vadd.xlane.f32.xlu0 %v603_v46  ;;  %v520_v47 = vpop.xlane.xlu0 %519  ;;  %v523_v48 = vpop.xlane.xlu1 %522 }
  0xb9   : > { %v559_v50 = vmul.f32 0.03125, %v520_v47  ;;  %v560_v51 = vmul.f32 0.03125, %v523_v48  ;;  %v588_v52 = vmul.f32 %v5505_v44, %v5505_v44  ;;  %v590_v53 = vmul.f32 %v5507_v45, %v5507_v45 }
  0xbb   : > { %v5515_v54 = vsub.f32 %v491_v8, %v559_v50  ;;  %v5517_v55 = vsub.f32 %v492_v9, %v560_v51  ;;  %v606_v56 = vsel %vm505_vm0, %v588_v52, 0.0  ;;  %v612_v59 = vsel %vm505_vm0, %v590_v53, 0.0  ;;  %v4899_v53 = vld [vmem:[%s7161_s4 + $0x8] sm:$0xff]  }
  0xbc   : > { %610 = vadd.xlane.f32.xlu0 %v609_v49  ;;  %607 = vadd.xlane.f32.xlu1 %v606_v56  ;;  %v526_v57 = vpop.xlane.xlu0 %525  ;;  %v529_v58 = vpop.xlane.xlu1 %528 }
  0xbd   : > { %v561_v60 = vmul.f32 0.03125, %v526_v57  ;;  %v562_v61 = vmul.f32 0.03125, %v529_v58  ;;  %v591_v62 = vmul.f32 %v5515_v54, %v5515_v54  ;;  %v592_v63 = vmul.f32 %v5517_v55, %v5517_v55 }
  0xbf   : > { %v5526_v0 = vsub.f32 %v5448_v12, %v561_v60  ;;  %v5529_v1 = vsub.f32 %v5451_v13, %v562_v61  ;;  %v615_v2 = vsel %vm505_vm0, %v591_v62, 0.0  ;;  %v618_v5 = vsel %vm505_vm0, %v592_v63, 0.0 }
  0xc0   : > { %613 = vadd.xlane.f32.xlu1 %v612_v59  ;;  %616 = vadd.xlane.f32.xlu0 %v615_v2  ;;  %v532_v3 = vpop.xlane.xlu0 %531  ;;  %v535_v4 = vpop.xlane.xlu1 %534 }
  0xc1   : > { %v563_v6 = vmul.f32 0.03125, %v532_v3  ;;  %v564_v7 = vmul.f32 0.03125, %v535_v4  ;;  %v593_v8 = vmul.f32 %v5526_v0, %v5526_v0  ;;  %v594_v9 = vmul.f32 %v5529_v1, %v5529_v1 }
  0xc3   : > { %v5538_v10 = vsub.f32 %v5458_v16, %v563_v6  ;;  %v5541_v11 = vsub.f32 %v5461_v17, %v564_v7  ;;  %v621_v12 = vsel %vm505_vm0, %v593_v8, 0.0  ;;  %v624_v15 = vsel %vm505_vm0, %v594_v9, 0.0 }
  0xc4   : > { %619 = vadd.xlane.f32.xlu1 %v618_v5  ;;  %622 = vadd.xlane.f32.xlu0 %v621_v12  ;;  %v538_v13 = vpop.xlane.xlu0 %537  ;;  %v541_v14 = vpop.xlane.xlu1 %540 }
  0xc5   : > { %v565_v18 = vmul.f32 0.03125, %v538_v13  ;;  %v566_v19 = vmul.f32 0.03125, %v541_v14  ;;  %v595_v22 = vmul.f32 %v5538_v10, %v5538_v10  ;;  %v596_v16 = vmul.f32 %v5541_v11, %v5541_v11 }
  0xc7   : > { %v5550_v23 = vsub.f32 %v5468_v20, %v565_v18  ;;  %v5553_v17 = vsub.f32 %v5471_v21, %v566_v19  ;;  %v627_v26 = vsel %vm505_vm0, %v595_v22, 0.0  ;;  %v630_v31 = vsel %vm505_vm0, %v596_v16, 0.0 }
  0xc8   : > { %625 = vadd.xlane.f32.xlu1 %v624_v15  ;;  %628 = vadd.xlane.f32.xlu0 %v627_v26  ;;  %v544_v27 = vpop.xlane.xlu0 %543  ;;  %v547_v30 = vpop.xlane.xlu1 %546 }
  0xc9   : > { %v567_v32 = vmul.f32 0.03125, %v544_v27  ;;  %v568_v33 = vmul.f32 0.03125, %v547_v30  ;;  %v597_v34 = vmul.f32 %v5550_v23, %v5550_v23  ;;  %v598_v20 = vmul.f32 %v5553_v17, %v5553_v17 }
  0xcb   : > { %v5562_v35 = vsub.f32 %v5478_v24, %v567_v32  ;;  %v5565_v21 = vsub.f32 %v5481_v25, %v568_v33  ;;  %v633_v38 = vsel %vm505_vm0, %v597_v34, 0.0  ;;  %v636_v41 = vsel %vm505_vm0, %v598_v20, 0.0 }
  0xcc   : > { %631 = vadd.xlane.f32.xlu1 %v630_v31  ;;  %634 = vadd.xlane.f32.xlu0 %v633_v38  ;;  %v550_v39 = vpop.xlane.xlu0 %549  ;;  %v553_v40 = vpop.xlane.xlu1 %552  ;;  %v5597_v31 = vld [vmem:[%s7162_s2] ss:$0 sm:$0xff] }
  0xcd   : > { %v569_v42 = vmul.f32 0.03125, %v550_v39  ;;  %v570_v43 = vmul.f32 0.03125, %v553_v40  ;;  %v599_v46 = vmul.f32 %v5562_v35, %v5562_v35  ;;  %v600_v24 = vmul.f32 %v5565_v21, %v5565_v21 }
  0xcf   : > { %v5574_v47 = vsub.f32 %v5488_v28, %v569_v42  ;;  %v5577_v25 = vsub.f32 %v5491_v29, %v570_v43  ;;  %v639_v48 = vsel %vm505_vm0, %v599_v46, 0.0  ;;  %v642_v49 = vsel %vm505_vm0, %v600_v24, 0.0  ;;  %v4898_v29 = vld [vmem:[%s7161_s4] sm:$0xff]   ;;  %s6925_s4 = scalar_lea.vmem %s7134_s1, %s7219_s0  ;;  %s473_s0 = sand.u32 1, %s5268_s30  }
  0xd0   : > { %637 = vadd.xlane.f32.xlu1 %v636_v41  ;;  %640 = vadd.xlane.f32.xlu0 %v639_v48  ;;  %v5604_v43 = vld [vmem:[%s7163_s3] ss:$0 sm:$0xff]  ;;  %s3994_s25 = sshll.u32 %s473_s0, 6 }
  0xd1   : > { %v601_v50 = vmul.f32 %v5574_v47, %v5574_v47  ;;  %v602_v51 = vmul.f32 %v5577_v25, %v5577_v25  ;;  %4287 = vmatprep.subr.bf16.mxu0 %v4898_v29 }
  0xd2   : > { %4288 = vmatpush3.bf16.msra.mxu0 %v4898_v29 }
  0xd3   : > { %v645_v52 = vsel %vm505_vm0, %v601_v50, 0.0  ;;  %v648_v28 = vsel %vm505_vm0, %v602_v51, 0.0  ;;  %4289 = vmatprep.subr.bf16.mxu0 %v4899_v53 }
  0xd4   : > { %643 = vadd.xlane.f32.xlu1 %v642_v49  ;;  %646 = vadd.xlane.f32.xlu0 %v645_v52 }
  0xd6   : > { %4290 = vmatpush3.bf16.msra.mxu0 %v4899_v53 }
  0xd8   : > { %649 = vadd.xlane.f32.xlu1 %v648_v28 }
 0x145   : > { %v605_v56 = vpop.xlane.xlu0 %604 }
 0x146   : > { %v651_v57 = vmul.f32 0.03125, %v605_v56 }
 0x148   : > { %v667_v58 = vadd.f32 1e-05, %v651_v57 }
 0x149   : > { %v608_v59 = vpop.xlane.xlu1 %607  ;;  %v611_v60 = vpop.xlane.xlu0 %610 }
 0x14a   : > { %4906 = vrsqrt.f32 %v667_v58  ;;  %v652_v61 = vmul.f32 0.03125, %v608_v59  ;;  %v653_v62 = vmul.f32 0.03125, %v611_v60 }
 0x14c   : > { %v668_v63 = vadd.f32 1e-05, %v652_v61  ;;  %v669_v2 = vadd.f32 1e-05, %v653_v62 }
 0x14d   : > { %v614_v3 = vpop.xlane.xlu1 %613  ;;  %v617_v4 = vpop.xlane.xlu0 %616 }
 0x14e   : > { %4908 = vrsqrt.f32 %v668_v63  ;;  %v654_v5 = vmul.f32 0.03125, %v614_v3  ;;  %v655_v6 = vmul.f32 0.03125, %v617_v4 }
 0x14f   : > { %4910 = vrsqrt.f32 %v669_v2 }
 0x150   : > { %v670_v7 = vadd.f32 1e-05, %v654_v5  ;;  %v671_v8 = vadd.f32 1e-05, %v655_v6 }
 0x151   : > { %v620_v9 = vpop.xlane.xlu1 %619  ;;  %v623_v12 = vpop.xlane.xlu0 %622 }
 0x152   : > { %4912 = vrsqrt.f32 %v670_v7  ;;  %v656_v13 = vmul.f32 0.03125, %v620_v9  ;;  %v657_v14 = vmul.f32 0.03125, %v623_v12 }
 0x153   : > { %4914 = vrsqrt.f32 %v671_v8 }
 0x154   : > { %v4907_v15 = vpop.eup %4906  ;;  %v672_v18 = vadd.f32 1e-05, %v656_v13  ;;  %v673_v19 = vadd.f32 1e-05, %v657_v14 }
 0x155   : > { %v626_v22 = vpop.xlane.xlu1 %625  ;;  %v629_v16 = vpop.xlane.xlu0 %628  ;;  %v699_v26 = vmul.f32 %v4907_v15, %v5497_v36 }
 0x156   : > { %4916 = vrsqrt.f32 %v672_v18  ;;  %v658_v27 = vmul.f32 0.03125, %v626_v22  ;;  %v659_v30 = vmul.f32 0.03125, %v629_v16 }
 0x157   : > { %4918 = vrsqrt.f32 %v673_v19  ;;  %v721_v41 = vmul.f32 %v5597_v31, %v699_v26 }
 0x158   : > { %v4909_v32 = vpop.eup %4908  ;;  %v674_v33 = vadd.f32 1e-05, %v658_v27  ;;  %v675_v34 = vadd.f32 1e-05, %v659_v30 }
 0x159   : > { %v4911_v20 = vpop.eup %4910  ;;  %v632_v38 = vpop.xlane.xlu1 %631  ;;  %v700_v40 = vmul.f32 %v4909_v32, %v5505_v44  ;;  %v743_v28 = vadd.f32 %v5604_v43, %v721_v41 }
 0x15a   : > { %v635_v39 = vpop.xlane.xlu0 %634  ;;  %4920 = vrsqrt.f32 %v674_v33  ;;  %v660_v36 = vmul.f32 0.03125, %v632_v38  ;;  %v701_v46 = vmul.f32 %v4911_v20, %v5499_v37 }
 0x15b   : > { %v661_v42 = vmul.f32 0.03125, %v635_v39  ;;  %4922 = vrsqrt.f32 %v675_v34  ;;  %v722_v24 = vmul.f32 %v5597_v31, %v700_v40 }
 0x15c   : > { %v4913_v48 = vpop.eup %4912  ;;  %v676_v49 = vadd.f32 1e-05, %v660_v36  ;;  %v723_v56 = vmul.f32 %v5597_v31, %v701_v46 }
 0x15d   : > { %v677_v50 = vadd.f32 1e-05, %v661_v42  ;;  %v4915_v51 = vpop.eup %4914  ;;  %v638_v44 = vpop.xlane.xlu1 %637  ;;  %v744_v29 = vadd.f32 %v5604_v43, %v722_v24  ;;  %v702_v53 = vmul.f32 %v4913_v48, %v5507_v45 }
 0x15e   : > { %v641_v52 = vpop.xlane.xlu0 %640  ;;  %4924 = vrsqrt.f32 %v676_v49  ;;  %v662_v57 = vmul.f32 0.03125, %v638_v44  ;;  %v703_v60 = vmul.f32 %v4915_v51, %v5515_v54  ;;  %v745_v45 = vadd.f32 %v5604_v43, %v723_v56 }
 0x15f   : > { %v663_v37 = vmul.f32 0.03125, %v641_v52  ;;  %4926 = vrsqrt.f32 %v677_v50  ;;  %v759_v58 = vpack.c.bf16 %v744_v29, %v743_v28  ;;  %v724_v59 = vmul.f32 %v5597_v31, %v702_v53 }
 0x160   : > { %v4917_v61 = vpop.eup %4916  ;;  %v678_v62 = vadd.f32 1e-05, %v662_v57  ;;  %v725_v7 = vmul.f32 %v5597_v31, %v703_v60 }
 0x161   : > { %v679_v63 = vadd.f32 1e-05, %v663_v37  ;;  %v4919_v2 = vpop.eup %4918  ;;  %v644_v3 = vpop.xlane.xlu1 %643  ;;  %4291 = vmatprep.mubr.msk.bf16.mxu0 %vm505_vm0, %v759_v58  ;;  %v746_v5 = vadd.f32 %v5604_v43, %v724_v59  ;;  %v704_v6 = vmul.f32 %v4917_v61, %v5517_v55 }
 0x162   : > { %v647_v4 = vpop.xlane.xlu0 %646  ;;  %4928 = vrsqrt.f32 %v678_v62  ;;  %v664_v8 = vmul.f32 0.03125, %v644_v3  ;;  %v705_v54 = vmul.f32 %v4919_v2, %v5526_v0  ;;  %v747_v55 = vadd.f32 %v5604_v43, %v725_v7 }
 0x163   : > { %v665_v9 = vmul.f32 0.03125, %v647_v4  ;;  %4930 = vrsqrt.f32 %v679_v63  ;;  %v760_v12 = vpack.c.bf16 %v746_v5, %v745_v45  ;;  %v726_v13 = vmul.f32 %v5597_v31, %v704_v6  ;;  %v4001_v45 = vld [vmem:[%s7138_s5] ss:$0 sm:$0xff] }
 0x164   : > { %v4921_v14 = vpop.eup %4920  ;;  %v680_v15 = vadd.f32 1e-05, %v664_v8  ;;  %v727_v27 = vmul.f32 %v5597_v31, %v705_v54 }
 0x165   : > { %v681_v18 = vadd.f32 1e-05, %v665_v9  ;;  %v4923_v19 = vpop.eup %4922  ;;  %v650_v22 = vpop.xlane.xlu1 %649  ;;  %4292 = vmatmul.mubr.msk.bf16.vlgmr.msra.gmra.mrb[0].mxu0 %vm505_vm0, %v760_v12  ;;  %v748_v16 = vadd.f32 %v5604_v43, %v726_v13  ;;  %v706_v26 = vmul.f32 %v4921_v14, %v5529_v1 }
 0x166   : > { %4932 = vrsqrt.f32 %v680_v15  ;;  %v666_v0 = vmul.f32 0.03125, %v650_v22  ;;  %v707_v30 = vmul.f32 %v4923_v19, %v5538_v10  ;;  %v749_v39 = vadd.f32 %v5604_v43, %v727_v27 }
 0x167   : > { %4934 = vrsqrt.f32 %v681_v18  ;;  %v761_v32 = vpack.c.bf16 %v748_v16, %v747_v55  ;;  %v728_v33 = vmul.f32 %v5597_v31, %v706_v26 }
 0x168   : > { %v4925_v34 = vpop.eup %4924  ;;  %v682_v20 = vadd.f32 1e-05, %v666_v0  ;;  %v729_v41 = vmul.f32 %v5597_v31, %v707_v30 }
 0x169   : > { %v4927_v38 = vpop.eup %4926  ;;  %4295 = vmatprep.mubr.msk.bf16.mxu0 %vm505_vm0, %v761_v32  ;;  %v750_v40 = vadd.f32 %v5604_v43, %v728_v33  ;;  %v708_v1 = vmul.f32 %v4925_v34, %v5541_v11 }
 0x16a   : > { %4936 = vrsqrt.f32 %v682_v20  ;;  %v709_v10 = vmul.f32 %v4927_v38, %v5550_v23  ;;  %v751_v48 = vadd.f32 %v5604_v43, %v729_v41 }
 0x16b   : > { %v762_v36 = vpack.c.bf16 %v750_v40, %v749_v39  ;;  %v730_v42 = vmul.f32 %v5597_v31, %v708_v1 }
 0x16c   : > { %v4929_v46 = vpop.eup %4928  ;;  %v731_v11 = vmul.f32 %v5597_v31, %v709_v10 }
 0x16d   : > { %v4931_v24 = vpop.eup %4930  ;;  %4296 = vmatmul.mubr.msk.bf16.gmra.mrb[4].mxu0 %vm505_vm0, %v762_v36  ;;  %v752_v49 = vadd.f32 %v5604_v43, %v730_v42  ;;  %v710_v50 = vmul.f32 %v4929_v46, %v5553_v17 }
 0x16e   : > { %v711_v51 = vmul.f32 %v4931_v24, %v5562_v35  ;;  %v753_v29 = vadd.f32 %v5604_v43, %v731_v11 }
 0x16f   : > { %v763_v44 = vpack.c.bf16 %v752_v49, %v751_v48  ;;  %v732_v23 = vmul.f32 %v5597_v31, %v710_v50 }
 0x170   : > { %v4933_v52 = vpop.eup %4932  ;;  %v733_v57 = vmul.f32 %v5597_v31, %v711_v51 }
 0x171   : > { %v4935_v28 = vpop.eup %4934  ;;  %4299 = vmatprep.mubr.msk.bf16.mxu0 %vm505_vm0, %v763_v44  ;;  %v754_v53 = vadd.f32 %v5604_v43, %v732_v23  ;;  %v712_v56 = vmul.f32 %v4933_v52, %v5565_v21 }
 0x172   : > { %v713_v17 = vmul.f32 %v4935_v28, %v5574_v47  ;;  %v755_v59 = vadd.f32 %v5604_v43, %v733_v57 }
 0x173   : > { %v764_v37 = vpack.c.bf16 %v754_v53, %v753_v29  ;;  %v734_v35 = vmul.f32 %v5597_v31, %v712_v56 }
 0x174   : > { %v4937_v58 = vpop.eup %4936  ;;  %v735_v62 = vmul.f32 %v5597_v31, %v713_v17 }
 0x175   : > { %4300 = vmatmul.mubr.msk.bf16.gmra.mrb[8].mxu0 %vm505_vm0, %v764_v37  ;;  %v756_v60 = vadd.f32 %v5604_v43, %v734_v35  ;;  %v714_v61 = vmul.f32 %v4937_v58, %v5577_v25 }
 0x176   : > { %v757_v47 = vadd.f32 %v5604_v43, %v735_v62 }
 0x177   : > { %v765_v63 = vpack.c.bf16 %v756_v60, %v755_v59  ;;  %v736_v21 = vmul.f32 %v5597_v31, %v714_v61 }
 0x179   : > { %4303 = vmatprep.mubr.msk.bf16.mxu0 %vm505_vm0, %v765_v63  ;;  %v758_v2 = vadd.f32 %v5604_v43, %v736_v21 }
 0x17b   : > { %v766_v3 = vpack.c.bf16 %v758_v2, %v757_v47 }
 0x17d   : > { %4304 = vmatmul.mubr.msk.bf16.gmra.mrb[12].mxu0 %vm505_vm0, %v766_v3 }
 0x238   : > { %v4293_v4 = vpop.f32.mrb[0].mxu0 }
 0x239   : > { %v848_v25 = vpop.f32.mrb[1].mxu0  ;;  %v857_v6 = vadd.f32 %v4293_v4, %v4001_v45 }
 0x23a   : > { %v4294_v5 = vpop.f32.mrb[2].mxu0  ;;  %v849_v31 = vadd.f32 %v4001_v45, %v848_v25 }
 0x23b   : > { %v860_v7 = vadd.f32 %v4294_v5, %v4001_v45  ;;  %v851_v8 = vpop.f32.mrb[3].mxu0 }
 0x23c   : > { %v852_v9 = vadd.f32 %v4001_v45, %v851_v8 }
 0x23d   : > { %v5662_v54 = vpack.c.bf16 %v860_v7, %v857_v6 }
 0x23e   : > { %v5664_v12 = vpack.c.bf16 %v852_v9, %v849_v31 }
 0x23f   : > { %929 = vrot.lane.b32.xlu1 %v5662_v54, %s5278_s27 }
 0x240   : > { %927 = vrot.lane.b32.xlu0 %v5664_v12, %s5278_s27  ;;  %v4297_v43 = vpop.f32.mrb[4].mxu0  ;;  %4323 = vmatprep.mubr.msk.bf16.mxu1 %vm943_vm1, %v5664_v12 }
 0x241   : > { %v864_v13 = vpop.f32.mrb[5].mxu0  ;;  %v873_v15 = vadd.f32 %v4297_v43, %v4001_v45 }
 0x242   : > { %v4298_v14 = vpop.f32.mrb[6].mxu0  ;;  %v865_v22 = vadd.f32 %v4001_v45, %v864_v13 }
 0x243   : > { %v876_v18 = vadd.f32 %v4298_v14, %v4001_v45  ;;  %v867_v19 = vpop.f32.mrb[7].mxu0 }
 0x244   : > { %v868_v55 = vadd.f32 %v4001_v45, %v867_v19 }
 0x245   : > { %v5672_v16 = vpack.c.bf16 %v876_v18, %v873_v15 }
 0x246   : > { %v5674_v26 = vpack.c.bf16 %v868_v55, %v865_v22 }
 0x248   : > { %931 = vrot.lane.b32.xlu1 %v5674_v26, %s5278_s27  ;;  %v4301_v27 = vpop.f32.mrb[8].mxu0 }
 0x249   : > { %v880_v0 = vpop.f32.mrb[9].mxu0  ;;  %v889_v32 = vadd.f32 %v4301_v27, %v4001_v45 }
 0x24a   : > { %v4302_v30 = vpop.f32.mrb[10].mxu0  ;;  %v881_v20 = vadd.f32 %v4001_v45, %v880_v0 }
 0x24b   : > { %v892_v33 = vadd.f32 %v4302_v30, %v4001_v45  ;;  %v883_v34 = vpop.f32.mrb[11].mxu0 }
 0x24c   : > { %v884_v38 = vadd.f32 %v4001_v45, %v883_v34  ;;  %933 = vrot.lane.b32.xlu1 %v5672_v16, %s5278_s27 }
 0x24d   : > { %v5680_v39 = vpack.c.bf16 %v892_v33, %v889_v32 }
 0x24e   : > { %v5682_v40 = vpack.c.bf16 %v884_v38, %v881_v20 }
 0x250   : > { %937 = vrot.lane.b32.xlu1 %v5680_v39, %s5278_s27  ;;  %935 = vrot.lane.b32.xlu0 %v5682_v40, %s5278_s27  ;;  %v4305_v1 = vpop.f32.mrb[12].mxu0 }
 0x251   : > { %v896_v41 = vpop.f32.mrb[13].mxu0  ;;  %v905_v36 = vadd.f32 %v4305_v1, %v4001_v45 }
 0x252   : > { %v4306_v10 = vpop.f32.mrb[14].mxu0  ;;  %v897_v24 = vadd.f32 %v4001_v45, %v896_v41 }
 0x253   : > { %v908_v42 = vadd.f32 %v4306_v10, %v4001_v45  ;;  %v899_v46 = vpop.f32.mrb[15].mxu0 }
 0x254   : > { %v900_v48 = vadd.f32 %v4001_v45, %v899_v46 }
 0x255   : > { %v5688_v49 = vpack.c.bf16 %v908_v42, %v905_v36 }
 0x256   : > { %v5690_v50 = vpack.c.bf16 %v900_v48, %v897_v24 }
 0x257   : > { %941 = vrot.lane.b32.xlu1 %v5688_v49, %s5278_s27 }
 0x258   : > { %939 = vrot.lane.b32.xlu0 %v5690_v50, %s5278_s27  ;;  %s5282_s27 = smov 56  }
 0x25b   : > { %1243 = vrot.lane.b32.xlu1 %v5662_v54, %s5279_s28 }
 0x25c   : > { %1241 = vrot.lane.b32.xlu0 %v5664_v12, %s5279_s28 }
 0x25f   : > { %1247 = vrot.lane.b32.xlu1 %v5672_v16, %s5279_s28 }
 0x260   : > { %1245 = vrot.lane.b32.xlu0 %v5674_v26, %s5279_s28 }
 0x263   : > { %1251 = vrot.lane.b32.xlu1 %v5680_v39, %s5279_s28 }
 0x264   : > { %1249 = vrot.lane.b32.xlu0 %v5682_v40, %s5279_s28 }
 0x267   : > { %1255 = vrot.lane.b32.xlu1 %v5688_v49, %s5279_s28 }
 0x268   : > { %1378 = vrot.lane.b32.xlu0 %v5664_v12, %s5280_s20 }
 0x26b   : > { %1380 = vrot.lane.b32.xlu1 %v5662_v54, %s5280_s20 }
 0x26c   : > { %1253 = vrot.lane.b32.xlu0 %v5690_v50, %s5279_s28  ;;  %s5283_s28 = smov 80  }
 0x2b1   : > { %v930_v44 = vpop.permute.xlu1 %929 }
 0x2b2   : > { %v928_v11 = vpop.permute.xlu0 %927  ;;  %v972_v52 = vsel %vm943_vm1, %v930_v44, 0 }
 0x2b3   : > { %4639 = vmatprep.subr.msk.bf16.mxu1 %vm943_vm1, %v928_v11  ;;  %v969_v51 = vsel %vm943_vm1, %v928_v11, 0 }
 0x2b4   : > { %4308 = vmatpush3.bf16.xpose.msra.mxu1 %v969_v51 }
 0x2b5   : > { %4640 = vmatprep.subr.msk.bf16.mxu1 %vm943_vm1, %v930_v44 }
 0x2ba   : > { %v932_v23 = vpop.permute.xlu1 %931 }
 0x2bb   : > { %v975_v29 = vsel %vm943_vm1, %v932_v23, 0 }
 0x2bc   : > { %4310 = vmatpush3.bf16.xpose.msra.mxu1 %v972_v52 }
 0x2bd   : > { %4641 = vmatprep.subr.msk.bf16.mxu1 %vm943_vm1, %v932_v23 }
 0x2be   : > { %v934_v28 = vpop.permute.xlu1 %933 }
 0x2bf   : > { %v978_v37 = vsel %vm943_vm1, %v934_v28, 0 }
 0x2c2   : > { %v938_v53 = vpop.permute.xlu1 %937  ;;  %v936_v56 = vpop.permute.xlu0 %935 }
 0x2c3   : > { %v981_v60 = vsel %vm943_vm1, %v936_v56, 0  ;;  %v984_v63 = vsel %vm943_vm1, %v938_v53, 0 }
 0x2c4   : > { %4312 = vmatpush3.bf16.xpose.msra.mxu1 %v975_v29 }
 0x2c5   : > { %4642 = vmatprep.subr.msk.bf16.mxu1 %vm943_vm1, %v934_v28 }
 0x2c9   : > { %v942_v57 = vpop.permute.xlu1 %941 }
 0x2ca   : > { %v940_v17 = vpop.permute.xlu0 %939  ;;  %v990_v45 = vsel %vm943_vm1, %v942_v57, 0 }
 0x2cb   : > { %v987_v2 = vsel %vm943_vm1, %v940_v17, 0 }
 0x2cc   : > { %4314 = vmatpush3.bf16.xpose.msra.mxu1 %v978_v37 }
 0x2cd   : > { %4643 = vmatprep.subr.msk.bf16.mxu1 %vm943_vm1, %v936_v56  ;;  %v1244_v58 = vpop.permute.xlu1 %1243 }
 0x2ce   : > { %v1242_v35 = vpop.permute.xlu0 %1241 }
 0x2cf   : > { %4339 = vmatprep.subr.bf16.mxu0 %v1242_v35 }
 0x2d0   : > { %4340 = vmatpush3.bf16.msra.mxu0 %v1242_v35 }
 0x2d1   : > { %4341 = vmatprep.subr.bf16.mxu0 %v1244_v58  ;;  %v1248_v61 = vpop.permute.xlu1 %1247 }
 0x2d2   : > { %v1246_v59 = vpop.permute.xlu0 %1245 }
 0x2d4   : > { %4316 = vmatpush3.bf16.xpose.msra.mxu1 %v981_v60  ;;  %4342 = vmatpush3.bf16.msra.mxu0 %v1244_v58 }
 0x2d5   : > { %4644 = vmatprep.subr.msk.bf16.mxu1 %vm943_vm1, %v938_v53  ;;  %4343 = vmatprep.subr.bf16.mxu0 %v1246_v59  ;;  %v1252_v47 = vpop.permute.xlu1 %1251 }
 0x2d6   : > { %v1250_v62 = vpop.permute.xlu0 %1249 }
 0x2d8   : > { %4344 = vmatpush3.bf16.msra.mxu0 %v1246_v59 }
 0x2d9   : > { %4345 = vmatprep.subr.bf16.mxu0 %v1248_v61  ;;  %v1256_v4 = vpop.permute.xlu1 %1255 }
 0x2da   : > { %v5721_v21 = vpop.permute.xlu0 %1378 }
 0x2dc   : > { %4318 = vmatpush3.bf16.xpose.msra.mxu1 %v984_v63  ;;  %4346 = vmatpush3.bf16.msra.mxu0 %v1248_v61 }
 0x2dd   : > { %4645 = vmatprep.subr.msk.bf16.mxu1 %vm943_vm1, %v940_v17  ;;  %4347 = vmatprep.subr.bf16.mxu0 %v1250_v62  ;;  %v5779_v0 = vpop.permute.xlu1 %1380 }
 0x2de   : > { %v1254_v3 = vpop.permute.xlu0 %1253 }
 0x2e0   : > { %4348 = vmatpush3.bf16.msra.mxu0 %v1250_v62 }
 0x2e1   : > { %4349 = vmatprep.subr.bf16.mxu0 %v1252_v47 }
 0x2e4   : > { %4320 = vmatpush3.bf16.xpose.msra.mxu1 %v987_v2  ;;  %4350 = vmatpush3.bf16.msra.mxu0 %v1252_v47 }
 0x2e5   : > { %4646 = vmatprep.subr.msk.bf16.mxu1 %vm943_vm1, %v942_v57  ;;  %4351 = vmatprep.subr.bf16.mxu0 %v1254_v3 }
 0x2e8   : > { %4352 = vmatpush3.bf16.msra.mxu0 %v1254_v3 }
 0x2e9   : > { %4353 = vmatprep.subr.bf16.mxu0 %v1256_v4 }
 0x2ec   : > { %4322 = vmatpush3.bf16.xpose.msra.mxu1 %v990_v45  ;;  %4354 = vmatpush3.bf16.msra.mxu0 %v1256_v4 }
 0x2ed   : > { %4647 = vmatprep.subr.msk.bf16.mxu0 %vm943_vm1, %v5721_v21 }
 0x2f3   : > { %4324 = vmatmul.mubr.msk.bf16.vlgmr.msra.gmra.mrb[0].mxu1 %vm943_vm1, %v5662_v54 }
 0x2f4   : > { %4327 = vmatprep.mubr.msk.bf16.mxu1 %vm943_vm1, %v5674_v26 }
 0x2fb   : > { %4328 = vmatmul.mubr.msk.bf16.gmra.mrb[4].mxu1 %vm943_vm1, %v5672_v16 }
 0x2fc   : > { %4331 = vmatprep.mubr.msk.bf16.mxu1 %vm943_vm1, %v5682_v40 }
 0x303   : > { %4332 = vmatmul.mubr.msk.bf16.gmra.mrb[8].mxu1 %vm943_vm1, %v5680_v39 }
 0x304   : > { %4335 = vmatprep.mubr.msk.bf16.mxu1 %vm943_vm1, %v5690_v50 }
 0x30b   : > { %4336 = vmatmul.mubr.msk.bf16.gmra.mrb[12].mxu1 %vm943_vm1, %v5688_v49 }
 0x3c6   : > { %v4325_v25 = vpop.f32.mrb[0].mxu1 }
 0x3c7   : > { %1093 = vmax.xlane.f32.xlu0 %v4325_v25  ;;  %v1026_v5 = vpop.f32.mrb[1].mxu1 }
 0x3c8   : > { %v4326_v6 = vpop.f32.mrb[2].mxu1 }
 0x3c9   : > { %v1029_v7 = vpop.f32.mrb[3].mxu1 }
 0x3ca   : > { %1091 = vmax.xlane.f32.xlu1 %v1029_v7 }
 0x3cb   : > { %1089 = vmax.xlane.f32.xlu0 %v1026_v5 }
 0x3ce   : > { %v4329_v8 = vpop.f32.mrb[4].mxu1 }
 0x3cf   : > { %1095 = vmax.xlane.f32.xlu0 %v4326_v6  ;;  %v5742_v31 = vpop.f32.mrb[5].mxu1 }
 0x3d0   : > { %v5744_v9 = vpop.f32.mrb[6].mxu1 }
 0x3d1   : > { %1103 = vmax.xlane.f32.xlu1 %v5744_v9  ;;  %v5747_v43 = vpop.f32.mrb[7].mxu1 }
 0x3d3   : > { %1101 = vmax.xlane.f32.xlu0 %v4329_v8 }
 0x3d5   : > { %1099 = vmax.xlane.f32.xlu1 %v5747_v43 }
 0x3d6   : > { %v5750_v13 = vpop.f32.mrb[8].mxu1 }
 0x3d7   : > { %1097 = vmax.xlane.f32.xlu0 %v5742_v31  ;;  %v5753_v14 = vpop.f32.mrb[9].mxu1 }
 0x3d8   : > { %v5755_v15 = vpop.f32.mrb[10].mxu1 }
 0x3d9   : > { %1111 = vmax.xlane.f32.xlu1 %v5755_v15  ;;  %v5758_v18 = vpop.f32.mrb[11].mxu1 }
 0x3db   : > { %1109 = vmax.xlane.f32.xlu0 %v5750_v13 }
 0x3dd   : > { %1107 = vmax.xlane.f32.xlu1 %v5758_v18 }
 0x3de   : > { %v5762_v19 = vpop.f32.mrb[12].mxu1 }
 0x3df   : > { %1105 = vmax.xlane.f32.xlu0 %v5753_v14  ;;  %v5765_v22 = vpop.f32.mrb[13].mxu1 }
 0x3e0   : > { %v5767_v55 = vpop.f32.mrb[14].mxu1 }
 0x3e1   : > { %v5769_v27 = vpop.f32.mrb[15].mxu1 }
 0x3e3   : > { %1117 = vmax.xlane.f32.xlu0 %v5762_v19 }
 0x3e7   : > { %1113 = vmax.xlane.f32.xlu0 %v5765_v22 }
 0x3ee   : > { %1384 = vrot.lane.b32.xlu1 %v5672_v16, %s5280_s20 }
 0x3fd   : > { %1382 = vrot.lane.b32.xlu0 %v5674_v26, %s5280_s20 }
 0x412   : > { %1119 = vmax.xlane.f32.xlu1 %v5767_v55 }
 0x416   : > { %1115 = vmax.xlane.f32.xlu1 %v5769_v27 }
 0x454   : > { %v1094_v30 = vpop.xlane.xlu0 %1093 }
 0x455   : > { %v1123_v32 = vsub.f32 %v4325_v25, %v1094_v30 }
 0x457   : > { %v1141_v33 = vmul.f32 1.442695, %v1123_v32  ;;  %v1092_v34 = vpop.xlane.xlu1 %1091 }
 0x458   : > { %v1122_v20 = vsub.f32 %v1029_v7, %v1092_v34  ;;  %v1090_v38 = vpop.xlane.xlu0 %1089 }
 0x459   : > { %4938 = vpow2.f32 %v1141_v33  ;;  %v1121_v1 = vsub.f32 %v1026_v5, %v1090_v38 }
 0x45a   : > { %v1139_v41 = vmul.f32 1.442695, %v1122_v20 }
 0x45b   : > { %v1137_v10 = vmul.f32 1.442695, %v1121_v1 }
 0x45c   : > { %4940 = vpow2.f32 %v1139_v41  ;;  %v1096_v36 = vpop.xlane.xlu0 %1095 }
 0x45d   : > { %4942 = vpow2.f32 %v1137_v10  ;;  %v1124_v42 = vsub.f32 %v4326_v6, %v1096_v36 }
 0x45e   : > { %v1104_v52 = vpop.xlane.xlu1 %1103 }
 0x45f   : > { %v1143_v46 = vmul.f32 1.442695, %v1124_v42  ;;  %v1128_v59 = vsub.f32 %v5744_v9, %v1104_v52 }
 0x460   : > { %v1102_v44 = vpop.xlane.xlu0 %1101 }
 0x461   : > { %4944 = vpow2.f32 %v1143_v46  ;;  %v1127_v29 = vsub.f32 %v4329_v8, %v1102_v44  ;;  %v1151_v63 = vmul.f32 1.442695, %v1128_v59 }
 0x462   : > { %v1100_v53 = vpop.xlane.xlu1 %1099 }
 0x463   : > { %v5781_v24 = vpop.eup %4938  ;;  %v1149_v57 = vmul.f32 1.442695, %v1127_v29  ;;  %v1126_v37 = vsub.f32 %v5747_v43, %v1100_v53 }
 0x464   : > { %1173 = vadd.xlane.f32.xlu1 %v5781_v24  ;;  %v1098_v23 = vpop.xlane.xlu0 %1097 }
 0x465   : > { %v1125_v17 = vsub.f32 %v5742_v31, %v1098_v23  ;;  %4946 = vpow2.f32 %v1149_v57  ;;  %v1147_v61 = vmul.f32 1.442695, %v1126_v37 }
 0x466   : > { %v5784_v48 = vpop.eup %4940  ;;  %v1112_v35 = vpop.xlane.xlu1 %1111 }
 0x467   : > { %v5786_v11 = vpop.eup %4942  ;;  %1171 = vadd.xlane.f32.xlu0 %v5784_v48  ;;  %v1145_v60 = vmul.f32 1.442695, %v1125_v17  ;;  %v1132_v6 = vsub.f32 %v5755_v15, %v1112_v35 }
 0x468   : > { %1169 = vadd.xlane.f32.xlu1 %v5786_v11  ;;  %v1110_v28 = vpop.xlane.xlu0 %1109 }
 0x469   : > { %v1131_v62 = vsub.f32 %v5750_v13, %v1110_v28  ;;  %4948 = vpow2.f32 %v1145_v60  ;;  %v1159_v43 = vmul.f32 1.442695, %v1132_v6 }
 0x46a   : > { %v1108_v47 = vpop.xlane.xlu1 %1107  ;;  %4950 = vpow2.f32 %v1147_v61  ;;  %v1419_v61 = vsel %vm943_vm1, %v5721_v21, 0 }
 0x46b   : > { %v5790_v51 = vpop.eup %4944  ;;  %v1157_v3 = vmul.f32 1.442695, %v1131_v62  ;;  %4952 = vpow2.f32 %v1151_v63  ;;  %v1130_v13 = vsub.f32 %v5758_v18, %v1108_v47 }
 0x46c   : > { %1175 = vadd.xlane.f32.xlu1 %v5790_v51  ;;  %v1106_v56 = vpop.xlane.xlu0 %1105 }
 0x46d   : > { %v1129_v4 = vsub.f32 %v5753_v14, %v1106_v56  ;;  %4954 = vpow2.f32 %v1157_v3  ;;  %v1155_v30 = vmul.f32 1.442695, %v1130_v13 }
 0x46e   : > { %v5807_v31 = vpop.permute.xlu1 %1384 }
 0x46f   : > { %v1153_v7 = vmul.f32 1.442695, %v1129_v4  ;;  %v5805_v8 = vpop.eup %4946 }
 0x470   : > { %v1118_v58 = vpop.xlane.xlu0 %1117 }
 0x471   : > { %v1135_v2 = vsub.f32 %v5762_v19, %v1118_v58 }
 0x473   : > { %v1165_v25 = vmul.f32 1.442695, %v1135_v2  ;;  %v5811_v14 = vpop.eup %4948 }
 0x474   : > { %v1114_v45 = vpop.xlane.xlu0 %1113 }
 0x475   : > { %v1133_v5 = vsub.f32 %v5765_v22, %v1114_v45  ;;  %4956 = vpow2.f32 %v1165_v25  ;;  %v5813_v22 = vpop.eup %4950 }
 0x476   : > { %4958 = vpow2.f32 %v1153_v7  ;;  %v5818_v33 = vpop.eup %4952 }
 0x477   : > { %v1161_v9 = vmul.f32 1.442695, %v1133_v5  ;;  %v5820_v18 = vpop.eup %4954 }
 0x478   : > { %v1383_v46 = vpop.permute.xlu0 %1382 }
 0x479   : > { %4960 = vpow2.f32 %v1161_v9 }
 0x47a   : > { %4962 = vpow2.f32 %v1159_v43 }
 0x47d   : > { %1386 = vrot.lane.b32.xlu0 %v5682_v40, %s5280_s20  ;;  %1388 = vrot.lane.b32.xlu1 %v5680_v39, %s5280_s20 }
 0x47f   : > { %v5825_v38 = vpop.eup %4956 }
 0x480   : > { %v5827_v1 = vpop.eup %4958 }
 0x483   : > { %v5831_v41 = vpop.eup %4960 }
 0x484   : > { %v5833_v10 = vpop.eup %4962 }
 0x49c   : > { %1181 = vadd.xlane.f32.xlu0 %v5805_v8 }
 0x49f   : > { %v1120_v19 = vpop.xlane.xlu1 %1119 }
 0x4a0   : > { %v1136_v15 = vsub.f32 %v5767_v55, %v1120_v19  ;;  %1177 = vadd.xlane.f32.xlu0 %v5811_v14 }
 0x4a1   : > { %1179 = vadd.xlane.f32.xlu1 %v5813_v22 }
 0x4a2   : > { %v1167_v32 = vmul.f32 1.442695, %v1136_v15 }
 0x4a3   : > { %v1116_v34 = vpop.xlane.xlu1 %1115 }
 0x4a4   : > { %4964 = vpow2.f32 %v1167_v32  ;;  %v1134_v20 = vsub.f32 %v5769_v27, %v1116_v34  ;;  %1183 = vadd.xlane.f32.xlu0 %v5818_v33 }
 0x4a5   : > { %1189 = vadd.xlane.f32.xlu1 %v5820_v18  ;;  %4966 = vpow2.f32 %v1155_v30 }
 0x4a6   : > { %v1163_v55 = vmul.f32 1.442695, %v1134_v20 }
 0x4a8   : > { %1197 = vadd.xlane.f32.xlu0 %v5825_v38  ;;  %4968 = vpow2.f32 %v1163_v55 }
 0x4a9   : > { %1185 = vadd.xlane.f32.xlu1 %v5827_v1 }
 0x4ac   : > { %1193 = vadd.xlane.f32.xlu0 %v5831_v41 }
 0x4ad   : > { %1191 = vadd.xlane.f32.xlu1 %v5833_v10 }
 0x4ae   : > { %v5837_v27 = vpop.eup %4964 }
 0x4af   : > { %v5839_v36 = vpop.eup %4966 }
 0x4b0   : > { %1199 = vadd.xlane.f32.xlu0 %v5837_v27 }
 0x4b1   : > { %1187 = vadd.xlane.f32.xlu1 %v5839_v36 }
 0x4b2   : > { %v5843_v42 = vpop.eup %4968 }
 0x4b5   : > { %1195 = vadd.xlane.f32.xlu1 %v5843_v42 }
 0x4c6   : > { %1392 = vrot.lane.b32.xlu1 %v5688_v49, %s5280_s20  ;;  %1390 = vrot.lane.b32.xlu0 %v5690_v50, %s5280_s20  ;;  %s5284_s20 = smov 112  }
 0x4ca   : > { %1364 = vrot.lane.b32.xlu1 %v5662_v54, %s5281_s21  ;;  %1362 = vrot.lane.b32.xlu0 %v5664_v12, %s5281_s21 }
 0x4ce   : > { %1368 = vrot.lane.b32.xlu1 %v5672_v16, %s5281_s21  ;;  %1366 = vrot.lane.b32.xlu0 %v5674_v26, %s5281_s21 }
 0x4d2   : > { %1372 = vrot.lane.b32.xlu1 %v5680_v39, %s5281_s21  ;;  %1370 = vrot.lane.b32.xlu0 %v5682_v40, %s5281_s21 }
 0x4d6   : > { %1376 = vrot.lane.b32.xlu1 %v5688_v49, %s5281_s21  ;;  %1374 = vrot.lane.b32.xlu0 %v5690_v50, %s5281_s21  ;;  %s5285_s21 = smov 48  }
 0x4da   : > { %1693 = vrot.lane.b32.xlu1 %v5662_v54, %s5282_s27  ;;  %1691 = vrot.lane.b32.xlu0 %v5664_v12, %s5282_s27 }
 0x4de   : > { %1697 = vrot.lane.b32.xlu1 %v5672_v16, %s5282_s27  ;;  %1695 = vrot.lane.b32.xlu0 %v5674_v26, %s5282_s27 }
 0x4e2   : > { %1701 = vrot.lane.b32.xlu1 %v5680_v39, %s5282_s27  ;;  %1699 = vrot.lane.b32.xlu0 %v5682_v40, %s5282_s27 }
 0x4e6   : > { %1705 = vrot.lane.b32.xlu1 %v5688_v49, %s5282_s27  ;;  %1703 = vrot.lane.b32.xlu0 %v5690_v50, %s5282_s27  ;;  %s5286_s27 = smov 72  }
 0x4ea   : > { %1830 = vrot.lane.b32.xlu1 %v5662_v54, %s5283_s28  ;;  %1828 = vrot.lane.b32.xlu0 %v5664_v12, %s5283_s28 }
 0x4f1   : > { %v1174_v44 = vpop.xlane.xlu1 %1173 }
 0x4f4   : > { %v1172_v23 = vpop.xlane.xlu0 %1171 }
 0x4f5   : > { %4970 = vrcp.f32 %v1172_v23  ;;  %v1170_v52 = vpop.xlane.xlu1 %1169 }
 0x4f6   : > { %4972 = vrcp.f32 %v1170_v52 }
 0x4f7   : > { %4974 = vrcp.f32 %v1174_v44 }
 0x4f8   : > { %v1387_v21 = vpop.permute.xlu0 %1386 }
 0x4f9   : > { %v1176_v28 = vpop.xlane.xlu1 %1175 }
 0x4fa   : > { %4976 = vrcp.f32 %v1176_v28 }
 0x4ff   : > { %v4971_v29 = vpop.eup %4970 }
 0x500   : > { %v4973_v53 = vpop.eup %4972  ;;  %v1218_v56 = vmul.f32 %v4971_v29, %v5784_v48  ;;  %v1422_v48 = vsel %vm943_vm1, %v5779_v0, 0 }
 0x501   : > { %v1217_v57 = vmul.f32 %v4973_v53, %v5786_v11  ;;  %v4975_v17 = vpop.eup %4974  ;;  %v1428_v11 = vsel %vm943_vm1, %v5807_v31, 0 }
 0x502   : > { %v1219_v58 = vmul.f32 %v4975_v17, %v5781_v24  ;;  %v1425_v24 = vsel %vm943_vm1, %v1383_v46, 0 }
 0x503   : > { %v1233_v37 = vpack.c.bf16 %v1218_v56, %v1217_v57 }
 0x504   : > { %v4977_v35 = vpop.eup %4976 }
 0x505   : > { %v1220_v59 = vmul.f32 %v4977_v35, %v5790_v51  ;;  %4355 = vmatprep.mubr.bf16.mxu0 %v1233_v37  ;;  %v1431_v51 = vsel %vm943_vm1, %v1387_v21, 0 }
 0x507   : > { %v1234_v60 = vpack.c.bf16 %v1220_v59, %v1219_v58 }
 0x509   : > { %4356 = vmatmul.mubr.bf16.vlgmr.msra.gmra.mrb[16].mxu0 %v1234_v60 }
 0x50a   : > { %4372 = vmatpush3.bf16.xpose.msra.mxu0 %v1419_v61 }
 0x50b   : > { %4648 = vmatprep.subr.msk.bf16.mxu0 %vm943_vm1, %v5779_v0  ;;  %v1389_v0 = vpop.permute.xlu1 %1388 }
 0x50c   : > { %v1434_v2 = vsel %vm943_vm1, %v1389_v0, 0 }
 0x512   : > { %4374 = vmatpush3.bf16.xpose.msra.mxu0 %v1422_v48 }
 0x513   : > { %4649 = vmatprep.subr.msk.bf16.mxu0 %vm943_vm1, %v1383_v46 }
 0x51a   : > { %4376 = vmatpush3.bf16.xpose.msra.mxu0 %v1425_v24 }
 0x51b   : > { %4650 = vmatprep.subr.msk.bf16.mxu0 %vm943_vm1, %v5807_v31 }
 0x522   : > { %4378 = vmatpush3.bf16.xpose.msra.mxu0 %v1428_v11 }
 0x523   : > { %4651 = vmatprep.subr.msk.bf16.mxu0 %vm943_vm1, %v1387_v21 }
 0x529   : > { %v1182_v62 = vpop.xlane.xlu0 %1181 }
 0x52a   : > { %4380 = vmatpush3.bf16.xpose.msra.mxu0 %v1431_v51 }
 0x52b   : > { %4652 = vmatprep.subr.msk.bf16.mxu0 %vm943_vm1, %v1389_v0 }
 0x52d   : > { %v1178_v63 = vpop.xlane.xlu0 %1177 }
 0x52e   : > { %4978 = vrcp.f32 %v1178_v63  ;;  %v1180_v47 = vpop.xlane.xlu1 %1179 }
 0x52f   : > { %4980 = vrcp.f32 %v1180_v47 }
 0x530   : > { %4982 = vrcp.f32 %v1182_v62 }
 0x531   : > { %v1184_v3 = vpop.xlane.xlu0 %1183 }
 0x532   : > { %4382 = vmatpush3.bf16.xpose.msra.mxu0 %v1434_v2  ;;  %4984 = vrcp.f32 %v1184_v3  ;;  %v1190_v4 = vpop.xlane.xlu1 %1189 }
 0x535   : > { %v1198_v45 = vpop.xlane.xlu0 %1197 }
 0x536   : > { %v1186_v25 = vpop.xlane.xlu1 %1185 }
 0x538   : > { %v4979_v5 = vpop.eup %4978 }
 0x539   : > { %v4981_v6 = vpop.eup %4980  ;;  %v1194_v7 = vpop.xlane.xlu0 %1193  ;;  %v1221_v31 = vmul.f32 %v4979_v5, %v5811_v14 }
 0x53a   : > { %v4983_v9 = vpop.eup %4982  ;;  %v1192_v43 = vpop.xlane.xlu1 %1191  ;;  %v1222_v13 = vmul.f32 %v4981_v6, %v5813_v22 }
 0x53b   : > { %4986 = vrcp.f32 %v1192_v43  ;;  %v1223_v32 = vmul.f32 %v4983_v9, %v5805_v8 }
 0x53c   : > { %v4985_v19 = vpop.eup %4984  ;;  %v1235_v15 = vpack.c.bf16 %v1222_v13, %v1221_v31  ;;  %4988 = vrcp.f32 %v1186_v25 }
 0x53d   : > { %v1200_v30 = vpop.xlane.xlu0 %1199  ;;  %v1224_v34 = vmul.f32 %v4985_v19, %v5818_v33  ;;  %4990 = vrcp.f32 %v1190_v4 }
 0x53e   : > { %v1188_v20 = vpop.xlane.xlu1 %1187  ;;  %4359 = vmatprep.mubr.bf16.mxu0 %v1235_v15 }
 0x53f   : > { %4992 = vrcp.f32 %v1188_v20  ;;  %v1236_v55 = vpack.c.bf16 %v1224_v34, %v1223_v32 }
 0x540   : > { %4994 = vrcp.f32 %v1194_v7 }
 0x541   : > { %4360 = vmatmul.mubr.bf16.gmra.mrb[20].mxu0 %v1236_v55  ;;  %v1391_v14 = vpop.permute.xlu0 %1390 }
 0x542   : > { %v1196_v46 = vpop.xlane.xlu1 %1195  ;;  %4653 = vmatprep.subr.msk.bf16.mxu0 %vm943_vm1, %v1391_v14  ;;  %v1437_v22 = vsel %vm943_vm1, %v1391_v14, 0 }
 0x543   : > { %4996 = vrcp.f32 %v1196_v46  ;;  %4384 = vmatpush3.bf16.xpose.msra.mxu0 %v1437_v22 }
 0x544   : > { %4998 = vrcp.f32 %v1200_v30 }
 0x545   : > { %v1363_v44 = vpop.permute.xlu0 %1362  ;;  %v4987_v8 = vpop.eup %4986  ;;  %5000 = vrcp.f32 %v1198_v45 }
 0x546   : > { %v1393_v33 = vpop.permute.xlu1 %1392  ;;  %v4989_v23 = vpop.eup %4988  ;;  %v1228_v53 = vmul.f32 %v4987_v8, %v5833_v10 }
 0x547   : > { %4654 = vmatprep.subr.msk.bf16.mxu0 %vm943_vm1, %v1393_v33  ;;  %v4991_v52 = vpop.eup %4990  ;;  %v1440_v57 = vsel %vm943_vm1, %v1393_v33, 0  ;;  %v1225_v17 = vmul.f32 %v4989_v23, %v5827_v1 }
 0x548   : > { %v1227_v58 = vmul.f32 %v4991_v52, %v5820_v18 }
 0x549   : > { %v4993_v28 = vpop.eup %4992  ;;  %v1367_v29 = vpop.permute.xlu0 %1366 }
 0x54a   : > { %v1365_v56 = vpop.permute.xlu1 %1364  ;;  %v1226_v37 = vmul.f32 %v4993_v28, %v5839_v36  ;;  %v4995_v35 = vpop.eup %4994  ;;  %v1238_v48 = vpack.c.bf16 %v1228_v53, %v1227_v58 }
 0x54b   : > { %4386 = vmatpush3.bf16.xpose.msra.mxu0 %v1440_v57  ;;  %v1229_v10 = vmul.f32 %v4995_v35, %v5831_v41 }
 0x54c   : > { %v1237_v59 = vpack.c.bf16 %v1226_v37, %v1225_v17 }
 0x54d   : > { %v4997_v60 = vpop.eup %4996  ;;  %v1371_v61 = vpop.permute.xlu0 %1370 }
 0x54e   : > { %v4999_v24 = vpop.eup %4998  ;;  %v1369_v11 = vpop.permute.xlu1 %1368  ;;  %4363 = vmatprep.mubr.bf16.mxu0 %v1237_v59  ;;  %v1230_v21 = vmul.f32 %v4997_v60, %v5843_v42 }
 0x54f   : > { %4364 = vmatmul.mubr.bf16.gmra.mrb[24].mxu0 %v1238_v48  ;;  %v5001_v51 = vpop.eup %5000  ;;  %v1232_v36 = vmul.f32 %v4999_v24, %v5837_v27 }
 0x550   : > { %v1239_v1 = vpack.c.bf16 %v1230_v21, %v1229_v10  ;;  %v1231_v18 = vmul.f32 %v5001_v51, %v5825_v38 }
 0x551   : > { %v1375_v62 = vpop.permute.xlu0 %1374 }
 0x552   : > { %v1373_v0 = vpop.permute.xlu1 %1372  ;;  %4367 = vmatprep.mubr.bf16.mxu0 %v1239_v1  ;;  %v1240_v47 = vpack.c.bf16 %v1232_v36, %v1231_v18 }
 0x555   : > { %v1692_v63 = vpop.permute.xlu0 %1691 }
 0x556   : > { %v1377_v2 = vpop.permute.xlu1 %1376  ;;  %4403 = vmatprep.subr.bf16.mxu1 %v1692_v63 }
 0x557   : > { %4368 = vmatmul.mubr.bf16.gmra.mrb[28].mxu0 %v1240_v47  ;;  %4404 = vmatpush3.bf16.msra.mxu1 %v1692_v63 }
 0x558   : > { %4387 = vmatprep.mubr.msk.bf16.mxu0 %vm943_vm1, %v1363_v44 }
 0x559   : > { %v1696_v42 = vpop.permute.xlu0 %1695 }
 0x55a   : > { %v1694_v41 = vpop.permute.xlu1 %1693 }
 0x55b   : > { %4405 = vmatprep.subr.bf16.mxu1 %v1694_v41 }
 0x55c   : > { %4406 = vmatpush3.bf16.msra.mxu1 %v1694_v41 }
 0x55d   : > { %4407 = vmatprep.subr.bf16.mxu1 %v1696_v42  ;;  %v1700_v38 = vpop.permute.xlu0 %1699 }
 0x55e   : > { %v1698_v27 = vpop.permute.xlu1 %1697 }
 0x55f   : > { %4388 = vmatmul.mubr.msk.bf16.vlgmr.msra.gmra.mrb[32].mxu0 %vm943_vm1, %v1365_v56 }
 0x560   : > { %4391 = vmatprep.mubr.msk.bf16.mxu0 %vm943_vm1, %v1367_v29  ;;  %4408 = vmatpush3.bf16.msra.mxu1 %v1696_v42 }
 0x561   : > { %4409 = vmatprep.subr.bf16.mxu1 %v1698_v27  ;;  %v1704_v4 = vpop.permute.xlu0 %1703 }
 0x562   : > { %v1702_v3 = vpop.permute.xlu1 %1701 }
 0x564   : > { %4410 = vmatpush3.bf16.msra.mxu1 %v1698_v27 }
 0x565   : > { %4411 = vmatprep.subr.bf16.mxu1 %v1700_v38  ;;  %v5913_v25 = vpop.permute.xlu0 %1828 }
 0x566   : > { %v1706_v45 = vpop.permute.xlu1 %1705 }
 0x567   : > { %4392 = vmatmul.mubr.msk.bf16.gmra.mrb[36].mxu0 %vm943_vm1, %v1369_v11 }
 0x568   : > { %4395 = vmatprep.mubr.msk.bf16.mxu0 %vm943_vm1, %v1371_v61  ;;  %4412 = vmatpush3.bf16.msra.mxu1 %v1700_v38 }
 0x569   : > { %4413 = vmatprep.subr.bf16.mxu1 %v1702_v3 }
 0x56a   : > { %v5987_v60 = vpop.permute.xlu1 %1830 }
 0x56c   : > { %4414 = vmatpush3.bf16.msra.mxu1 %v1702_v3 }
 0x56d   : > { %4415 = vmatprep.subr.bf16.mxu1 %v1704_v4 }
 0x56f   : > { %4396 = vmatmul.mubr.msk.bf16.gmra.mrb[40].mxu0 %vm943_vm1, %v1373_v0 }
 0x570   : > { %4399 = vmatprep.mubr.msk.bf16.mxu0 %vm943_vm1, %v1375_v62  ;;  %4416 = vmatpush3.bf16.msra.mxu1 %v1704_v4 }
 0x571   : > { %4417 = vmatprep.subr.bf16.mxu1 %v1706_v45 }
 0x574   : > { %4418 = vmatpush3.bf16.msra.mxu1 %v1706_v45 }
 0x575   : > { %4655 = vmatprep.subr.msk.bf16.mxu1 %vm943_vm1, %v5913_v25 }
 0x577   : > { %4400 = vmatmul.mubr.msk.bf16.gmra.mrb[44].mxu0 %vm943_vm1, %v1377_v2 }
 0x5dc   : > { %v5918_v5 = vpop.f32.mrb[16].mxu0 }
 0x5dd   : > { %7164 = vst [vmem:[#allocation7_spill] sm:$0xff] %v5918_v5  ;;  %v5920_v6 = vpop.f32.mrb[17].mxu0 }
 0x5de   : > { %7165 = vst [vmem:[#allocation8_spill] sm:$0xff] %v5920_v6  ;;  %v5922_v7 = vpop.f32.mrb[18].mxu0 }
 0x5df   : > { %7166 = vst [vmem:[#allocation9_spill] sm:$0xff] %v5922_v7  ;;  %v5924_v31 = vpop.f32.mrb[19].mxu0 }
 0x5e0   : > { %7167 = vst [vmem:[#allocation10_spill] sm:$0xff] %v5924_v31 }
 0x614   : > { %v5926_v9 = vpop.f32.mrb[20].mxu0 }
 0x615   : > { %7168 = vst [vmem:[#allocation11_spill] sm:$0xff] %v5926_v9  ;;  %v5928_v43 = vpop.f32.mrb[21].mxu0 }
 0x616   : > { %7169 = vst [vmem:[#allocation12_spill] sm:$0xff] %v5928_v43  ;;  %v5930_v13 = vpop.f32.mrb[22].mxu0 }
 0x617   : > { %7170 = vst [vmem:[#allocation13_spill] sm:$0xff] %v5930_v13  ;;  %v5932_v19 = vpop.f32.mrb[23].mxu0 }
 0x618   : > { %7171 = vst [vmem:[#allocation14_spill] sm:$0xff] %v5932_v19 }
 0x622   : > { %v5934_v15 = vpop.f32.mrb[24].mxu0 }
 0x623   : > { %7172 = vst [vmem:[#allocation15_spill] sm:$0xff] %v5934_v15  ;;  %v5936_v30 = vpop.f32.mrb[25].mxu0 }
 0x624   : > { %7173 = vst [vmem:[#allocation16_spill] sm:$0xff] %v5936_v30  ;;  %v5938_v32 = vpop.f32.mrb[26].mxu0 }
 0x625   : > { %7174 = vst [vmem:[#allocation17_spill] sm:$0xff] %v5938_v32  ;;  %v5940_v34 = vpop.f32.mrb[27].mxu0 }
 0x626   : > { %7175 = vst [vmem:[#allocation18_spill] sm:$0xff] %v5940_v34 }
 0x62a   : > { %v5942_v20 = vpop.f32.mrb[28].mxu0 }
 0x62b   : > { %7176 = vst [vmem:[#allocation19_spill] sm:$0xff] %v5942_v20  ;;  %v5944_v55 = vpop.f32.mrb[29].mxu0 }
 0x62c   : > { %7177 = vst [vmem:[#allocation20_spill] sm:$0xff] %v5944_v55  ;;  %v5946_v14 = vpop.f32.mrb[30].mxu0 }
 0x62d   : > { %7178 = vst [vmem:[#allocation21_spill] sm:$0xff] %v5946_v14  ;;  %v5948_v46 = vpop.f32.mrb[31].mxu0 }
 0x62e   : > { %7179 = vst [vmem:[#allocation22_spill] sm:$0xff] %v5948_v46 }
 0x632   : > { %v4389_v22 = vpop.f32.mrb[32].mxu0 }
 0x633   : > { %1543 = vmax.xlane.f32.xlu0 %v4389_v22  ;;  %v1476_v44 = vpop.f32.mrb[33].mxu0 }
 0x634   : > { %v4390_v8 = vpop.f32.mrb[34].mxu0 }
 0x635   : > { %v1479_v33 = vpop.f32.mrb[35].mxu0 }
 0x636   : > { %1541 = vmax.xlane.f32.xlu1 %v1479_v33 }
 0x637   : > { %1539 = vmax.xlane.f32.xlu0 %v1476_v44 }
 0x63a   : > { %v4393_v23 = vpop.f32.mrb[36].mxu0 }
 0x63b   : > { %1545 = vmax.xlane.f32.xlu0 %v4390_v8  ;;  %v5950_v52 = vpop.f32.mrb[37].mxu0 }
 0x63c   : > { %v5952_v28 = vpop.f32.mrb[38].mxu0 }
 0x63d   : > { %1553 = vmax.xlane.f32.xlu1 %v5952_v28  ;;  %v5955_v29 = vpop.f32.mrb[39].mxu0 }
 0x63f   : > { %1551 = vmax.xlane.f32.xlu0 %v4393_v23 }
 0x641   : > { %1549 = vmax.xlane.f32.xlu1 %v5955_v29 }
 0x642   : > { %v5958_v53 = vpop.f32.mrb[40].mxu0 }
 0x643   : > { %1547 = vmax.xlane.f32.xlu0 %v5950_v52  ;;  %v5961_v56 = vpop.f32.mrb[41].mxu0 }
 0x644   : > { %v5963_v57 = vpop.f32.mrb[42].mxu0 }
 0x645   : > { %1561 = vmax.xlane.f32.xlu1 %v5963_v57  ;;  %v5966_v17 = vpop.f32.mrb[43].mxu0 }
 0x647   : > { %1559 = vmax.xlane.f32.xlu0 %v5958_v53 }
 0x649   : > { %1557 = vmax.xlane.f32.xlu1 %v5966_v17 }
 0x64a   : > { %v5970_v37 = vpop.f32.mrb[44].mxu0 }
 0x64b   : > { %1555 = vmax.xlane.f32.xlu0 %v5961_v56  ;;  %v5973_v35 = vpop.f32.mrb[45].mxu0 }
 0x64c   : > { %v5975_v58 = vpop.f32.mrb[46].mxu0 }
 0x64d   : > { %v5977_v59 = vpop.f32.mrb[47].mxu0 }
 0x64f   : > { %1567 = vmax.xlane.f32.xlu0 %v5970_v37 }
 0x653   : > { %1563 = vmax.xlane.f32.xlu0 %v5973_v35 }
 0x65a   : > { %1834 = vrot.lane.b32.xlu1 %v5672_v16, %s5283_s28 }
 0x669   : > { %1832 = vrot.lane.b32.xlu0 %v5674_v26, %s5283_s28 }
 0x67e   : > { %1569 = vmax.xlane.f32.xlu1 %v5975_v58 }
 0x682   : > { %1565 = vmax.xlane.f32.xlu1 %v5977_v59 }
 0x6c0   : > { %v1544_v61 = vpop.xlane.xlu0 %1543 }
 0x6c1   : > { %v1573_v48 = vsub.f32 %v4389_v22, %v1544_v61 }
 0x6c3   : > { %v1591_v24 = vmul.f32 1.442695, %v1573_v48  ;;  %v1542_v11 = vpop.xlane.xlu1 %1541 }
 0x6c4   : > { %v1572_v10 = vsub.f32 %v1479_v33, %v1542_v11  ;;  %v1540_v21 = vpop.xlane.xlu0 %1539 }
 0x6c5   : > { %5002 = vpow2.f32 %v1591_v24  ;;  %v1571_v51 = vsub.f32 %v1476_v44, %v1540_v21 }
 0x6c6   : > { %v1589_v1 = vmul.f32 1.442695, %v1572_v10 }
 0x6c7   : > { %v1587_v62 = vmul.f32 1.442695, %v1571_v51 }
 0x6c8   : > { %5004 = vpow2.f32 %v1589_v1  ;;  %v1546_v36 = vpop.xlane.xlu0 %1545 }
 0x6c9   : > { %5006 = vpow2.f32 %v1587_v62  ;;  %v1574_v0 = vsub.f32 %v4390_v8, %v1546_v36 }
 0x6ca   : > { %v1554_v38 = vpop.xlane.xlu1 %1553 }
 0x6cb   : > { %v1593_v18 = vmul.f32 1.442695, %v1574_v0  ;;  %v1578_v24 = vsub.f32 %v5952_v28, %v1554_v38 }
 0x6cc   : > { %v1552_v42 = vpop.xlane.xlu0 %1551 }
 0x6cd   : > { %5008 = vpow2.f32 %v1593_v18  ;;  %v1577_v4 = vsub.f32 %v4393_v23, %v1552_v42  ;;  %v1601_v51 = vmul.f32 1.442695, %v1578_v24 }
 0x6ce   : > { %v1550_v45 = vpop.xlane.xlu1 %1549 }
 0x6cf   : > { %v5989_v63 = vpop.eup %5002  ;;  %v1599_v44 = vmul.f32 1.442695, %v1577_v4  ;;  %v1576_v33 = vsub.f32 %v5955_v29, %v1550_v45 }
 0x6d0   : > { %1623 = vadd.xlane.f32.xlu1 %v5989_v63  ;;  %v1548_v27 = vpop.xlane.xlu0 %1547 }
 0x6d1   : > { %v1575_v8 = vsub.f32 %v5950_v52, %v1548_v27  ;;  %5010 = vpow2.f32 %v1599_v44  ;;  %v1597_v10 = vmul.f32 1.442695, %v1576_v33 }
 0x6d2   : > { %v5992_v47 = vpop.eup %5004  ;;  %v1562_v61 = vpop.xlane.xlu1 %1561 }
 0x6d3   : > { %v5994_v2 = vpop.eup %5006  ;;  %1621 = vadd.xlane.f32.xlu0 %v5992_v47  ;;  %v1595_v11 = vmul.f32 1.442695, %v1575_v8  ;;  %v1582_v28 = vsub.f32 %v5963_v57, %v1562_v61 }
 0x6d4   : > { %1619 = vadd.xlane.f32.xlu1 %v5994_v2  ;;  %v1560_v3 = vpop.xlane.xlu0 %1559 }
 0x6d5   : > { %v1581_v21 = vsub.f32 %v5958_v53, %v1560_v3  ;;  %5012 = vpow2.f32 %v1595_v11  ;;  %v1609_v27 = vmul.f32 1.442695, %v1582_v28 }
 0x6d6   : > { %v1558_v1 = vpop.xlane.xlu1 %1557  ;;  %5014 = vpow2.f32 %v1597_v10 }
 0x6d7   : > { %v5998_v41 = vpop.eup %5008  ;;  %v1607_v62 = vmul.f32 1.442695, %v1581_v21  ;;  %5016 = vpow2.f32 %v1601_v51 }
 0x6d8   : > { %1625 = vadd.xlane.f32.xlu1 %v5998_v41  ;;  %v1556_v22 = vpop.xlane.xlu0 %1555 }
 0x6d9   : > { %v1579_v52 = vsub.f32 %v5961_v56, %v1556_v22  ;;  %5018 = vpow2.f32 %v1607_v62  ;;  %v1580_v56 = vsub.f32 %v5966_v17, %v1558_v1 }
 0x6da   : > { %v6015_v53 = vpop.permute.xlu1 %1834 }
 0x6db   : > { %v1603_v18 = vmul.f32 1.442695, %v1579_v52  ;;  %v6013_v42 = vpop.eup %5010  ;;  %v1605_v4 = vmul.f32 1.442695, %v1580_v56 }
 0x6dc   : > { %v1568_v48 = vpop.xlane.xlu0 %1567 }
 0x6dd   : > { %v1585_v23 = vsub.f32 %v5970_v37, %v1568_v48 }
 0x6df   : > { %v1615_v29 = vmul.f32 1.442695, %v1585_v23  ;;  %v6019_v38 = vpop.eup %5012 }
 0x6e0   : > { %v1564_v36 = vpop.xlane.xlu0 %1563 }
 0x6e1   : > { %v1583_v0 = vsub.f32 %v5973_v35, %v1564_v36  ;;  %5020 = vpow2.f32 %v1615_v29  ;;  %v6021_v35 = vpop.eup %5014 }
 0x6e2   : > { %5022 = vpow2.f32 %v1603_v18  ;;  %v6026_v22 = vpop.eup %5016 }
 0x6e3   : > { %v1611_v37 = vmul.f32 1.442695, %v1583_v0  ;;  %v6028_v17 = vpop.eup %5018 }
 0x6e4   : > { %v1833_v21 = vpop.permute.xlu0 %1832 }
 0x6e5   : > { %5024 = vpow2.f32 %v1611_v37 }
 0x6e6   : > { %5026 = vpow2.f32 %v1609_v27 }
 0x6e9   : > { %1836 = vrot.lane.b32.xlu0 %v5682_v40, %s5283_s28  ;;  %1838 = vrot.lane.b32.xlu1 %v5680_v39, %s5283_s28 }
 0x6eb   : > { %v6033_v33 = vpop.eup %5020 }
 0x6ec   : > { %v6035_v61 = vpop.eup %5022 }
 0x6ef   : > { %v6039_v48 = vpop.eup %5024 }
 0x6f0   : > { %v6041_v24 = vpop.eup %5026 }
 0x708   : > { %1631 = vadd.xlane.f32.xlu0 %v6013_v42 }
 0x70b   : > { %v1570_v3 = vpop.xlane.xlu1 %1569 }
 0x70c   : > { %v1586_v57 = vsub.f32 %v5975_v58, %v1570_v3  ;;  %1627 = vadd.xlane.f32.xlu0 %v6019_v38 }
 0x70d   : > { %1629 = vadd.xlane.f32.xlu1 %v6021_v35 }
 0x70e   : > { %v1617_v45 = vmul.f32 1.442695, %v1586_v57  ;;  %v1869_v57 = vsel %vm943_vm1, %v5913_v25, 0 }
 0x70f   : > { %v1566_v44 = vpop.xlane.xlu1 %1565 }
 0x710   : > { %5028 = vpow2.f32 %v1617_v45  ;;  %v1584_v8 = vsub.f32 %v5977_v59, %v1566_v44  ;;  %1633 = vadd.xlane.f32.xlu0 %v6026_v22 }
 0x711   : > { %1639 = vadd.xlane.f32.xlu1 %v6028_v17  ;;  %5030 = vpow2.f32 %v1605_v4 }
 0x712   : > { %v1613_v58 = vmul.f32 1.442695, %v1584_v8 }
 0x714   : > { %1647 = vadd.xlane.f32.xlu0 %v6033_v33  ;;  %5032 = vpow2.f32 %v1613_v58 }
 0x715   : > { %1635 = vadd.xlane.f32.xlu1 %v6035_v61 }
 0x718   : > { %1643 = vadd.xlane.f32.xlu0 %v6039_v48 }
 0x719   : > { %1641 = vadd.xlane.f32.xlu1 %v6041_v24 }
 0x71a   : > { %v6045_v59 = vpop.eup %5028 }
 0x71b   : > { %v6047_v11 = vpop.eup %5030 }
 0x71c   : > { %1649 = vadd.xlane.f32.xlu0 %v6045_v59 }
 0x71d   : > { %1637 = vadd.xlane.f32.xlu1 %v6047_v11 }
 0x71e   : > { %v6051_v10 = vpop.eup %5032 }
 0x721   : > { %1645 = vadd.xlane.f32.xlu1 %v6051_v10 }
 0x732   : > { %1842 = vrot.lane.b32.xlu1 %v5688_v49, %s5283_s28  ;;  %1840 = vrot.lane.b32.xlu0 %v5690_v50, %s5283_s28  ;;  %s5287_s28 = smov 104  }
 0x736   : > { %1814 = vrot.lane.b32.xlu1 %v5662_v54, %s5284_s20  ;;  %1812 = vrot.lane.b32.xlu0 %v5664_v12, %s5284_s20 }
 0x73a   : > { %1818 = vrot.lane.b32.xlu1 %v5672_v16, %s5284_s20  ;;  %1816 = vrot.lane.b32.xlu0 %v5674_v26, %s5284_s20 }
 0x73e   : > { %1822 = vrot.lane.b32.xlu1 %v5680_v39, %s5284_s20  ;;  %1820 = vrot.lane.b32.xlu0 %v5682_v40, %s5284_s20 }
 0x742   : > { %1826 = vrot.lane.b32.xlu1 %v5688_v49, %s5284_s20  ;;  %1824 = vrot.lane.b32.xlu0 %v5690_v50, %s5284_s20  ;;  %s5288_s20 = smov 40  }
 0x746   : > { %2143 = vrot.lane.b32.xlu1 %v5662_v54, %s5285_s21  ;;  %2141 = vrot.lane.b32.xlu0 %v5664_v12, %s5285_s21 }
 0x74a   : > { %2147 = vrot.lane.b32.xlu1 %v5672_v16, %s5285_s21  ;;  %2145 = vrot.lane.b32.xlu0 %v5674_v26, %s5285_s21 }
 0x74e   : > { %2151 = vrot.lane.b32.xlu1 %v5680_v39, %s5285_s21  ;;  %2149 = vrot.lane.b32.xlu0 %v5682_v40, %s5285_s21 }
 0x752   : > { %2155 = vrot.lane.b32.xlu1 %v5688_v49, %s5285_s21  ;;  %2153 = vrot.lane.b32.xlu0 %v5690_v50, %s5285_s21  ;;  %s7152_s21 = smov 8  }
 0x756   : > { %2280 = vrot.lane.b32.xlu1 %v5662_v54, %s5286_s27  ;;  %2278 = vrot.lane.b32.xlu0 %v5664_v12, %s5286_s27 }
 0x75d   : > { %v1624_v51 = vpop.xlane.xlu1 %1623 }
 0x760   : > { %v1622_v1 = vpop.xlane.xlu0 %1621 }
 0x761   : > { %5034 = vrcp.f32 %v1622_v1  ;;  %v1620_v23 = vpop.xlane.xlu1 %1619 }
 0x762   : > { %5036 = vrcp.f32 %v1620_v23 }
 0x763   : > { %5038 = vrcp.f32 %v1624_v51 }
 0x764   : > { %v1837_v25 = vpop.permute.xlu0 %1836 }
 0x765   : > { %v1626_v62 = vpop.xlane.xlu1 %1625 }
 0x766   : > { %5040 = vrcp.f32 %v1626_v62 }
 0x76b   : > { %v5035_v52 = vpop.eup %5034 }
 0x76c   : > { %v5037_v36 = vpop.eup %5036  ;;  %v1668_v29 = vmul.f32 %v5035_v52, %v5992_v47  ;;  %v1872_v47 = vsel %vm943_vm1, %v5987_v60, 0 }
 0x76d   : > { %v1667_v0 = vmul.f32 %v5037_v36, %v5994_v2  ;;  %v5039_v28 = vpop.eup %5038  ;;  %v1878_v2 = vsel %vm943_vm1, %v6015_v53, 0 }
 0x76e   : > { %v1669_v27 = vmul.f32 %v5039_v28, %v5989_v63  ;;  %v1875_v63 = vsel %vm943_vm1, %v1833_v21, 0 }
 0x76f   : > { %v1683_v18 = vpack.c.bf16 %v1668_v29, %v1667_v0 }
 0x770   : > { %v5041_v37 = vpop.eup %5040 }
 0x771   : > { %v1670_v56 = vmul.f32 %v5041_v37, %v5998_v41  ;;  %4419 = vmatprep.mubr.bf16.mxu1 %v1683_v18  ;;  %v1881_v41 = vsel %vm943_vm1, %v1837_v25, 0 }
 0x773   : > { %v1684_v3 = vpack.c.bf16 %v1670_v56, %v1669_v27 }
 0x775   : > { %4420 = vmatmul.mubr.bf16.vlgmr.msra.gmra.mrb[16].mxu1 %v1684_v3 }
 0x776   : > { %4436 = vmatpush3.bf16.xpose.msra.mxu1 %v1869_v57 }
 0x777   : > { %4656 = vmatprep.subr.msk.bf16.mxu1 %vm943_vm1, %v5987_v60  ;;  %v1839_v60 = vpop.permute.xlu1 %1838 }
 0x778   : > { %v1884_v8 = vsel %vm943_vm1, %v1839_v60, 0 }
 0x77e   : > { %4438 = vmatpush3.bf16.xpose.msra.mxu1 %v1872_v47 }
 0x77f   : > { %4657 = vmatprep.subr.msk.bf16.mxu1 %vm943_vm1, %v1833_v21 }
 0x786   : > { %4440 = vmatpush3.bf16.xpose.msra.mxu1 %v1875_v63 }
 0x787   : > { %4658 = vmatprep.subr.msk.bf16.mxu1 %vm943_vm1, %v6015_v53 }
 0x78e   : > { %4442 = vmatpush3.bf16.xpose.msra.mxu1 %v1878_v2 }
 0x78f   : > { %4659 = vmatprep.subr.msk.bf16.mxu1 %vm943_vm1, %v1837_v25 }
 0x795   : > { %v1632_v4 = vpop.xlane.xlu0 %1631 }
 0x796   : > { %4444 = vmatpush3.bf16.xpose.msra.mxu1 %v1881_v41 }
 0x797   : > { %4660 = vmatprep.subr.msk.bf16.mxu1 %vm943_vm1, %v1839_v60 }
 0x799   : > { %v1628_v45 = vpop.xlane.xlu0 %1627 }
 0x79a   : > { %5042 = vrcp.f32 %v1628_v45  ;;  %v1630_v44 = vpop.xlane.xlu1 %1629 }
 0x79b   : > { %5044 = vrcp.f32 %v1630_v44 }
 0x79c   : > { %5046 = vrcp.f32 %v1632_v4 }
 0x79d   : > { %v1634_v58 = vpop.xlane.xlu0 %1633 }
 0x79e   : > { %4446 = vmatpush3.bf16.xpose.msra.mxu1 %v1884_v8  ;;  %5048 = vrcp.f32 %v1634_v58  ;;  %v1640_v53 = vpop.xlane.xlu1 %1639 }
 0x7a1   : > { %v1648_v21 = vpop.xlane.xlu0 %1647 }
 0x7a2   : > { %v1636_v51 = vpop.xlane.xlu1 %1635 }
 0x7a4   : > { %v5043_v1 = vpop.eup %5042 }
 0x7a5   : > { %v5045_v23 = vpop.eup %5044  ;;  %v1644_v62 = vpop.xlane.xlu0 %1643  ;;  %v1671_v52 = vmul.f32 %v5043_v1, %v6019_v38 }
 0x7a6   : > { %v5047_v36 = vpop.eup %5046  ;;  %v1642_v29 = vpop.xlane.xlu1 %1641  ;;  %v1672_v0 = vmul.f32 %v5045_v23, %v6021_v35 }
 0x7a7   : > { %5050 = vrcp.f32 %v1642_v29  ;;  %v1673_v27 = vmul.f32 %v5047_v36, %v6013_v42 }
 0x7a8   : > { %v5049_v28 = vpop.eup %5048  ;;  %v1685_v18 = vpack.c.bf16 %v1672_v0, %v1671_v52  ;;  %5052 = vrcp.f32 %v1636_v51 }
 0x7a9   : > { %v1650_v37 = vpop.xlane.xlu0 %1649  ;;  %v1674_v56 = vmul.f32 %v5049_v28, %v6026_v22  ;;  %5054 = vrcp.f32 %v1640_v53 }
 0x7aa   : > { %v1638_v3 = vpop.xlane.xlu1 %1637  ;;  %4423 = vmatprep.mubr.bf16.mxu1 %v1685_v18 }
 0x7ab   : > { %5056 = vrcp.f32 %v1638_v3  ;;  %v1686_v57 = vpack.c.bf16 %v1674_v56, %v1673_v27 }
 0x7ac   : > { %5058 = vrcp.f32 %v1644_v62 }
 0x7ad   : > { %4424 = vmatmul.mubr.bf16.gmra.mrb[20].mxu1 %v1686_v57  ;;  %v1841_v38 = vpop.permute.xlu0 %1840 }
 0x7ae   : > { %v1646_v47 = vpop.xlane.xlu1 %1645  ;;  %4661 = vmatprep.subr.msk.bf16.mxu1 %vm943_vm1, %v1841_v38  ;;  %v1887_v35 = vsel %vm943_vm1, %v1841_v38, 0 }
 0x7af   : > { %5060 = vrcp.f32 %v1646_v47  ;;  %4448 = vmatpush3.bf16.xpose.msra.mxu1 %v1887_v35 }
 0x7b0   : > { %5062 = vrcp.f32 %v1650_v37 }
 0x7b1   : > { %v1813_v63 = vpop.permute.xlu0 %1812  ;;  %v5051_v42 = vpop.eup %5050  ;;  %5064 = vrcp.f32 %v1648_v21 }
 0x7b2   : > { %v1843_v22 = vpop.permute.xlu1 %1842  ;;  %v5053_v2 = vpop.eup %5052  ;;  %v1678_v60 = vmul.f32 %v5051_v42, %v6041_v24 }
 0x7b3   : > { %4662 = vmatprep.subr.msk.bf16.mxu1 %vm943_vm1, %v1843_v22  ;;  %v5055_v25 = vpop.eup %5054  ;;  %v1890_v44 = vsel %vm943_vm1, %v1843_v22, 0  ;;  %v1675_v8 = vmul.f32 %v5053_v2, %v6035_v61 }
 0x7b4   : > { %v1677_v21 = vmul.f32 %v5055_v25, %v6028_v17 }
 0x7b5   : > { %v5057_v41 = vpop.eup %5056  ;;  %v1817_v4 = vpop.permute.xlu0 %1816 }
 0x7b6   : > { %v1815_v45 = vpop.permute.xlu1 %1814  ;;  %v1676_v58 = vmul.f32 %v5057_v41, %v6047_v11  ;;  %v5059_v53 = vpop.eup %5058  ;;  %v1688_v62 = vpack.c.bf16 %v1678_v60, %v1677_v21 }
 0x7b7   : > { %4450 = vmatpush3.bf16.xpose.msra.mxu1 %v1890_v44  ;;  %v1679_v24 = vmul.f32 %v5059_v53, %v6039_v48 }
 0x7b8   : > { %v1687_v51 = vpack.c.bf16 %v1676_v58, %v1675_v8 }
 0x7b9   : > { %v5061_v1 = vpop.eup %5060  ;;  %v1821_v23 = vpop.permute.xlu0 %1820 }
 0x7ba   : > { %v5063_v52 = vpop.eup %5062  ;;  %v1819_v36 = vpop.permute.xlu1 %1818  ;;  %4427 = vmatprep.mubr.bf16.mxu1 %v1687_v51  ;;  %v1680_v29 = vmul.f32 %v5061_v1, %v6051_v10 }
 0x7bb   : > { %4428 = vmatmul.mubr.bf16.gmra.mrb[24].mxu1 %v1688_v62  ;;  %v5065_v0 = vpop.eup %5064  ;;  %v1682_v11 = vmul.f32 %v5063_v52, %v6045_v59 }
 0x7bc   : > { %v1689_v61 = vpack.c.bf16 %v1680_v29, %v1679_v24  ;;  %v1681_v17 = vmul.f32 %v5065_v0, %v6033_v33 }
 0x7bd   : > { %v1825_v28 = vpop.permute.xlu0 %1824 }
 0x7be   : > { %v1823_v18 = vpop.permute.xlu1 %1822  ;;  %4431 = vmatprep.mubr.bf16.mxu1 %v1689_v61  ;;  %v1690_v27 = vpack.c.bf16 %v1682_v11, %v1681_v17 }
 0x7c1   : > { %v2142_v37 = vpop.permute.xlu0 %2141 }
 0x7c2   : > { %v1827_v56 = vpop.permute.xlu1 %1826  ;;  %4467 = vmatprep.subr.bf16.mxu0 %v2142_v37 }
 0x7c3   : > { %4432 = vmatmul.mubr.bf16.gmra.mrb[28].mxu1 %v1690_v27  ;;  %4468 = vmatpush3.bf16.msra.mxu0 %v2142_v37 }
 0x7c4   : > { %4451 = vmatprep.mubr.msk.bf16.mxu1 %vm943_vm1, %v1813_v63 }
 0x7c5   : > { %v2146_v10 = vpop.permute.xlu0 %2145 }
 0x7c6   : > { %v2144_v48 = vpop.permute.xlu1 %2143 }
 0x7c7   : > { %4469 = vmatprep.subr.bf16.mxu0 %v2144_v48 }
 0x7c8   : > { %4470 = vmatpush3.bf16.msra.mxu0 %v2144_v48 }
 0x7c9   : > { %4471 = vmatprep.subr.bf16.mxu0 %v2146_v10  ;;  %v2150_v33 = vpop.permute.xlu0 %2149 }
 0x7ca   : > { %v2148_v59 = vpop.permute.xlu1 %2147 }
 0x7cb   : > { %4452 = vmatmul.mubr.msk.bf16.vlgmr.msra.gmra.mrb[32].mxu1 %vm943_vm1, %v1815_v45 }
 0x7cc   : > { %4455 = vmatprep.mubr.msk.bf16.mxu1 %vm943_vm1, %v1817_v4  ;;  %4472 = vmatpush3.bf16.msra.mxu0 %v2146_v10 }
 0x7cd   : > { %4473 = vmatprep.subr.bf16.mxu0 %v2148_v59  ;;  %v2154_v57 = vpop.permute.xlu0 %2153 }
 0x7ce   : > { %v2152_v3 = vpop.permute.xlu1 %2151 }
 0x7d0   : > { %4474 = vmatpush3.bf16.msra.mxu0 %v2148_v59 }
 0x7d1   : > { %4475 = vmatprep.subr.bf16.mxu0 %v2150_v33  ;;  %v6121_v47 = vpop.permute.xlu0 %2278 }
 0x7d2   : > { %v2156_v38 = vpop.permute.xlu1 %2155 }
 0x7d3   : > { %4456 = vmatmul.mubr.msk.bf16.gmra.mrb[36].mxu1 %vm943_vm1, %v1819_v36 }
 0x7d4   : > { %4459 = vmatprep.mubr.msk.bf16.mxu1 %vm943_vm1, %v1821_v23  ;;  %4476 = vmatpush3.bf16.msra.mxu0 %v2150_v33 }
 0x7d5   : > { %4477 = vmatprep.subr.bf16.mxu0 %v2152_v3 }
 0x7d6   : > { %v6211_v24 = vpop.permute.xlu1 %2280 }
 0x7d8   : > { %4478 = vmatpush3.bf16.msra.mxu0 %v2152_v3 }
 0x7d9   : > { %4479 = vmatprep.subr.bf16.mxu0 %v2154_v57 }
 0x7db   : > { %4460 = vmatmul.mubr.msk.bf16.gmra.mrb[40].mxu1 %vm943_vm1, %v1823_v18 }
 0x7dc   : > { %4463 = vmatprep.mubr.msk.bf16.mxu1 %vm943_vm1, %v1825_v28  ;;  %4480 = vmatpush3.bf16.msra.mxu0 %v2154_v57 }
 0x7dd   : > { %4481 = vmatprep.subr.bf16.mxu0 %v2156_v38 }
 0x7e0   : > { %4482 = vmatpush3.bf16.msra.mxu0 %v2156_v38 }
 0x7e1   : > { %4663 = vmatprep.subr.msk.bf16.mxu0 %vm943_vm1, %v6121_v47 }
 0x7e3   : > { %4464 = vmatmul.mubr.msk.bf16.gmra.mrb[44].mxu1 %vm943_vm1, %v1827_v56 }
 0x848   : > { %v6126_v35 = vpop.f32.mrb[16].mxu1 }
 0x849   : > { %v6128_v63 = vpop.f32.mrb[17].mxu1 }
 0x84a   : > { %v6130_v42 = vpop.f32.mrb[18].mxu1 }
 0x84b   : > { %v6134_v2 = vpop.f32.mrb[19].mxu1 }
 0x880   : > { %v6138_v41 = vpop.f32.mrb[20].mxu1 }
 0x881   : > { %v6140_v4 = vpop.f32.mrb[21].mxu1 }
 0x882   : > { %v6142_v60 = vpop.f32.mrb[22].mxu1 }
 0x883   : > { %v6146_v44 = vpop.f32.mrb[23].mxu1 }
 0x88e   : > { %v6150_v58 = vpop.f32.mrb[24].mxu1 }
 0x88f   : > { %v6152_v53 = vpop.f32.mrb[25].mxu1 }
 0x890   : > { %v6154_v21 = vpop.f32.mrb[26].mxu1 }
 0x891   : > { %v6158_v1 = vpop.f32.mrb[27].mxu1 }
 0x896   : > { %v6162_v62 = vpop.f32.mrb[28].mxu1 }
 0x897   : > { %v6164_v52 = vpop.f32.mrb[29].mxu1 }
 0x898   : > { %v6166_v36 = vpop.f32.mrb[30].mxu1 }
 0x899   : > { %v6170_v29 = vpop.f32.mrb[31].mxu1 }
 0x89e   : > { %v4453_v61 = vpop.f32.mrb[32].mxu1 }
 0x89f   : > { %1993 = vmax.xlane.f32.xlu0 %v4453_v61  ;;  %v1926_v28 = vpop.f32.mrb[33].mxu1 }
 0x8a0   : > { %v4454_v11 = vpop.f32.mrb[34].mxu1 }
 0x8a1   : > { %v1929_v18 = vpop.f32.mrb[35].mxu1 }
 0x8a2   : > { %1991 = vmax.xlane.f32.xlu1 %v1929_v18 }
 0x8a3   : > { %1989 = vmax.xlane.f32.xlu0 %v1926_v28 }
 0x8a6   : > { %v4457_v17 = vpop.f32.mrb[36].mxu1 }
 0x8a7   : > { %1995 = vmax.xlane.f32.xlu0 %v4454_v11  ;;  %v6174_v37 = vpop.f32.mrb[37].mxu1 }
 0x8a8   : > { %v6176_v27 = vpop.f32.mrb[38].mxu1 }
 0x8a9   : > { %2003 = vmax.xlane.f32.xlu1 %v6176_v27  ;;  %v6179_v56 = vpop.f32.mrb[39].mxu1 }
 0x8ab   : > { %2001 = vmax.xlane.f32.xlu0 %v4457_v17 }
 0x8ad   : > { %1999 = vmax.xlane.f32.xlu1 %v6179_v56 }
 0x8ae   : > { %v6182_v48 = vpop.f32.mrb[40].mxu1 }
 0x8af   : > { %1997 = vmax.xlane.f32.xlu0 %v6174_v37  ;;  %v6185_v10 = vpop.f32.mrb[41].mxu1 }
 0x8b0   : > { %v6187_v59 = vpop.f32.mrb[42].mxu1 }
 0x8b1   : > { %2011 = vmax.xlane.f32.xlu1 %v6187_v59  ;;  %v6190_v33 = vpop.f32.mrb[43].mxu1 }
 0x8b3   : > { %2009 = vmax.xlane.f32.xlu0 %v6182_v48 }
 0x8b5   : > { %2007 = vmax.xlane.f32.xlu1 %v6190_v33 }
 0x8b6   : > { %v6194_v3 = vpop.f32.mrb[44].mxu1 }
 0x8b7   : > { %2005 = vmax.xlane.f32.xlu0 %v6185_v10  ;;  %v6197_v57 = vpop.f32.mrb[45].mxu1 }
 0x8b8   : > { %v6199_v38 = vpop.f32.mrb[46].mxu1 }
 0x8b9   : > { %v6201_v0 = vpop.f32.mrb[47].mxu1 }
 0x8bb   : > { %2017 = vmax.xlane.f32.xlu0 %v6194_v3 }
 0x8bf   : > { %2013 = vmax.xlane.f32.xlu0 %v6197_v57 }
 0x8c6   : > { %2284 = vrot.lane.b32.xlu1 %v5672_v16, %s5286_s27 }
 0x8d5   : > { %2282 = vrot.lane.b32.xlu0 %v5674_v26, %s5286_s27 }
 0x8ea   : > { %2019 = vmax.xlane.f32.xlu1 %v6199_v38 }
 0x8ee   : > { %2015 = vmax.xlane.f32.xlu1 %v6201_v0 }
 0x92c   : > { %v1994_v23 = vpop.xlane.xlu0 %1993 }
 0x92d   : > { %v2023_v8 = vsub.f32 %v4453_v61, %v1994_v23 }
 0x92f   : > { %v2041_v25 = vmul.f32 1.442695, %v2023_v8  ;;  %v1992_v51 = vpop.xlane.xlu1 %1991 }
 0x930   : > { %v2022_v45 = vsub.f32 %v1929_v18, %v1992_v51  ;;  %v1990_v22 = vpop.xlane.xlu0 %1989 }
 0x931   : > { %5066 = vpow2.f32 %v2041_v25  ;;  %v2021_v55 = vsub.f32 %v1926_v28, %v1990_v22 }
 0x932   : > { %v2039_v46 = vmul.f32 1.442695, %v2022_v45 }
 0x933   : > { %v2037_v20 = vmul.f32 1.442695, %v2021_v55 }
 0x934   : > { %5068 = vpow2.f32 %v2039_v46  ;;  %v1996_v14 = vpop.xlane.xlu0 %1995 }
 0x935   : > { %5070 = vpow2.f32 %v2037_v20  ;;  %v2024_v30 = vsub.f32 %v4454_v11, %v1996_v14 }
 0x937   : > { %v2043_v34 = vmul.f32 1.442695, %v2024_v30 }
 0x938   : > { %v2002_v20 = vpop.xlane.xlu0 %2001 }
 0x939   : > { %5072 = vpow2.f32 %v2043_v34  ;;  %v2004_v34 = vpop.xlane.xlu1 %2003  ;;  %v2027_v14 = vsub.f32 %v4457_v17, %v2002_v20 }
 0x93a   : > { %v2028_v11 = vsub.f32 %v6176_v27, %v2004_v34 }
 0x93b   : > { %v6213_v15 = vpop.eup %5066  ;;  %v2049_v45 = vmul.f32 1.442695, %v2027_v14 }
 0x93c   : > { %2073 = vadd.xlane.f32.xlu1 %v6213_v15  ;;  %v1998_v30 = vpop.xlane.xlu0 %1997  ;;  %v2051_v13 = vmul.f32 1.442695, %v2028_v11 }
 0x93d   : > { %v2000_v46 = vpop.xlane.xlu1 %1999  ;;  %v2025_v51 = vsub.f32 %v6174_v37, %v1998_v30  ;;  %5074 = vpow2.f32 %v2049_v45 }
 0x93e   : > { %v6216_v32 = vpop.eup %5068  ;;  %v2026_v23 = vsub.f32 %v6179_v56, %v2000_v46 }
 0x93f   : > { %v6218_v8 = vpop.eup %5070  ;;  %2071 = vadd.xlane.f32.xlu0 %v6216_v32  ;;  %v2045_v18 = vmul.f32 1.442695, %v2025_v51 }
 0x940   : > { %2069 = vadd.xlane.f32.xlu1 %v6218_v8  ;;  %v2010_v55 = vpop.xlane.xlu0 %2009  ;;  %v2047_v43 = vmul.f32 1.442695, %v2026_v23 }
 0x941   : > { %v2012_v61 = vpop.xlane.xlu1 %2011  ;;  %v2031_v19 = vsub.f32 %v6182_v48, %v2010_v55  ;;  %5076 = vpow2.f32 %v2045_v18 }
 0x942   : > { %5078 = vpow2.f32 %v2047_v43  ;;  %v2032_v27 = vsub.f32 %v6187_v59, %v2012_v61 }
 0x943   : > { %v6222_v22 = vpop.eup %5072  ;;  %v2057_v20 = vmul.f32 1.442695, %v2031_v19  ;;  %5080 = vpow2.f32 %v2051_v13 }
 0x944   : > { %2075 = vadd.xlane.f32.xlu1 %v6222_v22  ;;  %v2006_v25 = vpop.xlane.xlu0 %2005  ;;  %v2059_v19 = vmul.f32 1.442695, %v2032_v27 }
 0x945   : > { %v2008_v9 = vpop.xlane.xlu1 %2007  ;;  %v2029_v37 = vsub.f32 %v6185_v10, %v2006_v25  ;;  %5082 = vpow2.f32 %v2057_v20 }
 0x946   : > { %v2030_v10 = vsub.f32 %v6190_v33, %v2008_v9 }
 0x947   : > { %v2053_v34 = vmul.f32 1.442695, %v2029_v37  ;;  %v6237_v46 = vpop.eup %5074 }
 0x948   : > { %v2018_v28 = vpop.xlane.xlu0 %2017  ;;  %v2055_v55 = vmul.f32 1.442695, %v2030_v10 }
 0x949   : > { %v2035_v17 = vsub.f32 %v6194_v3, %v2018_v28  ;;  %v6239_v48 = vpop.permute.xlu1 %2284 }
 0x94b   : > { %v2065_v56 = vmul.f32 1.442695, %v2035_v17  ;;  %v6243_v13 = vpop.eup %5076 }
 0x94c   : > { %v2014_v30 = vpop.xlane.xlu0 %2013 }
 0x94d   : > { %v2033_v14 = vsub.f32 %v6197_v57, %v2014_v30  ;;  %5084 = vpow2.f32 %v2065_v56  ;;  %v6245_v57 = vpop.eup %5078 }
 0x94e   : > { %5086 = vpow2.f32 %v2053_v34  ;;  %v6250_v45 = vpop.eup %5080 }
 0x94f   : > { %v2061_v43 = vmul.f32 1.442695, %v2033_v14  ;;  %v6252_v9 = vpop.eup %5082 }
 0x950   : > { %v2283_v20 = vpop.permute.xlu0 %2282 }
 0x951   : > { %5088 = vpow2.f32 %v2061_v43 }
 0x952   : > { %5090 = vpow2.f32 %v2059_v19 }
 0x955   : > { %2286 = vrot.lane.b32.xlu0 %v5682_v40, %s5286_s27  ;;  %2288 = vrot.lane.b32.xlu1 %v5680_v39, %s5286_s27 }
 0x957   : > { %v6257_v23 = vpop.eup %5084 }
 0x958   : > { %v6259_v61 = vpop.eup %5086 }
 0x95b   : > { %v6263_v28 = vpop.eup %5088 }
 0x95c   : > { %v6265_v11 = vpop.eup %5090 }
 0x974   : > { %2081 = vadd.xlane.f32.xlu0 %v6237_v46 }
 0x977   : > { %v2020_v3 = vpop.xlane.xlu1 %2019 }
 0x978   : > { %v2036_v59 = vsub.f32 %v6199_v38, %v2020_v3  ;;  %2077 = vadd.xlane.f32.xlu0 %v6243_v13 }
 0x979   : > { %2079 = vadd.xlane.f32.xlu1 %v6245_v57 }
 0x97a   : > { %v2067_v25 = vmul.f32 1.442695, %v2036_v59 }
 0x97b   : > { %v2016_v51 = vpop.xlane.xlu1 %2015 }
 0x97c   : > { %5092 = vpow2.f32 %v2067_v25  ;;  %v2034_v33 = vsub.f32 %v6201_v0, %v2016_v51  ;;  %2083 = vadd.xlane.f32.xlu0 %v6250_v45 }
 0x97d   : > { %2089 = vadd.xlane.f32.xlu1 %v6252_v9  ;;  %5094 = vpow2.f32 %v2055_v55  ;;  %v2319_v55 = vsel %vm943_vm1, %v6121_v47, 0 }
 0x97e   : > { %v2063_v38 = vmul.f32 1.442695, %v2034_v33 }
 0x980   : > { %2097 = vadd.xlane.f32.xlu0 %v6257_v23  ;;  %5096 = vpow2.f32 %v2063_v38 }
 0x981   : > { %2085 = vadd.xlane.f32.xlu1 %v6259_v61 }
 0x984   : > { %2093 = vadd.xlane.f32.xlu0 %v6263_v28 }
 0x985   : > { %2091 = vadd.xlane.f32.xlu1 %v6265_v11 }
 0x986   : > { %v6269_v0 = vpop.eup %5092 }
 0x987   : > { %v6271_v18 = vpop.eup %5094 }
 0x988   : > { %2099 = vadd.xlane.f32.xlu0 %v6269_v0 }
 0x989   : > { %2087 = vadd.xlane.f32.xlu1 %v6271_v18 }
 0x98a   : > { %v6275_v17 = vpop.eup %5096 }
 0x98d   : > { %2095 = vadd.xlane.f32.xlu1 %v6275_v17 }
 0x99e   : > { %2292 = vrot.lane.b32.xlu1 %v5688_v49, %s5286_s27  ;;  %2290 = vrot.lane.b32.xlu0 %v5690_v50, %s5286_s27  ;;  %s5290_s27 = smov 16  }
 0x9a2   : > { %2264 = vrot.lane.b32.xlu1 %v5662_v54, %s5287_s28  ;;  %2262 = vrot.lane.b32.xlu0 %v5664_v12, %s5287_s28 }
 0x9a6   : > { %2268 = vrot.lane.b32.xlu1 %v5672_v16, %s5287_s28  ;;  %2266 = vrot.lane.b32.xlu0 %v5674_v26, %s5287_s28 }
 0x9aa   : > { %2272 = vrot.lane.b32.xlu1 %v5680_v39, %s5287_s28  ;;  %2270 = vrot.lane.b32.xlu0 %v5682_v40, %s5287_s28 }
 0x9ae   : > { %2276 = vrot.lane.b32.xlu1 %v5688_v49, %s5287_s28  ;;  %2274 = vrot.lane.b32.xlu0 %v5690_v50, %s5287_s28  ;;  %s5291_s28 = smov 24  }
 0x9b2   : > { %2593 = vrot.lane.b32.xlu1 %v5662_v54, %s5288_s20  ;;  %2591 = vrot.lane.b32.xlu0 %v5664_v12, %s5288_s20 }
 0x9b6   : > { %2595 = vrot.lane.b32.xlu0 %v5674_v26, %s5288_s20 }
 0x9c9   : > { %v2074_v37 = vpop.xlane.xlu1 %2073 }
 0x9cc   : > { %v2072_v30 = vpop.xlane.xlu0 %2071 }
 0x9cd   : > { %5098 = vrcp.f32 %v2072_v30  ;;  %v2070_v56 = vpop.xlane.xlu1 %2069 }
 0x9ce   : > { %5100 = vrcp.f32 %v2070_v56 }
 0x9cf   : > { %5102 = vrcp.f32 %v2074_v37 }
 0x9d0   : > { %v2287_v47 = vpop.permute.xlu0 %2286 }
 0x9d1   : > { %v2076_v14 = vpop.xlane.xlu1 %2075 }
 0x9d2   : > { %5104 = vrcp.f32 %v2076_v14 }
 0x9d7   : > { %v5099_v27 = vpop.eup %5098 }
 0x9d8   : > { %v5101_v34 = vpop.eup %5100  ;;  %v2118_v43 = vmul.f32 %v5099_v27, %v6216_v32  ;;  %v2322_v32 = vsel %vm943_vm1, %v6211_v24, 0 }
 0x9d9   : > { %v2117_v54 = vmul.f32 %v5101_v34, %v6218_v8  ;;  %v5103_v19 = vpop.eup %5102  ;;  %v2328_v8 = vsel %vm943_vm1, %v6239_v48, 0 }
 0x9da   : > { %v2119_v26 = vmul.f32 %v5103_v19, %v6213_v15  ;;  %v2325_v15 = vsel %vm943_vm1, %v2283_v20, 0 }
 0x9db   : > { %v2133_v12 = vpack.c.bf16 %v2118_v43, %v2117_v54 }
 0x9dc   : > { %v5105_v10 = vpop.eup %5104 }
 0x9dd   : > { %v2120_v3 = vmul.f32 %v5105_v10, %v6222_v22  ;;  %4483 = vmatprep.mubr.bf16.mxu0 %v2133_v12  ;;  %v2331_v22 = vsel %vm943_vm1, %v2287_v47, 0 }
 0x9df   : > { %v2134_v59 = vpack.c.bf16 %v2120_v3, %v2119_v26 }
 0x9e1   : > { %4484 = vmatmul.mubr.bf16.vlgmr.msra.gmra.mrb[48].mxu0 %v2134_v59 }
 0x9e2   : > { %4500 = vmatpush3.bf16.xpose.msra.mxu0 %v2319_v55 }
 0x9e3   : > { %4664 = vmatprep.subr.msk.bf16.mxu0 %vm943_vm1, %v6211_v24  ;;  %v2289_v24 = vpop.permute.xlu1 %2288 }
 0x9e4   : > { %v2334_v38 = vsel %vm943_vm1, %v2289_v24, 0 }
 0x9ea   : > { %4502 = vmatpush3.bf16.xpose.msra.mxu0 %v2322_v32 }
 0x9eb   : > { %4665 = vmatprep.subr.msk.bf16.mxu0 %vm943_vm1, %v2283_v20 }
 0x9f2   : > { %4504 = vmatpush3.bf16.xpose.msra.mxu0 %v2325_v15 }
 0x9f3   : > { %4666 = vmatprep.subr.msk.bf16.mxu0 %vm943_vm1, %v6239_v48 }
 0x9fa   : > { %4506 = vmatpush3.bf16.xpose.msra.mxu0 %v2328_v8 }
 0x9fb   : > { %4667 = vmatprep.subr.msk.bf16.mxu0 %vm943_vm1, %v2287_v47 }
 0xa01   : > { %v2082_v25 = vpop.xlane.xlu0 %2081 }
 0xa02   : > { %4508 = vmatpush3.bf16.xpose.msra.mxu0 %v2331_v22 }
 0xa03   : > { %4668 = vmatprep.subr.msk.bf16.mxu0 %vm943_vm1, %v2289_v24 }
 0xa05   : > { %v2078_v51 = vpop.xlane.xlu0 %2077 }
 0xa06   : > { %5106 = vrcp.f32 %v2078_v51  ;;  %v2080_v33 = vpop.xlane.xlu1 %2079 }
 0xa07   : > { %5108 = vrcp.f32 %v2080_v33 }
 0xa08   : > { %5110 = vrcp.f32 %v2082_v25 }
 0xa09   : > { %v2084_v20 = vpop.xlane.xlu0 %2083 }
 0xa0a   : > { %4510 = vmatpush3.bf16.xpose.msra.mxu0 %v2334_v38  ;;  %5112 = vrcp.f32 %v2084_v20  ;;  %v2090_v48 = vpop.xlane.xlu1 %2089 }
 0xa0d   : > { %v2098_v37 = vpop.xlane.xlu0 %2097 }
 0xa0e   : > { %v2086_v30 = vpop.xlane.xlu1 %2085 }
 0xa10   : > { %v5107_v56 = vpop.eup %5106 }
 0xa11   : > { %v5109_v14 = vpop.eup %5108  ;;  %v2094_v27 = vpop.xlane.xlu0 %2093  ;;  %v2121_v34 = vmul.f32 %v5107_v56, %v6243_v13 }
 0xa12   : > { %v5111_v43 = vpop.eup %5110  ;;  %v2092_v54 = vpop.xlane.xlu1 %2091  ;;  %v2122_v19 = vmul.f32 %v5109_v14, %v6245_v57 }
 0xa13   : > { %5114 = vrcp.f32 %v2092_v54  ;;  %v2123_v3 = vmul.f32 %v5111_v43, %v6237_v46 }
 0xa14   : > { %v5113_v12 = vpop.eup %5112  ;;  %v2135_v10 = vpack.c.bf16 %v2122_v19, %v2121_v34  ;;  %5116 = vrcp.f32 %v2086_v30 }
 0xa15   : > { %v2100_v26 = vpop.xlane.xlu0 %2099  ;;  %v2124_v59 = vmul.f32 %v5113_v12, %v6250_v45  ;;  %5118 = vrcp.f32 %v2090_v48 }
 0xa16   : > { %v2088_v55 = vpop.xlane.xlu1 %2087  ;;  %4487 = vmatprep.mubr.bf16.mxu0 %v2135_v10 }
 0xa17   : > { %5120 = vrcp.f32 %v2088_v55  ;;  %v2136_v32 = vpack.c.bf16 %v2124_v59, %v2123_v3 }
 0xa18   : > { %5122 = vrcp.f32 %v2094_v27 }
 0xa19   : > { %4488 = vmatmul.mubr.bf16.gmra.mrb[52].mxu0 %v2136_v32  ;;  %v2291_v13 = vpop.permute.xlu0 %2290 }
 0xa1a   : > { %v2096_v15 = vpop.xlane.xlu1 %2095  ;;  %4669 = vmatprep.subr.msk.bf16.mxu0 %vm943_vm1, %v2291_v13  ;;  %v2337_v57 = vsel %vm943_vm1, %v2291_v13, 0 }
 0xa1b   : > { %5124 = vrcp.f32 %v2096_v15  ;;  %4512 = vmatpush3.bf16.xpose.msra.mxu0 %v2337_v57 }
 0xa1c   : > { %5126 = vrcp.f32 %v2100_v26 }
 0xa1d   : > { %v2263_v8 = vpop.permute.xlu0 %2262  ;;  %v5115_v46 = vpop.eup %5114  ;;  %5128 = vrcp.f32 %v2098_v37 }
 0xa1e   : > { %v2293_v45 = vpop.permute.xlu1 %2292  ;;  %v5117_v47 = vpop.eup %5116  ;;  %v2128_v51 = vmul.f32 %v5115_v46, %v6265_v11 }
 0xa1f   : > { %4670 = vmatprep.subr.msk.bf16.mxu0 %vm943_vm1, %v2293_v45  ;;  %v5119_v22 = vpop.eup %5118  ;;  %v2340_v38 = vsel %vm943_vm1, %v2293_v45, 0  ;;  %v2125_v20 = vmul.f32 %v5117_v47, %v6259_v61 }
 0xa20   : > { %v2127_v37 = vmul.f32 %v5119_v22, %v6252_v9 }
 0xa21   : > { %v5121_v25 = vpop.eup %5120  ;;  %v2267_v24 = vpop.permute.xlu0 %2266 }
 0xa22   : > { %v2265_v33 = vpop.permute.xlu1 %2264  ;;  %v2126_v48 = vmul.f32 %v5121_v25, %v6271_v18  ;;  %v5123_v30 = vpop.eup %5122  ;;  %v2138_v34 = vpack.c.bf16 %v2128_v51, %v2127_v37 }
 0xa23   : > { %4514 = vmatpush3.bf16.xpose.msra.mxu0 %v2340_v38  ;;  %v2129_v11 = vmul.f32 %v5123_v30, %v6263_v28 }
 0xa24   : > { %v2137_v56 = vpack.c.bf16 %v2126_v48, %v2125_v20 }
 0xa25   : > { %v5125_v14 = vpop.eup %5124  ;;  %v2271_v27 = vpop.permute.xlu0 %2270 }
 0xa26   : > { %v5127_v43 = vpop.eup %5126  ;;  %v2269_v54 = vpop.permute.xlu1 %2268  ;;  %4491 = vmatprep.mubr.bf16.mxu0 %v2137_v56  ;;  %v2130_v19 = vmul.f32 %v5125_v14, %v6275_v17 }
 0xa27   : > { %4492 = vmatmul.mubr.bf16.gmra.mrb[56].mxu0 %v2138_v34  ;;  %v5129_v12 = vpop.eup %5128  ;;  %v2132_v18 = vmul.f32 %v5127_v43, %v6269_v0 }
 0xa28   : > { %v2139_v61 = vpack.c.bf16 %v2130_v19, %v2129_v11  ;;  %v2131_v9 = vmul.f32 %v5129_v12, %v6257_v23 }
 0xa29   : > { %v2275_v10 = vpop.permute.xlu0 %2274 }
 0xa2a   : > { %v2273_v26 = vpop.permute.xlu1 %2272  ;;  %4495 = vmatprep.mubr.bf16.mxu0 %v2139_v61  ;;  %v2140_v59 = vpack.c.bf16 %v2132_v18, %v2131_v9 }
 0xa2d   : > { %v2592_v3 = vpop.permute.xlu0 %2591 }
 0xa2e   : > { %v2277_v55 = vpop.permute.xlu1 %2276  ;;  %4531 = vmatprep.subr.bf16.mxu0 %v2592_v3  ;;  %4623 = vmatprep.subr.bf16.mxu1 %v2592_v3 }
 0xa2f   : > { %4496 = vmatmul.mubr.bf16.gmra.mrb[60].mxu0 %v2140_v59  ;;  %4631 = vmatpush3.bf16.msra.mxu1 %v2592_v3 }
 0xa30   : > { %4515 = vmatprep.mubr.msk.bf16.mxu0 %vm943_vm1, %v2263_v8 }
 0xa31   : > { %v2596_v17 = vpop.permute.xlu0 %2595 }
 0xa32   : > { %v2594_v28 = vpop.permute.xlu1 %2593 }
 0xa33   : > { %4624 = vmatprep.subr.bf16.mxu1 %v2594_v28 }
 0xa34   : > { %4632 = vmatpush3.bf16.msra.mxu1 %v2594_v28 }
 0xa35   : > { %4625 = vmatprep.subr.bf16.mxu1 %v2596_v17 }
 0xa37   : > { %4516 = vmatmul.mubr.msk.bf16.vlgmr.msra.gmra.mrb[64].mxu0 %vm943_vm1, %v2265_v33 }
 0xa38   : > { %4532 = vmatpush3.bf16.msra.mxu0 %v2592_v3  ;;  %4519 = vmatprep.mubr.msk.bf16.mxu0 %vm943_vm1, %v2267_v24 }
 0xa39   : > { %4533 = vmatprep.subr.bf16.mxu0 %v2594_v28  ;;  %4633 = vmatpush3.bf16.msra.mxu1 %v2596_v17 }
 0xa3c   : > { %4534 = vmatpush3.bf16.msra.mxu0 %v2594_v28 }
 0xa3d   : > { %4535 = vmatprep.subr.bf16.mxu0 %v2596_v17 }
 0xa3f   : > { %4520 = vmatmul.mubr.msk.bf16.gmra.mrb[68].mxu0 %vm943_vm1, %v2269_v54 }
 0xa40   : > { %4536 = vmatpush3.bf16.msra.mxu0 %v2596_v17  ;;  %4523 = vmatprep.mubr.msk.bf16.mxu0 %vm943_vm1, %v2271_v27 }
 0xa47   : > { %4524 = vmatmul.mubr.msk.bf16.gmra.mrb[72].mxu0 %vm943_vm1, %v2273_v26 }
 0xa48   : > { %4527 = vmatprep.mubr.msk.bf16.mxu0 %vm943_vm1, %v2275_v10 }
 0xa4f   : > { %4528 = vmatmul.mubr.msk.bf16.gmra.mrb[76].mxu0 %vm943_vm1, %v2277_v55 }
 0xab4   : > { %v6340_v23 = vpop.f32.mrb[48].mxu0 }
 0xab5   : > { %v6342_v0 = vpop.f32.mrb[49].mxu0 }
 0xab6   : > { %v6344_v32 = vpop.f32.mrb[50].mxu0 }
 0xab7   : > { %v6348_v15 = vpop.f32.mrb[51].mxu0 }
 0xaec   : > { %v6352_v8 = vpop.f32.mrb[52].mxu0 }
 0xaed   : > { %v6354_v46 = vpop.f32.mrb[53].mxu0 }
 0xaee   : > { %v6356_v45 = vpop.f32.mrb[54].mxu0 }
 0xaef   : > { %v6360_v22 = vpop.f32.mrb[55].mxu0 }
 0xafa   : > { %v6364_v24 = vpop.f32.mrb[56].mxu0 }
 0xafb   : > { %v6366_v51 = vpop.f32.mrb[57].mxu0 }
 0xafc   : > { %v6368_v33 = vpop.f32.mrb[58].mxu0 }
 0xafd   : > { %v6372_v20 = vpop.f32.mrb[59].mxu0 }
 0xb02   : > { %v6376_v30 = vpop.f32.mrb[60].mxu0 }
 0xb03   : > { %7180 = vst [vmem:[#allocation23_spill] sm:$0xff] %v6376_v30  ;;  %v6378_v37 = vpop.f32.mrb[61].mxu0 }
 0xb04   : > { %7181 = vst [vmem:[#allocation24_spill] sm:$0xff] %v6378_v37  ;;  %v6380_v56 = vpop.f32.mrb[62].mxu0 }
 0xb05   : > { %v6384_v27 = vpop.f32.mrb[63].mxu0 }
 0xb06   : > { %7182 = vst [vmem:[#allocation25_spill] sm:$0xff] %v6384_v27 }
 0xb0a   : > { %v4517_v43 = vpop.f32.mrb[64].mxu0 }
 0xb0b   : > { %2443 = vmax.xlane.f32.xlu0 %v4517_v43  ;;  %v2376_v54 = vpop.f32.mrb[65].mxu0 }
 0xb0c   : > { %v4518_v11 = vpop.f32.mrb[66].mxu0 }
 0xb0d   : > { %v2379_v19 = vpop.f32.mrb[67].mxu0 }
 0xb0e   : > { %2441 = vmax.xlane.f32.xlu1 %v2379_v19 }
 0xb0f   : > { %2439 = vmax.xlane.f32.xlu0 %v2376_v54 }
 0xb12   : > { %v4521_v12 = vpop.f32.mrb[68].mxu0 }
 0xb13   : > { %2445 = vmax.xlane.f32.xlu0 %v4518_v11  ;;  %v2392_v61 = vpop.f32.mrb[69].mxu0 }
 0xb14   : > { %v4522_v10 = vpop.f32.mrb[70].mxu0 }
 0xb15   : > { %2453 = vmax.xlane.f32.xlu1 %v4522_v10  ;;  %v2395_v18 = vpop.f32.mrb[71].mxu0 }
 0xb17   : > { %2451 = vmax.xlane.f32.xlu0 %v4521_v12 }
 0xb19   : > { %2449 = vmax.xlane.f32.xlu1 %v2395_v18 }
 0xb1a   : > { %v4525_v26 = vpop.f32.mrb[72].mxu0 }
 0xb1b   : > { %2447 = vmax.xlane.f32.xlu0 %v2392_v61  ;;  %v6388_v9 = vpop.f32.mrb[73].mxu0 }
 0xb1c   : > { %v6390_v3 = vpop.f32.mrb[74].mxu0 }
 0xb1d   : > { %2461 = vmax.xlane.f32.xlu1 %v6390_v3  ;;  %v6393_v59 = vpop.f32.mrb[75].mxu0 }
 0xb1f   : > { %2459 = vmax.xlane.f32.xlu0 %v4525_v26 }
 0xb21   : > { %2457 = vmax.xlane.f32.xlu1 %v6393_v59 }
 0xb22   : > { %v6396_v55 = vpop.f32.mrb[76].mxu0 }
 0xb23   : > { %2455 = vmax.xlane.f32.xlu0 %v6388_v9  ;;  %v6399_v28 = vpop.f32.mrb[77].mxu0 }
 0xb24   : > { %v6401_v17 = vpop.f32.mrb[78].mxu0 }
 0xb25   : > { %v6403_v34 = vpop.f32.mrb[79].mxu0 }
 0xb27   : > { %2467 = vmax.xlane.f32.xlu0 %v6396_v55 }
 0xb2b   : > { %2463 = vmax.xlane.f32.xlu0 %v6399_v28 }
 0xb32   : > { %2599 = vrot.lane.b32.xlu1 %v5682_v40, %s5288_s20 }
 0xb41   : > { %2597 = vrot.lane.b32.xlu0 %v5672_v16, %s5288_s20 }
 0xb56   : > { %2469 = vmax.xlane.f32.xlu1 %v6401_v17 }
 0xb5a   : > { %2465 = vmax.xlane.f32.xlu1 %v6403_v34 }
 0xb6b   : > { %2601 = vrot.lane.b32.xlu1 %v5680_v39, %s5288_s20 }
 0xb98   : > { %v2444_v14 = vpop.xlane.xlu0 %2443 }
 0xb99   : > { %v2473_v48 = vsub.f32 %v4517_v43, %v2444_v14 }
 0xb9b   : > { %v2491_v38 = vmul.f32 1.442695, %v2473_v48  ;;  %v2442_v47 = vpop.xlane.xlu1 %2441 }
 0xb9c   : > { %v2440_v25 = vpop.xlane.xlu0 %2439  ;;  %v2472_v6 = vsub.f32 %v2379_v19, %v2442_v47 }
 0xb9d   : > { %5130 = vpow2.f32 %v2491_v38  ;;  %v2471_v13 = vsub.f32 %v2376_v54, %v2440_v25 }
 0xb9e   : > { %v2489_v7 = vmul.f32 1.442695, %v2472_v6 }
 0xb9f   : > { %v2487_v57 = vmul.f32 1.442695, %v2471_v13 }
 0xba0   : > { %v2446_v40 = vpop.xlane.xlu0 %2445 }
 0xba1   : > { %5132 = vpow2.f32 %v2487_v57  ;;  %v2474_v31 = vsub.f32 %v4518_v11, %v2446_v40 }
 0xba2   : > { %v2454_v16 = vpop.xlane.xlu1 %2453 }
 0xba3   : > { %v2493_v5 = vmul.f32 1.442695, %v2474_v31  ;;  %v2478_v13 = vsub.f32 %v4522_v10, %v2454_v16 }
 0xba4   : > { %v2452_v37 = vpop.xlane.xlu0 %2451 }
 0xba5   : > { %5134 = vpow2.f32 %v2493_v5  ;;  %v2477_v27 = vsub.f32 %v4521_v12, %v2452_v37  ;;  %v2501_v37 = vmul.f32 1.442695, %v2478_v13 }
 0xba6   : > { %v2450_v30 = vpop.xlane.xlu1 %2449  ;;  %5136 = vpow2.f32 %v2489_v7 }
 0xba7   : > { %v6415_v39 = vpop.eup %5130  ;;  %v2499_v14 = vmul.f32 1.442695, %v2477_v27  ;;  %v2476_v48 = vsub.f32 %v2395_v18, %v2450_v30 }
 0xba8   : > { %2523 = vadd.xlane.f32.xlu1 %v6415_v39  ;;  %v2448_v25 = vpop.xlane.xlu0 %2447 }
 0xba9   : > { %5138 = vpow2.f32 %v2499_v14  ;;  %v2497_v47 = vmul.f32 1.442695, %v2476_v48  ;;  %v2475_v57 = vsub.f32 %v2392_v61, %v2448_v25 }
 0xbaa   : > { %v2462_v6 = vpop.xlane.xlu1 %2461 }
 0xbab   : > { %v6418_v38 = vpop.eup %5132  ;;  %v2495_v31 = vmul.f32 1.442695, %v2475_v57  ;;  %5140 = vpow2.f32 %v2497_v47  ;;  %v2482_v7 = vsub.f32 %v6390_v3, %v2462_v6 }
 0xbac   : > { %2519 = vadd.xlane.f32.xlu1 %v6418_v38  ;;  %v2460_v5 = vpop.xlane.xlu0 %2459 }
 0xbad   : > { %5142 = vpow2.f32 %v2495_v31  ;;  %v2481_v27 = vsub.f32 %v4525_v26, %v2460_v5  ;;  %v2509_v18 = vmul.f32 1.442695, %v2482_v7  ;;  %v7183_v7 = vpack.i.bf16 %v6130_v42, %v6126_v35 }
 0xbae   : > { %5144 = vpow2.f32 %v2501_v37  ;;  %v2458_v11 = vpop.xlane.xlu1 %2457  ;;  %v7186_v35 = vpack.i.bf16 %v6142_v60, %v6138_v41  ;;  %v7188_v41 = vpack.i.bf16 %v6154_v21, %v6150_v58  ;;  %v7190_v58 = vpack.i.bf16 %v6146_v44, %v6140_v4 }
 0xbaf   : > { %v6421_v30 = vpop.eup %5134  ;;  %v2507_v43 = vmul.f32 1.442695, %v2481_v27  ;;  %v2480_v26 = vsub.f32 %v6393_v59, %v2458_v11  ;;  %v7191_v21 = vpack.i.bf16 %v6360_v22, %v6354_v46 }
 0xbb0   : > { %2525 = vadd.xlane.f32.xlu1 %v6421_v30  ;;  %v2456_v54 = vpop.xlane.xlu0 %2455  ;;  %v6426_v12 = vpop.eup %5136 }
 0xbb1   : > { %v2479_v19 = vsub.f32 %v6388_v9, %v2456_v54  ;;  %5146 = vpow2.f32 %v2507_v43  ;;  %v2505_v48 = vmul.f32 1.442695, %v2480_v26  ;;  %v7184_v43 = vpack.i.bf16 %v6348_v15, %v6342_v0 }
 0xbb2   : > { %v2600_v31 = vpop.permute.xlu1 %2599  ;;  %v7187_v0 = vpack.i.bf16 %v6356_v45, %v6352_v8  ;;  %v7189_v8 = vpack.i.bf16 %v6134_v2, %v6128_v63  ;;  %v7192_v45 = vpack.i.bf16 %v6158_v1, %v6152_v53 }
 0xbb3   : > { %v6428_v61 = vpop.eup %5138  ;;  %v2503_v10 = vmul.f32 1.442695, %v2479_v19 }
 0xbb4   : > { %2521 = vadd.xlane.f32.xlu1 %v6426_v12  ;;  %2531 = vadd.xlane.f32.xlu0 %v6428_v61  ;;  %v2468_v3 = vpop.xlane.xlu0 %2467 }
 0xbb5   : > { %5148 = vpow2.f32 %v2503_v10  ;;  %v2485_v40 = vsub.f32 %v6396_v55, %v2468_v3  ;;  %v6434_v16 = vpop.eup %5140 }
 0xbb6   : > { %5150 = vpow2.f32 %v2509_v18 }
 0xbb7   : > { %v6436_v9 = vpop.eup %5142  ;;  %v2515_v14 = vmul.f32 1.442695, %v2485_v40 }
 0xbb8   : > { %2529 = vadd.xlane.f32.xlu1 %v6434_v16  ;;  %2527 = vadd.xlane.f32.xlu0 %v6436_v9  ;;  %v2464_v59 = vpop.xlane.xlu0 %2463  ;;  %v6441_v13 = vpop.eup %5144 }
 0xbb9   : > { %5152 = vpow2.f32 %v2515_v14  ;;  %v2483_v25 = vsub.f32 %v6399_v28, %v2464_v59 }
 0xbba   : > { %5154 = vpow2.f32 %v2505_v48 }
 0xbbb   : > { %v2511_v47 = vmul.f32 1.442695, %v2483_v25  ;;  %v6444_v57 = vpop.eup %5146 }
 0xbbc   : > { %2533 = vadd.xlane.f32.xlu0 %v6441_v13  ;;  %v2598_v55 = vpop.permute.xlu0 %2597 }
 0xbbd   : > { %5156 = vpow2.f32 %v2511_v47  ;;  %4537 = vmatprep.subr.bf16.mxu0 %v2598_v55  ;;  %4626 = vmatprep.subr.bf16.mxu1 %v2598_v55 }
 0xbbe   : > { %4538 = vmatpush3.bf16.msra.mxu0 %v2598_v55  ;;  %4634 = vmatpush3.bf16.msra.mxu1 %v2598_v55 }
 0xbbf   : > { %v6446_v6 = vpop.eup %5148  ;;  %4539 = vmatprep.subr.bf16.mxu0 %v2600_v31  ;;  %4627 = vmatprep.subr.bf16.mxu1 %v2600_v31 }
 0xbc0   : > { %2539 = vadd.xlane.f32.xlu0 %v6444_v57  ;;  %2535 = vadd.xlane.f32.xlu1 %v6446_v6  ;;  %v6450_v28 = vpop.eup %5150 }
 0xbc2   : > { %4540 = vmatpush3.bf16.msra.mxu0 %v2600_v31  ;;  %4635 = vmatpush3.bf16.msra.mxu1 %v2600_v31 }
 0xbc3   : > { %v6452_v5 = vpop.eup %5152 }
 0xbc4   : > { %2541 = vadd.xlane.f32.xlu0 %v6450_v28  ;;  %2547 = vadd.xlane.f32.xlu1 %v6452_v5  ;;  %v6456_v37 = vpop.eup %5154 }
 0xbc7   : > { %v6458_v27 = vpop.eup %5156 }
 0xbc8   : > { %2537 = vadd.xlane.f32.xlu0 %v6456_v37  ;;  %2543 = vadd.xlane.f32.xlu1 %v6458_v27 }
 0xbd9   : > { %2605 = vrot.lane.b32.xlu1 %v5688_v49, %s5288_s20  ;;  %v7185_v49 = vpack.i.bf16 %v6344_v32, %v6340_v23 }
 0xbdd   : > { %4744 = vrot.lane.b32.xlu1 %v7183_v7, %s7152_s21 }
 0xbde   : > { %2603 = vrot.lane.b32.xlu0 %v5690_v50, %s5288_s20 }
 0xbe1   : > { %4749 = vrot.lane.b32.xlu1 %v7184_v43, %s5290_s27 }
 0xbe3   : > { %v2470_v54 = vpop.xlane.xlu1 %2469 }
 0xbe4   : > { %v2486_v23 = vsub.f32 %v6401_v17, %v2470_v54 }
 0xbe5   : > { %4754 = vrot.lane.b32.xlu1 %v7185_v49, %s5290_s27 }
 0xbe6   : > { %v2517_v60 = vmul.f32 1.442695, %v2486_v23 }
 0xbe7   : > { %v2466_v11 = vpop.xlane.xlu1 %2465 }
 0xbe8   : > { %v2484_v50 = vsub.f32 %v6403_v34, %v2466_v11 }
 0xbe9   : > { %4764 = vrot.lane.b32.xlu1 %v7186_v35, %s7152_s21 }
 0xbea   : > { %v2513_v32 = vmul.f32 1.442695, %v2484_v50 }
 0xbeb   : > { %v2602_v42 = vpop.permute.xlu1 %2601 }
 0xbec   : > { %4541 = vmatprep.subr.bf16.mxu0 %v2602_v42  ;;  %4628 = vmatprep.subr.bf16.mxu1 %v2602_v42  ;;  %5158 = vpow2.f32 %v2513_v32 }
 0xbed   : > { %4774 = vrot.lane.b32.xlu1 %v7187_v0, %s5290_s27  ;;  %4542 = vmatpush3.bf16.msra.mxu0 %v2602_v42  ;;  %5160 = vpow2.f32 %v2517_v60 }
 0xbee   : > { %4636 = vmatpush3.bf16.msra.mxu1 %v2602_v42 }
 0xbf1   : > { %4784 = vrot.lane.b32.xlu1 %v7188_v41, %s7152_s21 }
 0xbf6   : > { %v6492_v15 = vpop.eup %5158 }
 0xbf7   : > { %v6495_v34 = vpop.eup %5160 }
 0xbfd   : > { %2545 = vadd.xlane.f32.xlu0 %v6492_v15 }
 0xc01   : > { %2549 = vadd.xlane.f32.xlu0 %v6495_v34 }
 0xc17   : > { %4739 = vrot.lane.b32.xlu0 %v7189_v8, %s7152_s21 }
 0xc1b   : > { %4759 = vrot.lane.b32.xlu0 %v7190_v58, %s7152_s21 }
 0xc1f   : > { %4769 = vrot.lane.b32.xlu0 %v7191_v21, %s5290_s27 }
 0xc23   : > { %4779 = vrot.lane.b32.xlu0 %v7192_v45, %s7152_s21 }
 0xc35   : > { %v2524_v17 = vpop.xlane.xlu1 %2523 }
 0xc39   : > { %v2520_v19 = vpop.xlane.xlu1 %2519 }
 0xc3a   : > { %5162 = vrcp.f32 %v2520_v19 }
 0xc3d   : > { %v2526_v10 = vpop.xlane.xlu1 %2525 }
 0xc41   : > { %v2522_v63 = vpop.xlane.xlu1 %2521  ;;  %v2532_v2 = vpop.xlane.xlu0 %2531 }
 0xc42   : > { %5164 = vrcp.f32 %v2522_v63 }
 0xc44   : > { %v5163_v26 = vpop.eup %5162 }
 0xc45   : > { %v2530_v18 = vpop.xlane.xlu1 %2529  ;;  %v2528_v4 = vpop.xlane.xlu0 %2527  ;;  %v2567_v40 = vmul.f32 %v5163_v26, %v6418_v38 }
 0xc46   : > { %5166 = vrcp.f32 %v2530_v18 }
 0xc47   : > { %5168 = vrcp.f32 %v2528_v4 }
 0xc48   : > { %5170 = vrcp.f32 %v2526_v10 }
 0xc49   : > { %v2534_v44 = vpop.xlane.xlu0 %2533 }
 0xc4a   : > { %5172 = vrcp.f32 %v2534_v44  ;;  %v4900_v44 = vld [vmem:[%s7139_s6] sm:$0xff]  }
 0xc4b   : > { %5174 = vrcp.f32 %v2524_v17 }
 0xc4c   : > { %v5165_v46 = vpop.eup %5164  ;;  %5176 = vrcp.f32 %v2532_v2 }
 0xc4d   : > { %v2536_v22 = vpop.xlane.xlu1 %2535  ;;  %v2540_v3 = vpop.xlane.xlu0 %2539  ;;  %v2568_v53 = vmul.f32 %v5165_v46, %v6426_v12 }
 0xc4e   : > { %5178 = vrcp.f32 %v2536_v22 }
 0xc4f   : > { %v2583_v1 = vpack.c.bf16 %v2568_v53, %v2567_v40 }
 0xc50   : > { %v5167_v14 = vpop.eup %5166 }
 0xc51   : > { %v5169_v48 = vpop.eup %5168  ;;  %4547 = vmatprep.mubr.bf16.mxu0 %v2583_v1  ;;  %v2548_v59 = vpop.xlane.xlu1 %2547  ;;  %v2572_v47 = vmul.f32 %v5167_v14, %v6434_v16 }
 0xc52   : > { %v2542_v25 = vpop.xlane.xlu0 %2541  ;;  %v2571_v55 = vmul.f32 %v5169_v48, %v6436_v9  ;;  %v5171_v12 = vpop.eup %5170 }
 0xc53   : > { %5180 = vrcp.f32 %v2542_v25  ;;  %v2570_v16 = vmul.f32 %v5171_v12, %v6421_v30 }
 0xc54   : > { %v2585_v31 = vpack.c.bf16 %v2572_v47, %v2571_v55  ;;  %v5173_v43 = vpop.eup %5172  ;;  %v7193_v47 = vpack.i.bf16 %v6368_v33, %v6364_v24  ;;  %v7197_v24 = vpack.i.bf16 %v6170_v29, %v6164_v52 }
 0xc55   : > { %v2544_v7 = vpop.xlane.xlu1 %2543  ;;  %v5175_v49 = vpop.eup %5174  ;;  %v2574_v9 = vmul.f32 %v5173_v43, %v6441_v13  ;;  %v7196_v43 = vpack.i.bf16 %v6166_v36, %v6162_v62 }
 0xc56   : > { %v2538_v38 = vpop.xlane.xlu0 %2537  ;;  %4551 = vmatprep.mubr.bf16.mxu1 %v2585_v31  ;;  %v5177_v11 = vpop.eup %5176  ;;  %v2569_v50 = vmul.f32 %v5175_v49, %v6415_v39  ;;  %v7194_v31 = vpack.i.bf16 %v6372_v20, %v6366_v51  ;;  %v7198_v51 = vld [vmem:[#allocation23_spill] sm:$0xff]  ;;  %v7200_v20 = vld [vmem:[#allocation25_spill] sm:$0xff] }
 0xc57   : > { %5182 = vrcp.f32 %v2538_v38  ;;  %v2573_v42 = vmul.f32 %v5177_v11, %v6428_v61  ;;  %v7199_v33 = vpack.i.bf16 %v6380_v56, %v7198_v51 }
 0xc58   : > { %5184 = vrcp.f32 %v2540_v3  ;;  %v5179_v0 = vpop.eup %5178  ;;  %v2584_v32 = vpack.c.bf16 %v2570_v16, %v2569_v50 }
 0xc59   : > { %v2606_v35 = vpop.permute.xlu1 %2605  ;;  %v2586_v41 = vpack.c.bf16 %v2574_v9, %v2573_v42  ;;  %v2575_v8 = vmul.f32 %v5179_v0, %v6446_v6  ;;  %5186 = vrcp.f32 %v2544_v7 }
 0xc5a   : > { %v2604_v54 = vpop.permute.xlu0 %2603 }
 0xc5b   : > { %4543 = vmatprep.subr.bf16.mxu0 %v2604_v54  ;;  %4629 = vmatprep.subr.bf16.mxu1 %v2604_v54 }
 0xc5c   : > { %4544 = vmatpush3.bf16.msra.mxu0 %v2604_v54  ;;  %4637 = vmatpush3.bf16.msra.mxu1 %v2604_v54  ;;  %v7201_v54 = vld [vmem:[#allocation24_spill] sm:$0xff] }
 0xc5d   : > { %4545 = vmatprep.subr.bf16.mxu0 %v2606_v35  ;;  %4630 = vmatprep.subr.bf16.mxu1 %v2606_v35  ;;  %v5181_v23 = vpop.eup %5180  ;;  %v7202_v49 = vpack.i.bf16 %v7200_v20, %v7201_v54  ;;  %v4745_v52 = vpop.permute.xlu1 %4744 }
 0xc5e   : > { %v2578_v21 = vmul.f32 %v5181_v23, %v6450_v28 }
 0xc60   : > { %4546 = vmatpush3.bf16.msra.mxu0 %v2606_v35  ;;  %4638 = vmatpush3.bf16.msra.mxu1 %v2606_v35 }
 0xc61   : > { %v5183_v60 = vpop.eup %5182  ;;  %4563 = vmatprep.subr.bf16.mxu1 %v4900_v44  ;;  %v4750_v29 = vpop.permute.xlu1 %4749 }
 0xc62   : > { %v2576_v30 = vmul.f32 %v5183_v60, %v6456_v37  ;;  %v5185_v13 = vpop.eup %5184  ;;  %v4746_v60 = vunpack.i.l.bf16 %v4745_v52 }
 0xc63   : > { %4548 = vmatmul.mubr.bf16.vlgmr.msra.gmra.mrb[80].mxu0 %v2584_v32  ;;  %4552 = vmatmul.mubr.bf16.vlgmr.msra.gmra.mrb[48].mxu1 %v2586_v41  ;;  %v2577_v39 = vmul.f32 %v5185_v13, %v6444_v57  ;;  %v5187_v19 = vpop.eup %5186  ;;  %v4747_v41 = vunpack.i.h.bf16 %v4745_v52 }
 0xc64   : > { %v2587_v58 = vpack.c.bf16 %v2576_v30, %v2575_v8  ;;  %v2579_v6 = vmul.f32 %v5187_v19, %v6458_v27  ;;  %4564 = vmatpush3.bf16.msra.mxu1 %v4900_v44  ;;  %v4901_v27 = vld [vmem:[%s7139_s6 + $0x8] sm:$0xff]  }
 0xc65   : > { %v2588_v61 = vpack.c.bf16 %v2578_v21, %v2577_v39  ;;  %4565 = vmatprep.subr.bf16.mxu1 %v4901_v27  ;;  %v4755_v50 = vpop.permute.xlu1 %4754 }
 0xc66   : > { %4555 = vmatprep.mubr.bf16.mxu1 %v2587_v58  ;;  %v4757_v58 = vunpack.i.h.bf16 %v4755_v50  ;;  %v4756_v21 = vunpack.i.l.bf16 %v4755_v50 }
 0xc68   : > { %4566 = vmatpush3.bf16.msra.mxu1 %v4901_v27 }
 0xc69   : > { %v4765_v0 = vpop.permute.xlu1 %4764 }
 0xc6b   : > { %4556 = vmatmul.mubr.bf16.gmra.mrb[52].mxu1 %v2588_v61  ;;  %v7203_v61 = vld [vmem:[#allocation9_spill] sm:$0xff] }
 0xc6d   : > { %v4775_v23 = vpop.permute.xlu1 %4774 }
 0xc71   : > { %v6560_v8 = vpop.permute.xlu1 %4784 }
 0xc8a   : > { %v2546_v45 = vpop.xlane.xlu0 %2545 }
 0xc8b   : > { %5188 = vrcp.f32 %v2546_v45  ;;  %v2907_v45 = vsel %vm943_vm1, %v7203_v61, %v4747_v41 }
 0xc8c   : > { %5190 = vrcp.f32 %v2548_v59 }
 0xc8e   : > { %v2550_v17 = vpop.xlane.xlu0 %2549 }
 0xc8f   : > { %5192 = vrcp.f32 %v2550_v17  ;;  %v7204_v17 = vld [vmem:[#allocation7_spill] sm:$0xff] }
 0xc90   : > { %v2906_v19 = vsel %vm943_vm1, %v7204_v17, %v4746_v60  ;;  %v4786_v60 = vunpack.i.l.bf16 %v6560_v8 }
 0xc92   : > { %v4740_v42 = vpop.permute.xlu0 %4739 }
 0xc93   : > { %v4742_v30 = vunpack.i.h.bf16 %v4740_v42  ;;  %v4741_v13 = vunpack.i.l.bf16 %v4740_v42 }
 0xc95   : > { %v5189_v10 = vpop.eup %5188 }
 0xc96   : > { %v2580_v37 = vmul.f32 %v5189_v10, %v6492_v15  ;;  %v5191_v63 = vpop.eup %5190  ;;  %v4760_v56 = vpop.permute.xlu0 %4759  ;;  %v4752_v10 = vunpack.i.h.bf16 %v4750_v29 }
 0xc97   : > { %v2581_v57 = vmul.f32 %v5191_v63, %v6452_v5 }
 0xc98   : > { %v2589_v2 = vpack.c.bf16 %v2580_v37, %v2579_v6  ;;  %v4751_v6 = vunpack.i.l.bf16 %v4750_v29  ;;  %v7205_v37 = vld [vmem:[#allocation10_spill] sm:$0xff]  ;;  %v7210_v29 = vld [vmem:[#allocation12_spill] sm:$0xff] }
 0xc99   : > { %v5193_v28 = vpop.eup %5192  ;;  %v2905_v63 = vsel %vm943_vm1, %v7205_v37, %v4742_v30 }
 0xc9a   : > { %4559 = vmatprep.mubr.bf16.mxu1 %v2589_v2  ;;  %v2582_v18 = vmul.f32 %v5193_v28, %v6495_v34  ;;  %v4770_v32 = vpop.permute.xlu0 %4769  ;;  %v7206_v2 = vld [vmem:[#allocation8_spill] sm:$0xff] }
 0xc9b   : > { %v2904_v28 = vsel %vm943_vm1, %v7206_v2, %v4741_v13  ;;  %v4771_v51 = vunpack.i.l.bf16 %v4770_v32  ;;  %v7211_v2 = vld [vmem:[#allocation17_spill] sm:$0xff] }
 0xc9c   : > { %v2590_v4 = vpack.c.bf16 %v2582_v18, %v2581_v57  ;;  %v2923_v18 = vsel %vm2920_vm2, %v2906_v19, %v4756_v21 }
 0xc9e   : > { %4560 = vmatmul.mubr.bf16.gmra.mrb[56].mxu1 %v2590_v4  ;;  %v6562_v39 = vpop.permute.xlu0 %4779  ;;  %v2924_v4 = vsel %vm2920_vm2, %v2907_v45, %v4757_v58 }
 0xc9f   : > { %v4782_v61 = vunpack.i.h.bf16 %v6562_v39  ;;  %v4781_v45 = vunpack.i.l.bf16 %v6562_v39 }
 0xd36   : > { %v4549_v15 = vpop.f32.mrb[80].mxu0  ;;  %v4553_v26 = vpop.f32.mrb[48].mxu1 }
 0xd37   : > { %v2649_v46 = vpop.f32.mrb[81].mxu0  ;;  %v2665_v5 = vpop.f32.mrb[49].mxu1 }
 0xd38   : > { %v4550_v22 = vpop.f32.mrb[82].mxu0  ;;  %v4554_v34 = vpop.f32.mrb[50].mxu1 }
 0xd39   : > { %v4788_v3 = vpack.i.bf16 %v4550_v22, %v4549_v15  ;;  %v4808_v40 = vpack.i.bf16 %v4554_v34, %v4553_v26  ;;  %v2652_v53 = vpop.f32.mrb[83].mxu0  ;;  %v2668_v1 = vpop.f32.mrb[51].mxu1  ;;  %v4767_v26 = vunpack.i.h.bf16 %v4765_v0 }
 0xd3a   : > { %v4793_v14 = vpack.i.bf16 %v2652_v53, %v2649_v46  ;;  %v4813_v48 = vpack.i.bf16 %v2668_v1, %v2665_v5  ;;  %v4766_v46 = vunpack.i.l.bf16 %v4765_v0  ;;  %v2922_v53 = vsel %vm2920_vm2, %v2905_v63, %v4752_v10 }
 0xd3b   : > { %4789 = vrot.lane.b32.xlu1 %v4788_v3, %s5291_s28  ;;  %v4776_v1 = vunpack.i.l.bf16 %v4775_v23 }
 0xd3c   : > { %4794 = vrot.lane.b32.xlu0 %v4793_v14, %s5291_s28 }
 0xd3e   : > { %v4557_v59 = vpop.f32.mrb[52].mxu1 }
 0xd3f   : > { %v2681_v25 = vpop.f32.mrb[53].mxu1  ;;  %4804 = vrot.lane.b32.xlu1 %v7193_v47, %s5290_s27  ;;  %v4777_v47 = vunpack.i.h.bf16 %v4775_v23 }
 0xd40   : > { %v4558_v55 = vpop.f32.mrb[54].mxu1  ;;  %4799 = vrot.lane.b32.xlu0 %v7194_v31, %s5290_s27 }
 0xd41   : > { %v4828_v7 = vpack.i.bf16 %v4558_v55, %v4557_v59  ;;  %v2684_v38 = vpop.f32.mrb[55].mxu1 }
 0xd42   : > { %v4833_v12 = vpack.i.bf16 %v2684_v38, %v2681_v25  ;;  %v4761_v38 = vunpack.i.l.bf16 %v4760_v56 }
 0xd43   : > { %4809 = vrot.lane.b32.xlu1 %v4808_v40, %s5291_s28  ;;  %v2921_v40 = vsel %vm2920_vm2, %v2904_v28, %v4751_v6  ;;  %v7212_v28 = vld [vmem:[#allocation15_spill] sm:$0xff] }
 0xd44   : > { %4814 = vrot.lane.b32.xlu0 %v4813_v48, %s5291_s28  ;;  %v2908_v50 = vsel %vm943_vm1, %v7210_v29, %v4761_v38 }
 0xd47   : > { %4824 = vrot.lane.b32.xlu1 %v7196_v43, %s7195_s26 }
 0xd48   : > { %4819 = vrot.lane.b32.xlu0 %v7197_v24, %s7195_s26  ;;  %v4772_v24 = vunpack.i.h.bf16 %v4770_v32  ;;  %s3874_s26 = scalar_lea.sflag [#allocation3], %s473_s0 }
 0xd4b   : > { %4829 = vrot.lane.b32.xlu1 %v4828_v7, %s5291_s28  ;;  %v4762_v7 = vunpack.i.h.bf16 %v4760_v56  ;;  %v2925_v56 = vsel %vm2920_vm2, %v2908_v50, %v4771_v51 }
 0xd4c   : > { %4834 = vrot.lane.b32.xlu0 %v4833_v12, %s5291_s28  ;;  %v7207_v12 = vld [vmem:[#allocation11_spill] sm:$0xff] }
 0xd4d   : > { %v2910_v43 = vsel %vm943_vm1, %v7207_v12, %v4766_v46 }
 0xd4e   : > { %v2927_v54 = vsel %vm2920_vm2, %v2910_v43, %v4776_v1 }
 0xd4f   : > { %4844 = vrot.lane.b32.xlu1 %v7199_v33, %s5290_s27  ;;  %v7208_v33 = vld [vmem:[#allocation13_spill] sm:$0xff] }
 0xd50   : > { %4839 = vrot.lane.b32.xlu0 %v7202_v49, %s5290_s27  ;;  %v2911_v20 = vsel %vm943_vm1, %v7208_v33, %v4767_v26 }
 0xd71   : > { %v4561_v11 = vpop.f32.mrb[56].mxu1 }
 0xd72   : > { %v2697_v62 = vpop.f32.mrb[57].mxu1 }
 0xd73   : > { %v4562_v36 = vpop.f32.mrb[58].mxu1 }
 0xd74   : > { %v4853_v35 = vpack.i.bf16 %v4562_v36, %v4561_v11  ;;  %v2700_v16 = vpop.f32.mrb[59].mxu1  ;;  %v2928_v11 = vsel %vm2920_vm2, %v2911_v20, %v4777_v47 }
 0xd75   : > { %v4848_v9 = vpack.i.bf16 %v2700_v16, %v2697_v62  ;;  %v4787_v62 = vunpack.i.h.bf16 %v6560_v8 }
 0xd76   : > { %4854 = vrot.lane.b32.xlu1 %v4853_v35, %s5291_s28 }
 0xd77   : > { %4849 = vrot.lane.b32.xlu0 %v4848_v9, %s5291_s28  ;;  %v7209_v9 = vld [vmem:[#allocation14_spill] sm:$0xff]  ;;  %v2915_v8 = vsel %vm943_vm1, %v7211_v2, %v4787_v62  ;;  %s7037_s28 = scalar_lea.vmem [#allocation2], %s3994_s25 }
 0xd78   : > { %v2909_v52 = vsel %vm943_vm1, %v7209_v9, %v4762_v7  ;;  %v7218_v9 = vld [vmem:[#allocation20_spill] sm:$0xff] }
 0xd79   : > { %v2926_v23 = vsel %vm2920_vm2, %v2909_v52, %v4772_v24 }
 0xdad   : > { %v4790_v57 = vpop.permute.xlu1 %4789 }
 0xdae   : > { %v4792_v44 = vunpack.i.h.bf16 %v4790_v57  ;;  %v4791_v27 = vunpack.i.l.bf16 %v4790_v57  ;;  %v4795_v15 = vpop.permute.xlu0 %4794  ;;  %v2914_v57 = vsel %vm943_vm1, %v7212_v28, %v4786_v60 }
 0xdaf   : > { %v4797_v5 = vunpack.i.h.bf16 %v4795_v15  ;;  %v4796_v22 = vunpack.i.l.bf16 %v4795_v15 }
 0xdb0   : > { %v2941_v34 = vsel %vm2937_vm3, %v2924_v4, %v4792_v44  ;;  %v2940_v3 = vsel %vm2937_vm3, %v2923_v18, %v4791_v27  ;;  %v7213_v4 = vld [vmem:[#allocation18_spill] sm:$0xff]  ;;  %v7214_v44 = vld [vmem:[#allocation16_spill] sm:$0xff] }
 0xdb1   : > { %v2955_v14 = vpack.c.bf16 %v2941_v34, %v2940_v3  ;;  %v2938_v48 = vsel %vm2937_vm3, %v2921_v40, %v4796_v22  ;;  %v2939_v59 = vsel %vm2937_vm3, %v2922_v53, %v4797_v5  ;;  %v4805_v25 = vpop.permute.xlu1 %4804  ;;  %v2913_v39 = vsel %vm943_vm1, %v7213_v4, %v4782_v61 }
 0xdb2   : > { %v2954_v55 = vpack.c.bf16 %v2939_v59, %v2938_v48  ;;  %v4800_v31 = vpop.permute.xlu0 %4799  ;;  %v4807_v10 = vunpack.i.h.bf16 %v4805_v25  ;;  %v4806_v6 = vunpack.i.l.bf16 %v4805_v25  ;;  %v2912_v27 = vsel %vm943_vm1, %v7214_v44, %v4781_v45  ;;  %v5228_v44 = vld [vmem:[%s5433_s18 + $0x8] sm:$0xff] }
 0xdb3   : > { %v4802_v37 = vunpack.i.h.bf16 %v4800_v31  ;;  %v4801_v63 = vunpack.i.l.bf16 %v4800_v31 }
 0xdb4   : > { %4567 = vmatprep.mubr.msk.bf16.mxu1 %vm505_vm0, %v2954_v55  ;;  %v2932_v5 = vsel %vm2920_vm2, %v2915_v8, %v4807_v10  ;;  %v2931_v22 = vsel %vm2920_vm2, %v2914_v57, %v4806_v6  ;;  %v5226_v8 = vld [vmem:[%s5433_s18] sm:$0xff] }
 0xdb5   : > { %v4810_v49 = vpop.permute.xlu1 %4809  ;;  %4568 = vmatmul.mubr.msk.bf16.vlgmr.msra.gmra.mrb[60].mxu1 %vm505_vm0, %v2955_v14  ;;  %v2929_v40 = vsel %vm2920_vm2, %v2912_v27, %v4801_v63  ;;  %v2930_v53 = vsel %vm2920_vm2, %v2913_v39, %v4802_v37 }
 0xdb6   : > { %v4812_v36 = vunpack.i.h.bf16 %v4810_v49  ;;  %v4811_v35 = vunpack.i.l.bf16 %v4810_v49  ;;  %v4815_v16 = vpop.permute.xlu0 %4814 }
 0xdb7   : > { %v4817_v42 = vunpack.i.h.bf16 %v4815_v16  ;;  %v4816_v0 = vunpack.i.l.bf16 %v4815_v16 }
 0xdb8   : > { %v2945_v32 = vsel %vm2937_vm3, %v2928_v11, %v4812_v36  ;;  %v2944_v41 = vsel %vm2937_vm3, %v2927_v54, %v4811_v35  ;;  %v7215_v54 = vld [vmem:[#allocation21_spill] sm:$0xff]  ;;  %v7216_v11 = vld [vmem:[#allocation19_spill] sm:$0xff]  ;;  %v7217_v35 = vld [vmem:[#allocation22_spill] sm:$0xff] }
 0xdb9   : > { %v2957_v30 = vpack.c.bf16 %v2945_v32, %v2944_v41  ;;  %v2942_v13 = vsel %vm2937_vm3, %v2925_v56, %v4816_v0  ;;  %v2943_v58 = vsel %vm2937_vm3, %v2926_v23, %v4817_v42  ;;  %v4825_v21 = vpop.permute.xlu1 %4824 }
 0xdba   : > { %v2956_v17 = vpack.c.bf16 %v2943_v58, %v2942_v13  ;;  %v4820_v19 = vpop.permute.xlu0 %4819  ;;  %v4827_v31 = vunpack.i.h.bf16 %v4825_v21  ;;  %v4826_v7 = vunpack.i.l.bf16 %v4825_v21 }
 0xdbb   : > { %v4822_v12 = vunpack.i.h.bf16 %v4820_v19  ;;  %v4821_v43 = vunpack.i.l.bf16 %v4820_v19 }
 0xdbc   : > { %4571 = vmatprep.mubr.msk.bf16.mxu1 %vm505_vm0, %v2956_v17  ;;  %v2919_v49 = vsel %vm943_vm1, %v7215_v54, %v4827_v31  ;;  %v2918_v62 = vsel %vm943_vm1, %v7216_v11, %v4826_v7  ;;  %v6643_v17 = vld [vmem:[%s7140_s7] ss:$0 sm:$0xff] }
 0xdbd   : > { %v4830_v18 = vpop.permute.xlu1 %4829  ;;  %4572 = vmatmul.mubr.msk.bf16.gmra.mrb[64].mxu1 %vm505_vm0, %v2957_v30  ;;  %v2917_v16 = vsel %vm943_vm1, %v7217_v35, %v4822_v12  ;;  %v2916_v52 = vsel %vm943_vm1, %v7218_v9, %v4821_v43 }
 0xdbe   : > { %v4832_v15 = vunpack.i.h.bf16 %v4830_v18  ;;  %v4831_v26 = vunpack.i.l.bf16 %v4830_v18  ;;  %v4835_v46 = vpop.permute.xlu0 %4834  ;;  %v5227_v18 = vld [vmem:[%s5433_s18 + $0x10] sm:$0xff] }
 0xdbf   : > { %v4837_v34 = vunpack.i.h.bf16 %v4835_v46  ;;  %v4836_v3 = vunpack.i.l.bf16 %v4835_v46 }
 0xdc0   : > { %v2948_v1 = vsel %vm2937_vm3, %v2931_v22, %v4831_v26  ;;  %v2949_v14 = vsel %vm2937_vm3, %v2932_v5, %v4832_v15  ;;  %v5229_v22 = vld [vmem:[%s5433_s18 + $0x18] sm:$0xff] }
 0xdc1   : > { %v2959_v48 = vpack.c.bf16 %v2949_v14, %v2948_v1  ;;  %v2946_v59 = vsel %vm2937_vm3, %v2929_v40, %v4836_v3  ;;  %v2947_v25 = vsel %vm2937_vm3, %v2930_v53, %v4837_v34  ;;  %v4845_v55 = vpop.permute.xlu1 %4844 }
 0xdc2   : > { %v2958_v47 = vpack.c.bf16 %v2947_v25, %v2946_v59  ;;  %v4840_v38 = vpop.permute.xlu0 %4839  ;;  %v4847_v24 = vunpack.i.h.bf16 %v4845_v55  ;;  %v4846_v51 = vunpack.i.l.bf16 %v4845_v55  ;;  %v5230_v25 = vld [vmem:[%s5433_s18 + $0x20] sm:$0xff]  ;;  %v5231_v55 = vld [vmem:[%s5433_s18 + $0x28] sm:$0xff] }
 0xdc3   : > { %v4842_v33 = vunpack.i.h.bf16 %v4840_v38  ;;  %v4841_v20 = vunpack.i.l.bf16 %v4840_v38  ;;  %v5232_v38 = vld [vmem:[%s5433_s18 + $0x38] sm:$0xff] }
 0xdc4   : > { %4575 = vmatprep.mubr.msk.bf16.mxu1 %vm505_vm0, %v2958_v47  ;;  %v2935_v0 = vsel %vm2920_vm2, %v2918_v62, %v4846_v51  ;;  %v2936_v56 = vsel %vm2920_vm2, %v2919_v49, %v4847_v24 }
 0xdc5   : > { %4576 = vmatmul.mubr.msk.bf16.gmra.mrb[68].mxu1 %vm505_vm0, %v2959_v48  ;;  %v2933_v41 = vsel %vm2920_vm2, %v2916_v52, %v4841_v20  ;;  %v2934_v60 = vsel %vm2920_vm2, %v2917_v16, %v4842_v33  ;;  %v5233_v33 = vld [vmem:[%s5433_s18 + $0x30] sm:$0xff]  ;;  %v5234_v52 = vld [vmem:[%s5433_s18 + $0x40] sm:$0xff] }
 0xde8   : > { %v4855_v36 = vpop.permute.xlu1 %4854 }
 0xde9   : > { %v4857_v29 = vunpack.i.h.bf16 %v4855_v36  ;;  %v4856_v50 = vunpack.i.l.bf16 %v4855_v36  ;;  %v4850_v42 = vpop.permute.xlu0 %4849 }
 0xdea   : > { %v4852_v23 = vunpack.i.h.bf16 %v4850_v42  ;;  %v4851_v32 = vunpack.i.l.bf16 %v4850_v42 }
 0xdeb   : > { %v2953_v30 = vsel %vm2937_vm3, %v2936_v56, %v4857_v29  ;;  %v2952_v13 = vsel %vm2937_vm3, %v2935_v0, %v4856_v50  ;;  %v5235_v50 = vld [vmem:[%s5433_s18 + $0x48] sm:$0xff]  ;;  %v5236_v56 = vld [vmem:[%s5433_s18 + $0x58] sm:$0xff] }
 0xdec   : > { %v2961_v58 = vpack.c.bf16 %v2953_v30, %v2952_v13  ;;  %v2950_v21 = vsel %vm2937_vm3, %v2933_v41, %v4851_v32  ;;  %v2951_v61 = vsel %vm2937_vm3, %v2934_v60, %v4852_v23  ;;  %v5237_v41 = vld [vmem:[%s5433_s18 + $0x50] sm:$0xff] }
 0xded   : > { %v2960_v45 = vpack.c.bf16 %v2951_v61, %v2950_v21 }
 0xdef   : > { %4579 = vmatprep.mubr.msk.bf16.mxu1 %vm505_vm0, %v2960_v45 }
 0xdf0   : > { %4580 = vmatmul.mubr.msk.bf16.gmra.mrb[72].mxu1 %vm505_vm0, %v2961_v58 }
 0xe88   : > { %v4569_v19 = vpop.f32.mrb[60].mxu1 }
 0xe89   : > { %v3043_v10 = vpop.f32.mrb[61].mxu1  ;;  %v3052_v6 = vadd.f32 %v4569_v19, %v6643_v17 }
 0xe8a   : > { %v3044_v37 = vadd.f32 %v6643_v17, %v3043_v10  ;;  %v4570_v63 = vpop.f32.mrb[62].mxu1 }
 0xe8b   : > { %v3046_v2 = vpop.f32.mrb[63].mxu1  ;;  %v6652_v4 = vadd.f32 %v5227_v18, %v3052_v6  ;;  %v3055_v39 = vadd.f32 %v4570_v63, %v6643_v17  ;;  %v5238_v63 = vld [vmem:[%s5433_s18 + $0x60] sm:$0xff] }
 0xe8c   : > { %v6648_v28 = vadd.f32 %v5226_v8, %v3044_v37  ;;  %v3047_v57 = vadd.f32 %v6643_v17, %v3046_v2 }
 0xe8d   : > { %v6663_v34 = vadd.f32 %v5229_v22, %v3055_v39  ;;  %v3130_v53 = vsel %vm505_vm0, %v6652_v4, 0.0  ;;  %v5240_v39 = vld [vmem:[%s5433_s18 + $0x68] sm:$0xff] }
 0xe8e   : > { %v6656_v27 = vadd.f32 %v5228_v44, %v3047_v57  ;;  %v3124_v15 = vsel %vm505_vm0, %v6648_v28, 0.0  ;;  %v5239_v57 = vld [vmem:[%s5433_s18 + $0x70] sm:$0xff] }
 0xe8f   : > { %3125 = vadd.xlane.f32.xlu0 %v3124_v15  ;;  %v3133_v7 = vsel %vm505_vm0, %v6663_v34, 0.0 }
 0xe90   : > { %v4573_v26 = vpop.f32.mrb[64].mxu1  ;;  %v3127_v46 = vsel %vm505_vm0, %v6656_v27, 0.0 }
 0xe91   : > { %v3059_v5 = vpop.f32.mrb[65].mxu1  ;;  %3128 = vadd.xlane.f32.xlu1 %v3127_v46  ;;  %v3068_v59 = vadd.f32 %v4573_v26, %v6643_v17  ;;  %v5241_v26 = vld [vmem:[%s5433_s18 + $0x78] sm:$0xff] }
 0xe92   : > { %v3060_v3 = vadd.f32 %v6643_v17, %v3059_v5  ;;  %v4574_v40 = vpop.f32.mrb[66].mxu1 }
 0xe93   : > { %v3062_v1 = vpop.f32.mrb[67].mxu1  ;;  %3131 = vadd.xlane.f32.xlu0 %v3130_v53  ;;  %v3071_v14 = vadd.f32 %v4574_v40, %v6643_v17  ;;  %v6685_v20 = vadd.f32 %v5233_v33, %v3068_v59 }
 0xe94   : > { %v3063_v48 = vadd.f32 %v6643_v17, %v3062_v1  ;;  %v6672_v47 = vadd.f32 %v5230_v25, %v3060_v3 }
 0xe95   : > { %v6680_v12 = vadd.f32 %v5232_v38, %v3071_v14  ;;  %v3142_v0 = vsel %vm505_vm0, %v6685_v20, 0.0 }
 0xe96   : > { %v6675_v31 = vadd.f32 %v5231_v55, %v3063_v48  ;;  %v3136_v11 = vsel %vm505_vm0, %v6672_v47, 0.0 }
 0xe97   : > { %3134 = vadd.xlane.f32.xlu0 %v3133_v7  ;;  %v3145_v16 = vsel %vm505_vm0, %v6680_v12, 0.0 }
 0xe98   : > { %v4577_v43 = vpop.f32.mrb[68].mxu1  ;;  %v3139_v24 = vsel %vm505_vm0, %v6675_v31, 0.0 }
 0xe99   : > { %v3075_v51 = vpop.f32.mrb[69].mxu1  ;;  %3140 = vadd.xlane.f32.xlu1 %v3139_v24  ;;  %v3084_v9 = vadd.f32 %v4577_v43, %v6643_v17 }
 0xe9a   : > { %v3076_v54 = vadd.f32 %v6643_v17, %v3075_v51  ;;  %v4578_v49 = vpop.f32.mrb[70].mxu1 }
 0xe9b   : > { %v3078_v62 = vpop.f32.mrb[71].mxu1  ;;  %3137 = vadd.xlane.f32.xlu0 %v3136_v11  ;;  %v3087_v36 = vadd.f32 %v4578_v49, %v6643_v17  ;;  %v6709_v60 = vadd.f32 %v5237_v41, %v3084_v9 }
 0xe9c   : > { %v3079_v35 = vadd.f32 %v6643_v17, %v3078_v62  ;;  %v6696_v29 = vadd.f32 %v5234_v52, %v3076_v54 }
 0xe9d   : > { %3146 = vadd.xlane.f32.xlu1 %v3145_v16  ;;  %v6704_v23 = vadd.f32 %v5236_v56, %v3087_v36  ;;  %v3154_v58 = vsel %vm505_vm0, %v6709_v60, 0.0 }
 0xe9e   : > { %v6699_v42 = vadd.f32 %v5235_v50, %v3079_v35  ;;  %v3148_v30 = vsel %vm505_vm0, %v6696_v29, 0.0 }
 0xe9f   : > { %3143 = vadd.xlane.f32.xlu0 %v3142_v0  ;;  %v3157_v13 = vsel %vm505_vm0, %v6704_v23, 0.0 }
 0xea0   : > { %v3151_v32 = vsel %vm505_vm0, %v6699_v42, 0.0 }
 0xea1   : > { %3152 = vadd.xlane.f32.xlu1 %v3151_v32 }
 0xea3   : > { %3149 = vadd.xlane.f32.xlu0 %v3148_v30 }
 0xea5   : > { %3158 = vadd.xlane.f32.xlu1 %v3157_v13 }
 0xea7   : > { %3155 = vadd.xlane.f32.xlu0 %v3154_v58 }
 0xec3   : > { %v4581_v21 = vpop.f32.mrb[72].mxu1 }
 0xec4   : > { %v3100_v61 = vadd.f32 %v4581_v21, %v6643_v17  ;;  %v3091_v45 = vpop.f32.mrb[73].mxu1 }
 0xec5   : > { %v3092_v19 = vadd.f32 %v6643_v17, %v3091_v45  ;;  %v4582_v10 = vpop.f32.mrb[74].mxu1 }
 0xec6   : > { %v3103_v6 = vadd.f32 %v4582_v10, %v6643_v17  ;;  %v3094_v37 = vpop.f32.mrb[75].mxu1  ;;  %v6725_v18 = vadd.f32 %v5239_v57, %v3100_v61 }
 0xec7   : > { %v6721_v2 = vadd.f32 %v5238_v63, %v3092_v19  ;;  %v3095_v8 = vadd.f32 %v6643_v17, %v3094_v37 }
 0xec8   : > { %v6733_v46 = vadd.f32 %v5241_v26, %v3103_v6  ;;  %v3166_v17 = vsel %vm505_vm0, %v6725_v18, 0.0 }
 0xec9   : > { %v6728_v44 = vadd.f32 %v5240_v39, %v3095_v8  ;;  %v3160_v15 = vsel %vm505_vm0, %v6721_v2, 0.0 }
 0xeca   : > { %3161 = vadd.xlane.f32.xlu0 %v3160_v15  ;;  %v3169_v22 = vsel %vm505_vm0, %v6733_v46, 0.0 }
 0xecb   : > { %v3163_v5 = vsel %vm505_vm0, %v6728_v44, 0.0 }
 0xecc   : > { %3164 = vadd.xlane.f32.xlu1 %v3163_v5 }
 0xece   : > { %3167 = vadd.xlane.f32.xlu0 %v3166_v17 }
 0xed0   : > { %3170 = vadd.xlane.f32.xlu1 %v3169_v22 }
 0xf1c   : > { %v3126_v3 = vpop.xlane.xlu0 %3125 }
 0xf1d   : > { %v3172_v40 = vmul.f32 0.03125, %v3126_v3 }
 0xf1e   : > { %v3129_v53 = vpop.xlane.xlu1 %3128 }
 0xf1f   : > { %v6742_v1 = vsub.f32 %v6648_v28, %v3172_v40  ;;  %v3173_v14 = vmul.f32 0.03125, %v3129_v53  ;;  %v4903_v40 = vld [vmem:[%s7143_s10 + $0x8] sm:$0xff]  }
 0xf20   : > { %v3132_v48 = vpop.xlane.xlu0 %3131 }
 0xf21   : > { %v6745_v59 = vsub.f32 %v6656_v27, %v3173_v14  ;;  %v3174_v25 = vmul.f32 0.03125, %v3132_v48  ;;  %v3204_v55 = vmul.f32 %v6742_v1, %v6742_v1 }
 0xf23   : > { %v6750_v7 = vsub.f32 %v6652_v4, %v3174_v25  ;;  %v3220_v38 = vsel %vm505_vm0, %v3204_v55, 0.0  ;;  %v3205_v43 = vmul.f32 %v6745_v59, %v6745_v59 }
 0xf24   : > { %3221 = vadd.xlane.f32.xlu0 %v3220_v38  ;;  %v3135_v28 = vpop.xlane.xlu0 %3134 }
 0xf25   : > { %v3175_v24 = vmul.f32 0.03125, %v3135_v28  ;;  %v3223_v51 = vsel %vm505_vm0, %v3205_v43, 0.0  ;;  %v3206_v27 = vmul.f32 %v6750_v7, %v6750_v7 }
 0xf26   : > { %3224 = vadd.xlane.f32.xlu1 %v3223_v51  ;;  %v3141_v33 = vpop.xlane.xlu1 %3140 }
 0xf27   : > { %v6759_v54 = vsub.f32 %v6663_v34, %v3175_v24  ;;  %v3177_v4 = vmul.f32 0.03125, %v3141_v33  ;;  %v3226_v49 = vsel %vm505_vm0, %v3206_v27, 0.0 }
 0xf28   : > { %3227 = vadd.xlane.f32.xlu0 %v3226_v49  ;;  %v3138_v11 = vpop.xlane.xlu0 %3137 }
 0xf29   : > { %v6763_v62 = vsub.f32 %v6675_v31, %v3177_v4  ;;  %v3176_v36 = vmul.f32 0.03125, %v3138_v11  ;;  %v3207_v35 = vmul.f32 %v6759_v54, %v6759_v54 }
 0xf2a   : > { %v3147_v16 = vpop.xlane.xlu1 %3146 }
 0xf2b   : > { %v6768_v9 = vsub.f32 %v6672_v47, %v3176_v36  ;;  %v3179_v52 = vmul.f32 0.03125, %v3147_v16  ;;  %v3229_v34 = vsel %vm505_vm0, %v3207_v35, 0.0  ;;  %v3209_v50 = vmul.f32 %v6763_v62, %v6763_v62 }
 0xf2c   : > { %3230 = vadd.xlane.f32.xlu1 %v3229_v34  ;;  %v3144_v0 = vpop.xlane.xlu0 %3143 }
 0xf2d   : > { %v6774_v56 = vsub.f32 %v6680_v12, %v3179_v52  ;;  %v3178_v31 = vmul.f32 0.03125, %v3144_v0  ;;  %v3208_v32 = vmul.f32 %v6768_v9, %v6768_v9  ;;  %v3235_v30 = vsel %vm505_vm0, %v3209_v50, 0.0 }
 0xf2e   : > { %v3153_v41 = vpop.xlane.xlu1 %3152 }
 0xf2f   : > { %v6780_v47 = vsub.f32 %v6685_v20, %v3178_v31  ;;  %v3181_v13 = vmul.f32 0.03125, %v3153_v41  ;;  %v3232_v58 = vsel %vm505_vm0, %v3208_v32, 0.0  ;;  %v3211_v21 = vmul.f32 %v6774_v56, %v6774_v56 }
 0xf30   : > { %3236 = vadd.xlane.f32.xlu1 %v3235_v30  ;;  %3233 = vadd.xlane.f32.xlu0 %v3232_v58  ;;  %v3150_v12 = vpop.xlane.xlu0 %3149 }
 0xf31   : > { %v6786_v61 = vsub.f32 %v6699_v42, %v3181_v13  ;;  %v3180_v45 = vmul.f32 0.03125, %v3150_v12  ;;  %v3210_v19 = vmul.f32 %v6780_v47, %v6780_v47  ;;  %v3241_v20 = vsel %vm505_vm0, %v3211_v21, 0.0 }
 0xf32   : > { %v3159_v10 = vpop.xlane.xlu1 %3158 }
 0xf33   : > { %v6792_v6 = vsub.f32 %v6696_v29, %v3180_v45  ;;  %v3183_v37 = vmul.f32 0.03125, %v3159_v10  ;;  %v3238_v63 = vsel %vm505_vm0, %v3210_v19, 0.0  ;;  %v3213_v8 = vmul.f32 %v6786_v61, %v6786_v61 }
 0xf34   : > { %3242 = vadd.xlane.f32.xlu1 %v3241_v20  ;;  %3239 = vadd.xlane.f32.xlu0 %v3238_v63  ;;  %v3156_v42 = vpop.xlane.xlu0 %3155  ;;  %v6846_v20 = vld [vmem:[%s7141_s8] ss:$0 sm:$0xff] }
 0xf35   : > { %v6798_v57 = vsub.f32 %v6704_v23, %v3183_v37  ;;  %v3182_v39 = vmul.f32 0.03125, %v3156_v42  ;;  %v3212_v15 = vmul.f32 %v6792_v6, %v6792_v6  ;;  %v3247_v29 = vsel %vm505_vm0, %v3213_v8, 0.0 }
 0xf37   : > { %v6803_v26 = vsub.f32 %v6709_v60, %v3182_v39  ;;  %v3244_v5 = vsel %vm505_vm0, %v3212_v15, 0.0  ;;  %v3215_v17 = vmul.f32 %v6798_v57, %v6798_v57  ;;  %v4902_v60 = vld [vmem:[%s7143_s10] sm:$0xff]  }
 0xf38   : > { %3248 = vadd.xlane.f32.xlu1 %v3247_v29  ;;  %3245 = vadd.xlane.f32.xlu0 %v3244_v5 }
 0xf39   : > { %v3214_v23 = vmul.f32 %v6803_v26, %v6803_v26  ;;  %v3253_v22 = vsel %vm505_vm0, %v3215_v17, 0.0  ;;  %4583 = vmatprep.subr.bf16.mxu0 %v4902_v60 }
 0xf3a   : > { %4584 = vmatpush3.bf16.msra.mxu0 %v4902_v60 }
 0xf3b   : > { %v3250_v3 = vsel %vm505_vm0, %v3214_v23, 0.0  ;;  %4585 = vmatprep.subr.bf16.mxu0 %v4903_v40 }
 0xf3c   : > { %3254 = vadd.xlane.f32.xlu1 %v3253_v22  ;;  %3251 = vadd.xlane.f32.xlu0 %v3250_v3 }
 0xf3e   : > { %4586 = vmatpush3.bf16.msra.mxu0 %v4903_v40  ;;  %v6854_v40 = vld [vmem:[%s7142_s9] ss:$0 sm:$0xff] }
 0xf57   : > { %v3162_v53 = vpop.xlane.xlu0 %3161 }
 0xf58   : > { %v3184_v14 = vmul.f32 0.03125, %v3162_v53 }
 0xf59   : > { %v3165_v48 = vpop.xlane.xlu1 %3164 }
 0xf5a   : > { %v6820_v25 = vsub.f32 %v6721_v2, %v3184_v14  ;;  %v3185_v55 = vmul.f32 0.03125, %v3165_v48 }
 0xf5b   : > { %v3168_v38 = vpop.xlane.xlu0 %3167 }
 0xf5c   : > { %v6823_v43 = vsub.f32 %v6728_v44, %v3185_v55  ;;  %v3186_v28 = vmul.f32 0.03125, %v3168_v38  ;;  %v3216_v24 = vmul.f32 %v6820_v25, %v6820_v25 }
 0xf5d   : > { %v3171_v51 = vpop.xlane.xlu1 %3170 }
 0xf5e   : > { %v6828_v27 = vsub.f32 %v6725_v18, %v3186_v28  ;;  %v3187_v33 = vmul.f32 0.03125, %v3171_v51  ;;  %v3256_v4 = vsel %vm505_vm0, %v3216_v24, 0.0  ;;  %v3217_v2 = vmul.f32 %v6823_v43, %v6823_v43 }
 0xf5f   : > { %3257 = vadd.xlane.f32.xlu0 %v3256_v4 }
 0xf60   : > { %v6834_v49 = vsub.f32 %v6733_v46, %v3187_v33  ;;  %v3259_v44 = vsel %vm505_vm0, %v3217_v2, 0.0  ;;  %v3218_v11 = vmul.f32 %v6828_v27, %v6828_v27 }
 0xf61   : > { %3260 = vadd.xlane.f32.xlu1 %v3259_v44 }
 0xf62   : > { %v3262_v36 = vsel %vm505_vm0, %v3218_v11, 0.0  ;;  %v3219_v18 = vmul.f32 %v6834_v49, %v6834_v49 }
 0xf63   : > { %3263 = vadd.xlane.f32.xlu0 %v3262_v36 }
 0xf64   : > { %v3265_v35 = vsel %vm505_vm0, %v3219_v18, 0.0 }
 0xf65   : > { %3266 = vadd.xlane.f32.xlu1 %v3265_v35 }
 0xfb1   : > { %v3222_v16 = vpop.xlane.xlu0 %3221 }
 0xfb2   : > { %v3268_v52 = vmul.f32 0.03125, %v3222_v16 }
 0xfb3   : > { %v3225_v34 = vpop.xlane.xlu1 %3224 }
 0xfb4   : > { %v3284_v46 = vadd.f32 1e-05, %v3268_v52  ;;  %v3269_v50 = vmul.f32 0.03125, %v3225_v34 }
 0xfb5   : > { %v3228_v0 = vpop.xlane.xlu0 %3227 }
 0xfb6   : > { %5194 = vrsqrt.f32 %v3284_v46  ;;  %v3285_v31 = vadd.f32 1e-05, %v3269_v50  ;;  %v3270_v32 = vmul.f32 0.03125, %v3228_v0 }
 0xfb8   : > { %5196 = vrsqrt.f32 %v3285_v31  ;;  %v3286_v41 = vadd.f32 1e-05, %v3270_v32 }
 0xfb9   : > { %v3231_v30 = vpop.xlane.xlu1 %3230 }
 0xfba   : > { %5198 = vrsqrt.f32 %v3286_v41  ;;  %v3271_v13 = vmul.f32 0.03125, %v3231_v30 }
 0xfbc   : > { %v3287_v58 = vadd.f32 1e-05, %v3271_v13 }
 0xfbd   : > { %v3237_v21 = vpop.xlane.xlu1 %3236  ;;  %v3234_v12 = vpop.xlane.xlu0 %3233 }
 0xfbe   : > { %5200 = vrsqrt.f32 %v3287_v58  ;;  %v3273_v45 = vmul.f32 0.03125, %v3237_v21  ;;  %v3272_v19 = vmul.f32 0.03125, %v3234_v12 }
 0xfc0   : > { %v5195_v10 = vpop.eup %5194  ;;  %v3289_v37 = vadd.f32 1e-05, %v3273_v45  ;;  %v3288_v63 = vadd.f32 1e-05, %v3272_v19 }
 0xfc1   : > { %v3316_v8 = vmul.f32 %v5195_v10, %v6742_v1  ;;  %v3243_v42 = vpop.xlane.xlu1 %3242  ;;  %v3240_v39 = vpop.xlane.xlu0 %3239 }
 0xfc2   : > { %v5197_v15 = vpop.eup %5196  ;;  %5202 = vrsqrt.f32 %v3289_v37  ;;  %v3275_v29 = vmul.f32 0.03125, %v3243_v42  ;;  %v3274_v5 = vmul.f32 0.03125, %v3240_v39 }
 0xfc3   : > { %v3317_v17 = vmul.f32 %v5197_v15, %v6745_v59  ;;  %5204 = vrsqrt.f32 %v3288_v63  ;;  %v3338_v23 = vmul.f32 %v6846_v20, %v3316_v8 }
 0xfc4   : > { %v5199_v22 = vpop.eup %5198  ;;  %v3291_v3 = vadd.f32 1e-05, %v3275_v29  ;;  %v3290_v60 = vadd.f32 1e-05, %v3274_v5 }
 0xfc5   : > { %v3318_v1 = vmul.f32 %v5199_v22, %v6750_v7  ;;  %v3249_v53 = vpop.xlane.xlu1 %3248  ;;  %v3246_v14 = vpop.xlane.xlu0 %3245  ;;  %v3339_v48 = vmul.f32 %v6846_v20, %v3317_v17  ;;  %v3360_v38 = vadd.f32 %v6854_v40, %v3338_v23 }
 0xfc6   : > { %5206 = vrsqrt.f32 %v3291_v3  ;;  %v3277_v55 = vmul.f32 0.03125, %v3249_v53  ;;  %v3276_v59 = vmul.f32 0.03125, %v3246_v14 }
 0xfc7   : > { %5208 = vrsqrt.f32 %v3290_v60  ;;  %v3361_v28 = vadd.f32 %v6854_v40, %v3339_v48  ;;  %v3340_v4 = vmul.f32 %v6846_v20, %v3318_v1 }
 0xfc8   : > { %v5201_v24 = vpop.eup %5200  ;;  %v3293_v51 = vadd.f32 1e-05, %v3277_v55  ;;  %v3292_v33 = vadd.f32 1e-05, %v3276_v59 }
 0xfc9   : > { %v3319_v2 = vmul.f32 %v5201_v24, %v6759_v54  ;;  %v3255_v7 = vpop.xlane.xlu1 %3254  ;;  %v3252_v44 = vpop.xlane.xlu0 %3251  ;;  %v3376_v11 = vpack.c.bf16 %v3361_v28, %v3360_v38  ;;  %v3362_v0 = vadd.f32 %v6854_v40, %v3340_v4 }
 0xfca   : > { %5210 = vrsqrt.f32 %v3293_v51  ;;  %v3279_v36 = vmul.f32 0.03125, %v3255_v7  ;;  %v3278_v18 = vmul.f32 0.03125, %v3252_v44 }
 0xfcb   : > { %v3341_v35 = vmul.f32 %v6846_v20, %v3319_v2  ;;  %5212 = vrsqrt.f32 %v3292_v33  ;;  %4587 = vmatprep.mubr.msk.bf16.mxu0 %vm505_vm0, %v3376_v11 }
 0xfcc   : > { %v5203_v16 = vpop.eup %5202  ;;  %v3295_v52 = vadd.f32 1e-05, %v3279_v36  ;;  %v3294_v34 = vadd.f32 1e-05, %v3278_v18 }
 0xfcd   : > { %v5205_v46 = vpop.eup %5204  ;;  %v3321_v50 = vmul.f32 %v5203_v16, %v6763_v62  ;;  %v3363_v54 = vadd.f32 %v6854_v40, %v3341_v35 }
 0xfce   : > { %v3320_v31 = vmul.f32 %v5205_v46, %v6768_v9  ;;  %5214 = vrsqrt.f32 %v3295_v52 }
 0xfcf   : > { %5216 = vrsqrt.f32 %v3294_v34  ;;  %v3377_v32 = vpack.c.bf16 %v3363_v54, %v3362_v0  ;;  %v3343_v41 = vmul.f32 %v6846_v20, %v3321_v50 }
 0xfd0   : > { %v5207_v30 = vpop.eup %5206  ;;  %v3342_v13 = vmul.f32 %v6846_v20, %v3320_v31 }
 0xfd1   : > { %v5209_v58 = vpop.eup %5208  ;;  %v3323_v21 = vmul.f32 %v5207_v30, %v6774_v56  ;;  %4588 = vmatmul.mubr.msk.bf16.vlgmr.msra.gmra.mrb[84].mxu0 %vm505_vm0, %v3377_v32  ;;  %v3365_v62 = vadd.f32 %v6854_v40, %v3343_v41  ;;  %v4905_v30 = vld [vmem:[%s7145_s12 + $0x8] sm:$0xff]  }
 0xfd2   : > { %v3322_v12 = vmul.f32 %v5209_v58, %v6780_v47  ;;  %v3364_v45 = vadd.f32 %v6854_v40, %v3342_v13 }
 0xfd3   : > { %v3345_v9 = vmul.f32 %v6846_v20, %v3323_v21 }
 0xfd4   : > { %v5211_v19 = vpop.eup %5210  ;;  %v3378_v10 = vpack.c.bf16 %v3365_v62, %v3364_v45  ;;  %v3344_v37 = vmul.f32 %v6846_v20, %v3322_v12  ;;  %v3531_v62 = vld [vmem:[%s6925_s4 + $0x18] sm:$0xff]  ;;  %v3528_v45 = vld [vmem:[%s6925_s4] sm:$0xff] }
 0xfd5   : > { %v5213_v63 = vpop.eup %5212  ;;  %v3325_v8 = vmul.f32 %v5211_v19, %v6786_v61  ;;  %v3367_v42 = vadd.f32 %v6854_v40, %v3345_v9 }
 0xfd6   : > { %v3324_v56 = vmul.f32 %v5213_v63, %v6792_v6  ;;  %4591 = vmatprep.mubr.msk.bf16.mxu0 %vm505_vm0, %v3378_v10  ;;  %v3366_v39 = vadd.f32 %v6854_v40, %v3344_v37  ;;  %v3529_v10 = vld [vmem:[%s6925_s4 + $0x8] sm:$0xff]  ;;  %v3530_v37 = vld [vmem:[%s6925_s4 + $0x10] sm:$0xff] }
 0xfd7   : > { %v3347_v47 = vmul.f32 %v6846_v20, %v3325_v8 }
 0xfd8   : > { %v5215_v15 = vpop.eup %5214  ;;  %v3379_v29 = vpack.c.bf16 %v3367_v42, %v3366_v39  ;;  %v3346_v5 = vmul.f32 %v6846_v20, %v3324_v56 }
 0xfd9   : > { %v5217_v17 = vpop.eup %5216  ;;  %v3327_v23 = vmul.f32 %v5215_v15, %v6798_v57  ;;  %v3369_v22 = vadd.f32 %v6854_v40, %v3347_v47 }
 0xfda   : > { %v3326_v61 = vmul.f32 %v5217_v17, %v6803_v26  ;;  %4592 = vmatmul.mubr.msk.bf16.gmra.mrb[88].mxu0 %vm505_vm0, %v3379_v29  ;;  %v3368_v6 = vadd.f32 %v6854_v40, %v3346_v5 }
 0xfdb   : > { %v3349_v3 = vmul.f32 %v6846_v20, %v3327_v23 }
 0xfdc   : > { %v3380_v60 = vpack.c.bf16 %v3369_v22, %v3368_v6  ;;  %v3348_v1 = vmul.f32 %v6846_v20, %v3326_v61  ;;  %v3535_v22 = vld [vmem:[%s6925_s4 + $0x38] sm:$0xff]  ;;  %v3532_v6 = vld [vmem:[%s6925_s4 + $0x20] sm:$0xff] }
 0xfdd   : > { %v3371_v53 = vadd.f32 %v6854_v40, %v3349_v3 }
 0xfde   : > { %4595 = vmatprep.mubr.msk.bf16.mxu0 %vm505_vm0, %v3380_v60  ;;  %v3370_v14 = vadd.f32 %v6854_v40, %v3348_v1  ;;  %v3533_v1 = vld [vmem:[%s6925_s4 + $0x28] sm:$0xff] }
 0xfe0   : > { %v3381_v57 = vpack.c.bf16 %v3371_v53, %v3370_v14  ;;  %v3534_v53 = vld [vmem:[%s6925_s4 + $0x30] sm:$0xff] }
 0xfe2   : > { %4596 = vmatmul.mubr.msk.bf16.gmra.mrb[92].mxu0 %vm505_vm0, %v3381_v57 }
 0xfec   : > { %v3258_v48 = vpop.xlane.xlu0 %3257 }
 0xfed   : > { %v3280_v26 = vmul.f32 0.03125, %v3258_v48 }
 0xfee   : > { %v3261_v55 = vpop.xlane.xlu1 %3260 }
 0xfef   : > { %v3296_v59 = vadd.f32 1e-05, %v3280_v26  ;;  %v3281_v38 = vmul.f32 0.03125, %v3261_v55 }
 0xff0   : > { %v3264_v28 = vpop.xlane.xlu0 %3263 }
 0xff1   : > { %5218 = vrsqrt.f32 %v3296_v59  ;;  %v3297_v24 = vadd.f32 1e-05, %v3281_v38  ;;  %v3282_v51 = vmul.f32 0.03125, %v3264_v28 }
 0xff2   : > { %v3267_v33 = vpop.xlane.xlu1 %3266 }
 0xff3   : > { %5220 = vrsqrt.f32 %v3297_v24  ;;  %v3298_v4 = vadd.f32 1e-05, %v3282_v51  ;;  %v3283_v2 = vmul.f32 0.03125, %v3267_v33 }
 0xff5   : > { %5222 = vrsqrt.f32 %v3298_v4  ;;  %v3299_v7 = vadd.f32 1e-05, %v3283_v2  ;;  %v3539_v4 = vld [vmem:[%s6925_s4 + $0x58] sm:$0xff] }
 0xff7   : > { %5224 = vrsqrt.f32 %v3299_v7  ;;  %v3536_v7 = vld [vmem:[%s6925_s4 + $0x40] sm:$0xff] }
 0xffb   : > { %v5219_v44 = vpop.eup %5218 }
 0xffc   : > { %v3328_v11 = vmul.f32 %v5219_v44, %v6820_v25 }
 0xffd   : > { %v5221_v36 = vpop.eup %5220 }
 0xffe   : > { %v3329_v18 = vmul.f32 %v5221_v36, %v6823_v43  ;;  %v3350_v35 = vmul.f32 %v6846_v20, %v3328_v11  ;;  %v3537_v36 = vld [vmem:[%s6925_s4 + $0x48] sm:$0xff] }
 0xfff   : > { %v5223_v16 = vpop.eup %5222 }
0x1000   : > { %v3330_v52 = vmul.f32 %v5223_v16, %v6828_v27  ;;  %v3351_v34 = vmul.f32 %v6846_v20, %v3329_v18  ;;  %v3372_v0 = vadd.f32 %v6854_v40, %v3350_v35  ;;  %v3538_v18 = vld [vmem:[%s6925_s4 + $0x50] sm:$0xff] }
0x1001   : > { %v5225_v46 = vpop.eup %5224 }
0x1002   : > { %v3331_v50 = vmul.f32 %v5225_v46, %v6834_v49  ;;  %v3373_v54 = vadd.f32 %v6854_v40, %v3351_v34  ;;  %v3352_v25 = vmul.f32 %v6846_v20, %v3330_v52  ;;  %v4904_v49 = vld [vmem:[%s7145_s12] sm:$0xff]  }
0x1003   : > { %4603 = vmatprep.subr.bf16.mxu1 %v4904_v49 }
0x1004   : > { %v3382_v31 = vpack.c.bf16 %v3373_v54, %v3372_v0  ;;  %v3353_v43 = vmul.f32 %v6846_v20, %v3331_v50  ;;  %v3374_v32 = vadd.f32 %v6854_v40, %v3352_v25  ;;  %4604 = vmatpush3.bf16.msra.mxu1 %v4904_v49  ;;  %v6918_v20 = vld [vmem:[%s7144_s11] ss:$0 sm:$0xff] }
0x1005   : > { %4605 = vmatprep.subr.bf16.mxu1 %v4905_v30 }
0x1006   : > { %4599 = vmatprep.mubr.msk.bf16.mxu0 %vm505_vm0, %v3382_v31  ;;  %v3375_v27 = vadd.f32 %v6854_v40, %v3353_v43 }
0x1008   : > { %v3383_v41 = vpack.c.bf16 %v3375_v27, %v3374_v32  ;;  %4606 = vmatpush3.bf16.msra.mxu1 %v4905_v30  ;;  %v3543_v32 = vld [vmem:[%s6925_s4 + $0x78] sm:$0xff] }
0x100a   : > { %4600 = vmatmul.mubr.msk.bf16.gmra.mrb[96].mxu0 %vm505_vm0, %v3383_v41  ;;  %v3540_v41 = vld [vmem:[%s6925_s4 + $0x60] sm:$0xff] }
0x10a4   : > { %v4589_v40 = vpop.f32.mrb[84].mxu0 }
0x10a5   : > { %v3465_v13 = vpop.f32.mrb[85].mxu0  ;;  %v6932_v12 = vadd.f32 %v4589_v40, %v6918_v20  ;;  %v3541_v40 = vld [vmem:[%s6925_s4 + $0x68] sm:$0xff] }
0x10a6   : > { %v6928_v58 = vadd.f32 %v6918_v20, %v3465_v13  ;;  %v4590_v21 = vpop.f32.mrb[86].mxu0  ;;  %v3542_v13 = vld [vmem:[%s6925_s4 + $0x70] sm:$0xff]  ;;  %s5292_s4 = smov 32  }
0x10a7   : > { %v6936_v9 = vadd.f32 %v4590_v21, %v6918_v20  ;;  %v3468_v19 = vpop.f32.mrb[87].mxu0  ;;  %v3546_v39 = vadd.f32 %v3530_v37, %v6932_v12 }
0x10a8   : > { %v6941_v63 = vadd.f32 %v6918_v20, %v3468_v19  ;;  %v3544_v42 = vadd.f32 %v3528_v45, %v6928_v58 }
0x10a9   : > { %v3547_v8 = vadd.f32 %v3531_v62, %v6936_v9 }
0x10aa   : > { %v3545_v56 = vadd.f32 %v3529_v10, %v6941_v63 }
0x10ab   : > { %v3561_v15 = vpack.c.bf16 %v3547_v8, %v3546_v39 }
0x10ac   : > { %v3560_v47 = vpack.c.bf16 %v3545_v56, %v3544_v42 }
0x10ad   : > { %v4593_v29 = vpop.f32.mrb[88].mxu0 }
0x10ae   : > { %v3481_v5 = vpop.f32.mrb[89].mxu0  ;;  %4607 = vmatprep.mubr.msk.bf16.mxu1 %vm505_vm0, %v3560_v47  ;;  %v6954_v61 = vadd.f32 %v4593_v29, %v6918_v20 }
0x10af   : > { %v6949_v17 = vadd.f32 %v6918_v20, %v3481_v5  ;;  %v4594_v23 = vpop.f32.mrb[90].mxu0  ;;  %4608 = vmatmul.mubr.msk.bf16.vlgmr.msra.gmra.mrb[76].mxu1 %vm505_vm0, %v3561_v15 }
0x10b0   : > { %v6958_v3 = vadd.f32 %v4594_v23, %v6918_v20  ;;  %v3484_v60 = vpop.f32.mrb[91].mxu0  ;;  %v3550_v55 = vadd.f32 %v3534_v53, %v6954_v61 }
0x10b1   : > { %v6963_v14 = vadd.f32 %v6918_v20, %v3484_v60  ;;  %v3548_v48 = vadd.f32 %v3532_v6, %v6949_v17 }
0x10b2   : > { %v3551_v57 = vadd.f32 %v3535_v22, %v6958_v3 }
0x10b3   : > { %v3549_v26 = vadd.f32 %v3533_v1, %v6963_v14 }
0x10b4   : > { %v3563_v28 = vpack.c.bf16 %v3551_v57, %v3550_v55 }
0x10b5   : > { %v3562_v59 = vpack.c.bf16 %v3549_v26, %v3548_v48  ;;  %v4597_v38 = vpop.f32.mrb[92].mxu0 }
0x10b6   : > { %v3497_v24 = vpop.f32.mrb[93].mxu0  ;;  %v6975_v2 = vadd.f32 %v4597_v38, %v6918_v20 }
0x10b7   : > { %v6970_v51 = vadd.f32 %v6918_v20, %v3497_v24  ;;  %v4598_v33 = vpop.f32.mrb[94].mxu0  ;;  %4611 = vmatprep.mubr.msk.bf16.mxu1 %vm505_vm0, %v3562_v59 }
0x10b8   : > { %v6979_v44 = vadd.f32 %v4598_v33, %v6918_v20  ;;  %v3500_v11 = vpop.f32.mrb[95].mxu0  ;;  %4612 = vmatmul.mubr.msk.bf16.gmra.mrb[80].mxu1 %vm505_vm0, %v3563_v28  ;;  %v3554_v46 = vadd.f32 %v3538_v18, %v6975_v2 }
0x10b9   : > { %v6985_v35 = vadd.f32 %v6918_v20, %v3500_v11  ;;  %v3552_v52 = vadd.f32 %v3536_v7, %v6970_v51 }
0x10ba   : > { %v3555_v16 = vadd.f32 %v3539_v4, %v6979_v44 }
0x10bb   : > { %v3553_v34 = vadd.f32 %v3537_v36, %v6985_v35 }
0x10bc   : > { %v3565_v0 = vpack.c.bf16 %v3555_v16, %v3554_v46 }
0x10bd   : > { %v3564_v50 = vpack.c.bf16 %v3553_v34, %v3552_v52 }
0x10bf   : > { %4615 = vmatprep.mubr.msk.bf16.mxu1 %vm505_vm0, %v3564_v50 }
0x10c0   : > { %4616 = vmatmul.mubr.msk.bf16.gmra.mrb[84].mxu1 %vm505_vm0, %v3565_v0 }
0x10dd   : > { %v4601_v54 = vpop.f32.mrb[96].mxu0 }
0x10de   : > { %v3513_v25 = vpop.f32.mrb[97].mxu0  ;;  %v6998_v27 = vadd.f32 %v4601_v54, %v6918_v20 }
0x10df   : > { %v6994_v31 = vadd.f32 %v6918_v20, %v3513_v25  ;;  %v4602_v43 = vpop.f32.mrb[98].mxu0 }
0x10e0   : > { %v7002_v49 = vadd.f32 %v4602_v43, %v6918_v20  ;;  %v3516_v30 = vpop.f32.mrb[99].mxu0  ;;  %v3558_v10 = vadd.f32 %v3542_v13, %v6998_v27 }
0x10e1   : > { %v7007_v21 = vadd.f32 %v6918_v20, %v3516_v30  ;;  %v3556_v45 = vadd.f32 %v3540_v41, %v6994_v31  ;;  %v4068_v20 = vld [vmem:[%s7146_s13] ss:$0 sm:$0xff] }
0x10e2   : > { %v3559_v62 = vadd.f32 %v3543_v32, %v7002_v49 }
0x10e3   : > { %v3557_v19 = vadd.f32 %v3541_v40, %v7007_v21 }
0x10e4   : > { %v3567_v8 = vpack.c.bf16 %v3559_v62, %v3558_v10 }
0x10e5   : > { %v3566_v37 = vpack.c.bf16 %v3557_v19, %v3556_v45 }
0x10e7   : > { %4619 = vmatprep.mubr.msk.bf16.mxu1 %vm505_vm0, %v3566_v37 }
0x10e8   : > { %4620 = vmatmul.mubr.msk.bf16.gmra.mrb[88].mxu1 %vm505_vm0, %v3567_v8 }
0x1182   : > { %v4609_v42 = vpop.f32.mrb[76].mxu1 }
0x1183   : > { %v3649_v56 = vpop.f32.mrb[77].mxu1  ;;  %v3658_v47 = vadd.f32 %v4609_v42, %v4068_v20 }
0x1184   : > { %v4610_v39 = vpop.f32.mrb[78].mxu1  ;;  %v3650_v5 = vadd.f32 %v4068_v20, %v3649_v56 }
0x1185   : > { %v3661_v15 = vadd.f32 %v4610_v39, %v4068_v20  ;;  %v3652_v29 = vpop.f32.mrb[79].mxu1 }
0x1186   : > { %v3653_v23 = vadd.f32 %v4068_v20, %v3652_v29 }
0x1187   : > { %v4858_v22 = vpack.i.bf16 %v3661_v15, %v3658_v47 }
0x1188   : > { %v4863_v6 = vpack.i.bf16 %v3653_v23, %v3650_v5 }
0x1189   : > { %4859 = vrot.lane.b32.xlu1 %v4858_v22, %s5292_s4 }
0x118a   : > { %4864 = vrot.lane.b32.xlu0 %v4863_v6, %s5292_s4 }
0x118b   : > { %v4613_v60 = vpop.f32.mrb[80].mxu1 }
0x118c   : > { %v3665_v1 = vpop.f32.mrb[81].mxu1  ;;  %v3674_v57 = vadd.f32 %v4613_v60, %v4068_v20 }
0x118d   : > { %v4614_v53 = vpop.f32.mrb[82].mxu1  ;;  %v3666_v55 = vadd.f32 %v4068_v20, %v3665_v1 }
0x118e   : > { %v3677_v48 = vadd.f32 %v4614_v53, %v4068_v20  ;;  %v3668_v26 = vpop.f32.mrb[83].mxu1 }
0x118f   : > { %v3669_v59 = vadd.f32 %v4068_v20, %v3668_v26 }
0x1190   : > { %v4868_v38 = vpack.i.bf16 %v3677_v48, %v3674_v57 }
0x1191   : > { %v4873_v28 = vpack.i.bf16 %v3669_v59, %v3666_v55 }
0x1192   : > { %4869 = vrot.lane.b32.xlu1 %v4868_v38, %s5292_s4 }
0x1193   : > { %v4617_v24 = vpop.f32.mrb[84].mxu1 }
0x1194   : > { %v3681_v33 = vpop.f32.mrb[85].mxu1  ;;  %v3690_v7 = vadd.f32 %v4617_v24, %v4068_v20 }
0x1195   : > { %v4618_v4 = vpop.f32.mrb[86].mxu1  ;;  %v3682_v18 = vadd.f32 %v4068_v20, %v3681_v33 }
0x1196   : > { %v3693_v11 = vadd.f32 %v4618_v4, %v4068_v20  ;;  %4874 = vrot.lane.b32.xlu1 %v4873_v28, %s5292_s4  ;;  %v3684_v36 = vpop.f32.mrb[87].mxu1 }
0x1197   : > { %v3685_v16 = vadd.f32 %v4068_v20, %v3684_v36 }
0x1198   : > { %v4878_v52 = vpack.i.bf16 %v3693_v11, %v3690_v7 }
0x1199   : > { %v4883_v34 = vpack.i.bf16 %v3685_v16, %v3682_v18 }
0x119a   : > { %4879 = vrot.lane.b32.xlu1 %v4878_v52, %s5292_s4 }
0x119b   : > { %4884 = vrot.lane.b32.xlu0 %v4883_v34, %s5292_s4 }
0x11bb   : > { %v4621_v46 = vpop.f32.mrb[88].mxu1 }
0x11bc   : > { %v3697_v50 = vpop.f32.mrb[89].mxu1  ;;  %v3706_v54 = vadd.f32 %v4621_v46, %v4068_v20 }
0x11bd   : > { %v4622_v0 = vpop.f32.mrb[90].mxu1  ;;  %v3698_v32 = vadd.f32 %v4068_v20, %v3697_v50 }
0x11be   : > { %v3709_v25 = vadd.f32 %v4622_v0, %v4068_v20  ;;  %v3700_v43 = vpop.f32.mrb[91].mxu1 }
0x11bf   : > { %v3701_v41 = vadd.f32 %v4068_v20, %v3700_v43 }
0x11c0   : > { %v4893_v30 = vpack.i.bf16 %v3709_v25, %v3706_v54 }
0x11c1   : > { %v4888_v40 = vpack.i.bf16 %v3701_v41, %v3698_v32 }
0x11c2   : > { %4894 = vrot.lane.b32.xlu1 %v4893_v30, %s5292_s4 }
0x11c3   : > { %4889 = vrot.lane.b32.xlu0 %v4888_v40, %s5292_s4 }
0x11fb   : > { %v4860_v13 = vpop.permute.xlu1 %4859 }
0x11fc   : > { %v4862_v62 = vunpack.i.h.bf16 %v4860_v13  ;;  %v4861_v45 = vunpack.i.l.bf16 %v4860_v13  ;;  %v4865_v19 = vpop.permute.xlu0 %4864 }
0x11fd   : > { %v4867_v10 = vunpack.i.h.bf16 %v4865_v19  ;;  %v4866_v37 = vunpack.i.l.bf16 %v4865_v19 }
0x11fe   : > { %v3779_v8 = vsel %vm505_vm0, %v6936_v9, %v4862_v62  ;;  %v3778_v42 = vsel %vm505_vm0, %v6932_v12, %v4861_v45 }
0x11ff   : > { %v4105_v20 = vpack.c.bf16 %v3779_v8, %v3779_v8  ;;  %v4104_v56 = vpack.c.bf16 %v3778_v42, %v3778_v42  ;;  %v3777_v39 = vsel %vm505_vm0, %v6941_v63, %v4867_v10  ;;  %v3776_v47 = vsel %vm505_vm0, %v6928_v58, %v4866_v37 }
0x1200   : > { %v4103_v15 = vpack.c.bf16 %v3777_v39, %v3777_v39  ;;  %v4102_v29 = vpack.c.bf16 %v3776_v47, %v3776_v47 }
0x1201   : > { %3859 = vst.msk [vmem:[%s7037_s28 + $0x8] sm:$0xf] %vm3856_vm4, %v4104_v56  ;;  %3860 = vst.msk [vmem:[%s7037_s28 + $0xc] sm:$0xf] %vm3856_vm4, %v4105_v20 }
0x1202   : > { %3857 = vst.msk [vmem:[%s7037_s28] sm:$0xf] %vm3856_vm4, %v4102_v29  ;;  %3858 = vst.msk [vmem:[%s7037_s28 + $0x4] sm:$0xf] %vm3856_vm4, %v4103_v15 }
0x1204   : > { %v4870_v12 = vpop.permute.xlu1 %4869 }
0x1205   : > { %v4872_v58 = vunpack.i.h.bf16 %v4870_v12  ;;  %v4871_v9 = vunpack.i.l.bf16 %v4870_v12 }
0x1207   : > { %v3783_v63 = vsel %vm505_vm0, %v6958_v3, %v4872_v58  ;;  %v3782_v5 = vsel %vm505_vm0, %v6954_v61, %v4871_v9 }
0x1208   : > { %v4109_v23 = vpack.c.bf16 %v3783_v63, %v3783_v63  ;;  %v4108_v22 = vpack.c.bf16 %v3782_v5, %v3782_v5  ;;  %v4875_v6 = vpop.permute.xlu1 %4874 }
0x1209   : > { %v4877_v60 = vunpack.i.h.bf16 %v4875_v6  ;;  %v4876_v1 = vunpack.i.l.bf16 %v4875_v6 }
0x120a   : > { %3863 = vst.msk [vmem:[%s7037_s28 + $0x18] sm:$0xf] %vm3856_vm4, %v4108_v22  ;;  %3864 = vst.msk [vmem:[%s7037_s28 + $0x1c] sm:$0xf] %vm3856_vm4, %v4109_v23 }
0x120b   : > { %v3781_v53 = vsel %vm505_vm0, %v6963_v14, %v4877_v60  ;;  %v3780_v3 = vsel %vm505_vm0, %v6949_v17, %v4876_v1 }
0x120c   : > { %v4107_v57 = vpack.c.bf16 %v3781_v53, %v3781_v53  ;;  %v4106_v48 = vpack.c.bf16 %v3780_v3, %v3780_v3  ;;  %v4880_v61 = vpop.permute.xlu1 %4879 }
0x120d   : > { %v4882_v26 = vunpack.i.h.bf16 %v4880_v61  ;;  %v4881_v55 = vunpack.i.l.bf16 %v4880_v61  ;;  %v4885_v59 = vpop.permute.xlu0 %4884 }
0x120e   : > { %3861 = vst.msk [vmem:[%s7037_s28 + $0x10] sm:$0xf] %vm3856_vm4, %v4106_v48  ;;  %3862 = vst.msk [vmem:[%s7037_s28 + $0x14] sm:$0xf] %vm3856_vm4, %v4107_v57  ;;  %v4887_v38 = vunpack.i.h.bf16 %v4885_v59  ;;  %v4886_v28 = vunpack.i.l.bf16 %v4885_v59 }
0x120f   : > { %v3787_v14 = vsel %vm505_vm0, %v6979_v44, %v4882_v26  ;;  %v3786_v17 = vsel %vm505_vm0, %v6975_v2, %v4881_v55 }
0x1210   : > { %v4113_v24 = vpack.c.bf16 %v3787_v14, %v3787_v14  ;;  %v4112_v33 = vpack.c.bf16 %v3786_v17, %v3786_v17  ;;  %v3785_v4 = vsel %vm505_vm0, %v6985_v35, %v4887_v38  ;;  %v3784_v7 = vsel %vm505_vm0, %v6970_v51, %v4886_v28 }
0x1211   : > { %v4111_v11 = vpack.c.bf16 %v3785_v4, %v3785_v4  ;;  %v4110_v36 = vpack.c.bf16 %v3784_v7, %v3784_v7 }
0x1212   : > { %3867 = vst.msk [vmem:[%s7037_s28 + $0x28] sm:$0xf] %vm3856_vm4, %v4112_v33  ;;  %3868 = vst.msk [vmem:[%s7037_s28 + $0x2c] sm:$0xf] %vm3856_vm4, %v4113_v24 }
0x1213   : > { %3865 = vst.msk [vmem:[%s7037_s28 + $0x20] sm:$0xf] %vm3856_vm4, %v4110_v36  ;;  %3866 = vst.msk [vmem:[%s7037_s28 + $0x24] sm:$0xf] %vm3856_vm4, %v4111_v11 }
0x1234   : > { %v4895_v2 = vpop.permute.xlu1 %4894 }
0x1235   : > { %v4897_v44 = vunpack.i.h.bf16 %v4895_v2  ;;  %v4896_v35 = vunpack.i.l.bf16 %v4895_v2  ;;  %v4890_v18 = vpop.permute.xlu0 %4889 }
0x1236   : > { %v4892_v51 = vunpack.i.h.bf16 %v4890_v18  ;;  %v4891_v16 = vunpack.i.l.bf16 %v4890_v18 }
0x1237   : > { %v3791_v52 = vsel %vm505_vm0, %v7002_v49, %v4897_v44  ;;  %v3790_v34 = vsel %vm505_vm0, %v6998_v27, %v4896_v35 }
0x1238   : > { %v4117_v46 = vpack.c.bf16 %v3791_v52, %v3791_v52  ;;  %v4116_v50 = vpack.c.bf16 %v3790_v34, %v3790_v34  ;;  %v3789_v0 = vsel %vm505_vm0, %v7007_v21, %v4892_v51  ;;  %v3788_v54 = vsel %vm505_vm0, %v6994_v31, %v4891_v16 }
0x1239   : > { %v4115_v25 = vpack.c.bf16 %v3789_v0, %v3789_v0  ;;  %v4114_v43 = vpack.c.bf16 %v3788_v54, %v3788_v54 }
0x123a   : > { %3871 = vst.msk [vmem:[%s7037_s28 + $0x38] sm:$0xf] %vm3856_vm4, %v4116_v50  ;;  %3872 = vst.msk [vmem:[%s7037_s28 + $0x3c] sm:$0xf] %vm3856_vm4, %v4117_v46 }
0x123b   : > { %3869 = vst.msk [vmem:[%s7037_s28 + $0x30] sm:$0xf] %vm3856_vm4, %v4114_v43  ;;  %3870 = vst.msk [vmem:[%s7037_s28 + $0x34] sm:$0xf] %vm3856_vm4, %v4115_v25 }
0x123c   : > { %s4118_s21 = sshll.u32 %s5396_s17, 9  ;;  %s3903_s27 = sshll.u32 %s7037_s28, 4  ;;  %s3904_s27 = int_to_ptr.vmem [resolvable:$true] %s3903_s27 }
0x123d   : > { %s3886_s2 = scalar_lea.hbm %s7147_s14, %s4118_s21  ;;  %s5293_s3 = smov 512  }
0x123e   : > { %4671 = sst [smem:[#allocation5]] (%p5413_p5), %s5293_s3  ;;  %s5294_s0 = smov 1024  }
0x123f   : > { %4672 = sst [smem:[#allocation5 + $0x1]] (%p5413_p5), %s5294_s0  ;;  %s5295_s4 = smov 8  }
0x1240   : > { %4673 = sst [smem:[#allocation5 + $0x2]] (%p5413_p5), %s5295_s4  ;;  %s5296_s25 = smov 64  }
0x1241   : > { %4674 = sst [smem:[#allocation5 + $0x3]] (%p5413_p5), %s5296_s25  ;;  %s5297_s17 = smov 4  }
0x1242   : > { %4675 = sst [smem:[#allocation5 + $0x4]] (%p5413_p5), %s5296_s25  ;;  %s5298_s28 = smov [#allocation4]  }
0x1243   : > { %4676 = sst [smem:[#allocation5 + $0x5]] (%p5413_p5), %s5297_s17  ;;  %s5299_s21 = smov 0  }
0x1244   : > { %4677 = dma.general (%p5413_p5), %s3904_s27, 1024, %s3886_s2, %s3874_s26, %s5298_s28, [#allocation5], %s5299_s21, 0  }
0x1245 PF: > { %p4683_p11 = scmp.ge.s32.totalorder %s5276_s16, 2  ;;  %s3931_s18 = sand.u32 1, %s5264_s29  }
0x1246   : > { %s3932_s20 = scalar_lea.sflag [#allocation3], %s3931_s18 }
0x1247   : > { %p4680_p12 = pnand %p4683_p11, %p5417_p6 }
0x1249   : > { %5259 = dma.done.wait (!%p4680_p12), %s3932_s20, 1024  }
0x124a   : > { %5261 = vsyncadd (!%p4680_p12), %s3932_s20, 4294966272  ;;  %p24_p13 = scmp.ge.s32.totalorder %s5400_s19, 4   ;;  %s7220_s29 = smov %s5268_s30 }
0x124b   : > { %s7221_s30 = smov %s5272_s15  ;;  %s7222_s15 = smov %s5411_s22 }
0x124c   : > { %s7223_s16 = smov %s5400_s19  ;;  %26 = sbr.rel (!%p24_p13) target bundleno = 8 (0x8), region = 119 }
0x1253   :  { %3937 = vsyncpa [#allocation3], 1 }
0x1254   :  { %3939 = vsyncpa [#allocation3 + $0x1], 1 }

</bundles_post_ra>
